<compile_context>
chip_gen: v7x
topology: tpu7x:2x2x1
jax: 0.10.0
libtpu: 0.0.40
codegen_flags: <defaults>
</compile_context>

<pallas_src>
import functools

import jax
import jax.numpy as jnp
from jax.experimental import pallas as pl
from jax.experimental.pallas import tpu as pltpu

_LANE = 128
_TB_ALIGN = 1024  # output tile is (8, tb//8); tb % 1024 == 0 keeps tb//8 % 128 == 0


def _round_up(x, m):
    return (x + m - 1) // m * m


def _make_kernel(num_layers, activation, out_rows=8):
    if activation == "relu":
        act = lambda v: jnp.maximum(v, 0.0)
    elif activation == "tanh":
        act = jnp.tanh
    elif activation == "sigmoid":
        act = jax.nn.sigmoid
    else:
        raise ValueError(f"unsupported activation: {activation!r}")

    def kernel(*refs):
        # refs = (x, w0, b0, ..., w{L-1}, b{L-1}, wv, bv, out)
        x_ref = refs[0]
        wv_ref = refs[1 + 2 * num_layers]
        bv_ref = refs[2 + 2 * num_layers]     # (1,1) scalar head bias in SMEM
        out_ref = refs[-1]

        h = x_ref[...].astype(jnp.float32)                       # [TB, state_dim]
        for li in range(num_layers):
            w_ref = refs[1 + 2 * li]
            b_ref = refs[2 + 2 * li]
            # MXU consumes operands in the (bf16 by default) weight dtype;
            # accumulation is f32.  Bias add + activation stay f32 (VPU/EUP),
            # safe on v5e (no bf16 VPU/EUP there).
            z = jnp.dot(h.astype(w_ref.dtype), w_ref[...],
                        preferred_element_type=jnp.float32)
            h = act(z + b_ref[...].astype(jnp.float32))          # [TB, dout]

        # Value head: VPU multiply + XLU lane reduce against the [1, H] weight
        # row (no degenerate N=1 MXU matmul).  Splitting the leading dim of h
        # is a tile-aligned, data-movement-free reshape (TB//8 % 128 == 0), so
        # the reduce writes the (8, TB//8) output tile directly.
        tb, hd = h.shape
        wv = wv_ref[...].astype(jnp.float32)                     # [1, H]
        h3 = h.reshape(out_rows, tb // out_rows, hd)             # [8, TB//8, H]
        value = jnp.sum(h3 * wv, axis=-1) + bv_ref[0, 0]         # [8, TB//8]
        out_ref[...] = value.astype(out_ref.dtype)

    return kernel


def _pad_hidden_to_lanes(params, num_layers, state_dim, matmul_dtype):
    """Zero-pad hidden widths up to multiples of 128 lanes (numerically exact:
    padded activation columns multiply zero rows of the next weight / zero wv
    entries) and cast hidden-layer weights to the MXU dtype (halves the weight
    DMA for bf16).  The input state_dim is left unpadded."""
    out = {}
    prev = state_dim
    for i in range(num_layers):
        w, b = params[f"w{i}"], params[f"b{i}"]
        din, dout = w.shape
        dout_p = _round_up(dout, _LANE)
        out[f"w{i}"] = jnp.pad(
            w, ((0, prev - din), (0, dout_p - dout))).astype(matmul_dtype)
        out[f"b{i}"] = jnp.pad(
            b, ((0, 0), (0, dout_p - dout))).astype(jnp.float32)
        prev = dout_p
    wv = params["wv"]
    out["wv"] = jnp.pad(wv, ((0, 0), (0, prev - wv.shape[1]))).astype(jnp.float32)
    out["bv"] = params["bv"].astype(jnp.float32)
    return out


def state_value_forward(x, params, *, activation="relu", block_batch=4096,
                        matmul_dtype=jnp.bfloat16,
                        batch_dim_semantics="parallel"):
    """Fused StateValue forward.

    params: w{i}: [in, out], b{i}: [1, out], wv: [1, H], bv: [1, 1].
    On v7x pass batch_dim_semantics=pltpu.CORE_PARALLEL to shard the batch
    grid across both TensorCores.
    """
    B, state_dim = x.shape
    num_layers = sum(1 for k in params if k.startswith("w") and k != "wv")
    assert block_batch % _TB_ALIGN == 0, "block_batch must be a multiple of 1024"

    # Batch tile: multiple of 1024 so the (8, tb//8) output tile is
    # (8,128)-aligned; capped so the double-buffered x tile stays <= ~8 MiB
    # (relevant only for very large state_dim).
    max_tb = max(_TB_ALIGN,
                 ((8 << 20) // max(1, 2 * state_dim * x.dtype.itemsize))
                 // _TB_ALIGN * _TB_ALIGN)
    tb = block_batch if B >= block_batch else _round_up(max(B, 1), _TB_ALIGN)
    tb = min(tb, max_tb)
    b_pad = _round_up(B, tb)
    n_tiles = b_pad // tb
    if b_pad != B:
        x = jnp.pad(x, ((0, b_pad - B), (0, 0)))

    p = _pad_hidden_to_lanes(params, num_layers, state_dim, matmul_dtype)

    args = [x]
    in_specs = [pl.BlockSpec((tb, state_dim), lambda i: (i, 0))]
    for li in range(num_layers):
        w, b = p[f"w{li}"], p[f"b{li}"]
        args += [w, b]
        # Tiny full-array blocks with constant index maps: stay resident in
        # VMEM and are reused every grid step.
        in_specs += [pl.BlockSpec(w.shape, lambda i: (0, 0)),
                     pl.BlockSpec(b.shape, lambda i: (0, 0))]
    args += [p["wv"], p["bv"]]
    in_specs += [pl.BlockSpec(p["wv"].shape, lambda i: (0, 0)),
                 pl.BlockSpec(memory_space=pltpu.MemorySpace.SMEM)]  # scalar bias

    # Explicit scoped-VMEM budget: double-buffered x/out tiles + resident
    # weights + f32 activation temporaries, with headroom.  The explicit limit
    # keeps v5e's 16 MiB default from binding while staying under v7x's 64 MiB
    # physical VMEM.
    max_w = max([p[f"w{i}"].shape[1] for i in range(num_layers)] + [state_dim])
    weight_bytes = sum(a.size * a.dtype.itemsize for a in p.values())
    est = (2 * tb * state_dim * x.dtype.itemsize
           + 2 * 8 * (tb // 8) * 4
           + 2 * weight_bytes
           + 6 * tb * max_w * 4)
    vmem_limit = int(min(60 << 20, max(32 << 20, 3 * est // 2)))

    out = pl.pallas_call(
        _make_kernel(num_layers, activation),
        out_shape=jax.ShapeDtypeStruct((8 * n_tiles, tb // 8), jnp.float32),
        grid=(n_tiles,),
        in_specs=in_specs,
        out_specs=pl.BlockSpec((8, tb // 8), lambda i: (i, 0)),  # dense (8,128k) tile
        compiler_params=pltpu.CompilerParams(
            dimension_semantics=(batch_dim_semantics,),
            vmem_limit_bytes=vmem_limit),
    )(*args)

    # (8*n_tiles, tb//8) dense tiles -> module's (B, 1)
    return out.reshape(n_tiles, 8, tb // 8).reshape(-1)[:B].reshape(B, 1)


def init_state_value_params(key, state_dim, hidden_size=(64, 64, 64)):
    """Mirrors torch.nn.Linear default init U(-1/sqrt(fan_in), +1/sqrt(fan_in)),
    with value_head.weight *= 0.1 and value_head.bias = 0.
    Hidden weights stored [in, out]; value-head weight stored as a [1, H] row."""
    params = {}
    dims = [state_dim] + list(hidden_size)
    keys = jax.random.split(key, 2 * len(hidden_size) + 1)
    ki = 0
    for i, (din, dout) in enumerate(zip(dims[:-1], dims[1:])):
        bound = 1.0 / (din ** 0.5)
        params[f"w{i}"] = jax.random.uniform(
            keys[ki], (din, dout), jnp.float32, -bound, bound)
        ki += 1
        params[f"b{i}"] = jax.random.uniform(
            keys[ki], (1, dout), jnp.float32, -bound, bound)
        ki += 1
    din = dims[-1]
    bound = 1.0 / (din ** 0.5)
    params["wv"] = 0.1 * jax.random.uniform(
        keys[ki], (1, din), jnp.float32, -bound, bound)
    params["bv"] = jnp.zeros((1, 1), jnp.float32)
    return params


def state_value_reference(x, params, *, activation="relu",
                          matmul_dtype=jnp.float32):
    """Pure-JAX reference mirroring the kernel's numerics (matmul operands in
    matmul_dtype, f32 accumulation, f32 bias/activation/value head)."""
    act = {"relu": lambda v: jnp.maximum(v, 0.0),
           "tanh": jnp.tanh,
           "sigmoid": jax.nn.sigmoid}[activation]
    num_layers = sum(1 for k in params if k.startswith("w") and k != "wv")
    h = x.astype(jnp.float32)
    for i in range(num_layers):
        z = jnp.dot(h.astype(matmul_dtype),
                    params[f"w{i}"].astype(matmul_dtype),
                    preferred_element_type=jnp.float32)
        h = act(z + params[f"b{i}"].astype(jnp.float32))
    wv = params["wv"].astype(jnp.float32)
    return (jnp.sum(h * wv, axis=-1, keepdims=True)
            + params["bv"].astype(jnp.float32))


if __name__ == "__main__":
    key = jax.random.PRNGKey(0)
    k_param, k_x1, k_x2 = jax.random.split(key, 3)

    state_dim = 32
    hidden = (64, 64, 64)
    params = init_state_value_params(k_param, state_dim, hidden)

    # Small batch (single-tile path).
    x_small = jax.random.normal(k_x1, (8, state_dim), jnp.float32)
    fwd = jax.jit(functools.partial(state_value_forward, activation="relu"))
    v_small = jax.block_until_ready(fwd(x_small, params))
    ref_small = state_value_reference(x_small, params, activation="relu",
                                      matmul_dtype=jnp.bfloat16)
    assert v_small.shape == (8, 1), v_small.shape
    err_s = float(jnp.max(jnp.abs(v_small - ref_small)))
    assert jnp.allclose(v_small, ref_small, atol=1e-3, rtol=1e-3), f"max err {err_s}"

    # Larger batch exercising n_tiles > 1 and batch padding.
    fwd_mt = jax.jit(functools.partial(state_value_forward, activation="relu",
                                       block_batch=1024))
    x_big = jax.random.normal(k_x2, (2500, state_dim), jnp.float32)
    v_big = jax.block_until_ready(fwd_mt(x_big, params))
    ref_big = state_value_reference(x_big, params, activation="relu",
                                    matmul_dtype=jnp.bfloat16)
    assert v_big.shape == (2500, 1), v_big.shape
    err_b = float(jnp.max(jnp.abs(v_big - ref_big)))
    assert jnp.allclose(v_big, ref_big, atol=1e-3, rtol=1e-3), f"max err {err_b}"

    print("KERNEL_OK")
</pallas_src>

<mosaic_0001>
module attributes {stable_mosaic.version = 11 : i64} {
  func.func @kernel(%arg0: i32, %arg1: memref<1024x32xf32, #tpu.memory_space<vmem>>, %arg2: memref<32x128xbf16, #tpu.memory_space<vmem>>, %arg3: memref<1x128xf32, #tpu.memory_space<vmem>>, %arg4: memref<128x128xbf16, #tpu.memory_space<vmem>>, %arg5: memref<1x128xf32, #tpu.memory_space<vmem>>, %arg6: memref<128x128xbf16, #tpu.memory_space<vmem>>, %arg7: memref<1x128xf32, #tpu.memory_space<vmem>>, %arg8: memref<1x128xf32, #tpu.memory_space<vmem>>, %arg9: memref<1x1xf32, #tpu.memory_space<smem>>, %arg10: memref<8x128xf32, #tpu.memory_space<vmem>>) attributes {dimension_semantics = [#tpu.dimension_semantics<parallel>], iteration_bounds = array<i64: 1>, scalar_prefetch = 0 : i64, scratch_operands = 0 : i64, tpu.core_type = #tpu.core_type<tc>, window_params = [{transform_indices = @transform_0, window_bounds = array<i64: 1024, 32>}, {pipeline_mode = #tpu.pipeline_mode<synchronous>, transform_indices = @transform_1, window_bounds = array<i64: 32, 128>}, {pipeline_mode = #tpu.pipeline_mode<synchronous>, transform_indices = @transform_2, window_bounds = array<i64: 1, 128>}, {pipeline_mode = #tpu.pipeline_mode<synchronous>, transform_indices = @transform_3, window_bounds = array<i64: 128, 128>}, {pipeline_mode = #tpu.pipeline_mode<synchronous>, transform_indices = @transform_4, window_bounds = array<i64: 1, 128>}, {pipeline_mode = #tpu.pipeline_mode<synchronous>, transform_indices = @transform_5, window_bounds = array<i64: 128, 128>}, {pipeline_mode = #tpu.pipeline_mode<synchronous>, transform_indices = @transform_6, window_bounds = array<i64: 1, 128>}, {pipeline_mode = #tpu.pipeline_mode<synchronous>, transform_indices = @transform_7, window_bounds = array<i64: 1, 128>}, {transform_indices = @transform_8, window_bounds = array<i64: 1, 1>}, {transform_indices = @transform_9, window_bounds = array<i64: 8, 128>}]} {
    %c0 = arith.constant 0 : index
    %c0_0 = arith.constant 0 : index
    %0 = vector.load %arg1[%c0, %c0_0] : memref<1024x32xf32, #tpu.memory_space<vmem>>, vector<1024x32xf32>
    %1 = arith.truncf %0 : vector<1024x32xf32> to vector<1024x32xbf16>
    %c0_1 = arith.constant 0 : index
    %c0_2 = arith.constant 0 : index
    %2 = vector.load %arg2[%c0_1, %c0_2] : memref<32x128xbf16, #tpu.memory_space<vmem>>, vector<32x128xbf16>
    %cst = arith.constant dense<0.000000e+00> : vector<1024x128xf32>
    %3 = tpu.matmul %1, %2, %cst {dimension_numbers = #tpu.dot_dimension_numbers<[1], [0], [0], [1], [0, 0, 1, 1], [], []>} : vector<1024x32xbf16>, vector<32x128xbf16>, vector<1024x128xf32> -> vector<1024x128xf32>
    %c0_3 = arith.constant 0 : index
    %c0_4 = arith.constant 0 : index
    %4 = vector.load %arg3[%c0_3, %c0_4] : memref<1x128xf32, #tpu.memory_space<vmem>>, vector<1x128xf32>
    %5 = vector.broadcast %4 : vector<1x128xf32> to vector<1024x128xf32>
    %6 = arith.addf %3, %5 : vector<1024x128xf32>
    %cst_5 = arith.constant 0.000000e+00 : f32
    %7 = vector.broadcast %cst_5 : f32 to vector<1024x128xf32>
    %8 = arith.maximumf %6, %7 : vector<1024x128xf32>
    %9 = arith.truncf %8 : vector<1024x128xf32> to vector<1024x128xbf16>
    %c0_6 = arith.constant 0 : index
    %c0_7 = arith.constant 0 : index
    %10 = vector.load %arg4[%c0_6, %c0_7] : memref<128x128xbf16, #tpu.memory_space<vmem>>, vector<128x128xbf16>
    %cst_8 = arith.constant dense<0.000000e+00> : vector<1024x128xf32>
    %11 = tpu.matmul %9, %10, %cst_8 {dimension_numbers = #tpu.dot_dimension_numbers<[1], [0], [0], [1], [0, 0, 1, 1], [], []>} : vector<1024x128xbf16>, vector<128x128xbf16>, vector<1024x128xf32> -> vector<1024x128xf32>
    %c0_9 = arith.constant 0 : index
    %c0_10 = arith.constant 0 : index
    %12 = vector.load %arg5[%c0_9, %c0_10] : memref<1x128xf32, #tpu.memory_space<vmem>>, vector<1x128xf32>
    %13 = vector.broadcast %12 : vector<1x128xf32> to vector<1024x128xf32>
    %14 = arith.addf %11, %13 : vector<1024x128xf32>
    %cst_11 = arith.constant 0.000000e+00 : f32
    %15 = vector.broadcast %cst_11 : f32 to vector<1024x128xf32>
    %16 = arith.maximumf %14, %15 : vector<1024x128xf32>
    %17 = arith.truncf %16 : vector<1024x128xf32> to vector<1024x128xbf16>
    %c0_12 = arith.constant 0 : index
    %c0_13 = arith.constant 0 : index
    %18 = vector.load %arg6[%c0_12, %c0_13] : memref<128x128xbf16, #tpu.memory_space<vmem>>, vector<128x128xbf16>
    %cst_14 = arith.constant dense<0.000000e+00> : vector<1024x128xf32>
    %19 = tpu.matmul %17, %18, %cst_14 {dimension_numbers = #tpu.dot_dimension_numbers<[1], [0], [0], [1], [0, 0, 1, 1], [], []>} : vector<1024x128xbf16>, vector<128x128xbf16>, vector<1024x128xf32> -> vector<1024x128xf32>
    %c0_15 = arith.constant 0 : index
    %c0_16 = arith.constant 0 : index
    %20 = vector.load %arg7[%c0_15, %c0_16] : memref<1x128xf32, #tpu.memory_space<vmem>>, vector<1x128xf32>
    %21 = vector.broadcast %20 : vector<1x128xf32> to vector<1024x128xf32>
    %22 = arith.addf %19, %21 : vector<1024x128xf32>
    %cst_17 = arith.constant 0.000000e+00 : f32
    %23 = vector.broadcast %cst_17 : f32 to vector<1024x128xf32>
    %24 = arith.maximumf %22, %23 : vector<1024x128xf32>
    %c0_18 = arith.constant 0 : index
    %c0_19 = arith.constant 0 : index
    %25 = vector.load %arg8[%c0_18, %c0_19] : memref<1x128xf32, #tpu.memory_space<vmem>>, vector<1x128xf32>
    %26 = vector.shape_cast %24 : vector<1024x128xf32> to vector<8x128x128xf32>
    %27 = vector.shape_cast %25 : vector<1x128xf32> to vector<1x1x128xf32>
    %28 = vector.broadcast %27 : vector<1x1x128xf32> to vector<8x128x128xf32>
    %29 = arith.mulf %26, %28 : vector<8x128x128xf32>
    %cst_20 = arith.constant dense<0.000000e+00> : vector<8x128xf32>
    %30 = vector.multi_reduction <add>, %29, %cst_20 [2] : vector<8x128x128xf32> to vector<8x128xf32>
    %c0_21 = arith.constant 0 : index
    %c0_22 = arith.constant 0 : index
    %31 = memref.load %arg9[%c0_21, %c0_22] : memref<1x1xf32, #tpu.memory_space<smem>>
    %32 = vector.broadcast %31 : f32 to vector<8x128xf32>
    %33 = arith.addf %30, %32 : vector<8x128xf32>
    %c0_23 = arith.constant 0 : index
    %c0_24 = arith.constant 0 : index
    %34 = vector.load %arg10[%c0_23, %c0_24] : memref<8x128xf32, #tpu.memory_space<vmem>>, vector<8x128xf32>
    tpu.vector_store %arg10[%c0_23, %c0_24], %33 {strides = array<i32>} : memref<8x128xf32, #tpu.memory_space<vmem>>, vector<8x128xf32>,
    return
  }
  func.func @transform_0(%arg0: i32) -> (i32, i32) {
    %c0_i32 = arith.constant 0 : i32
    %c0_i32_0 = arith.constant 0 : i32
    return %arg0, %c0_i32 : i32, i32
  }
  func.func @transform_1(%arg0: i32) -> (i32, i32) {
    %c0_i32 = arith.constant 0 : i32
    %c0_i32_0 = arith.constant 0 : i32
    %c0_i32_1 = arith.constant 0 : i32
    return %c0_i32, %c0_i32_0 : i32, i32
  }
  func.func @transform_2(%arg0: i32) -> (i32, i32) {
    %c0_i32 = arith.constant 0 : i32
    %c0_i32_0 = arith.constant 0 : i32
    %c0_i32_1 = arith.constant 0 : i32
    return %c0_i32, %c0_i32_0 : i32, i32
  }
  func.func @transform_3(%arg0: i32) -> (i32, i32) {
    %c0_i32 = arith.constant 0 : i32
    %c0_i32_0 = arith.constant 0 : i32
    %c0_i32_1 = arith.constant 0 : i32
    return %c0_i32, %c0_i32_0 : i32, i32
  }
  func.func @transform_4(%arg0: i32) -> (i32, i32) {
    %c0_i32 = arith.constant 0 : i32
    %c0_i32_0 = arith.constant 0 : i32
    %c0_i32_1 = arith.constant 0 : i32
    return %c0_i32, %c0_i32_0 : i32, i32
  }
  func.func @transform_5(%arg0: i32) -> (i32, i32) {
    %c0_i32 = arith.constant 0 : i32
    %c0_i32_0 = arith.constant 0 : i32
    %c0_i32_1 = arith.constant 0 : i32
    return %c0_i32, %c0_i32_0 : i32, i32
  }
  func.func @transform_6(%arg0: i32) -> (i32, i32) {
    %c0_i32 = arith.constant 0 : i32
    %c0_i32_0 = arith.constant 0 : i32
    %c0_i32_1 = arith.constant 0 : i32
    return %c0_i32, %c0_i32_0 : i32, i32
  }
  func.func @transform_7(%arg0: i32) -> (i32, i32) {
    %c0_i32 = arith.constant 0 : i32
    %c0_i32_0 = arith.constant 0 : i32
    %c0_i32_1 = arith.constant 0 : i32
    return %c0_i32, %c0_i32_0 : i32, i32
  }
  func.func @transform_8(%arg0: i32) -> (i32, i32) {
    %c0_i32 = arith.constant 0 : i32
    %c0_i32_0 = arith.constant 0 : i32
    %c0_i32_1 = arith.constant 0 : i32
    return %c0_i32, %c0_i32_0 : i32, i32
  }
  func.func @transform_9(%arg0: i32) -> (i32, i32) {
    %c0_i32 = arith.constant 0 : i32
    %c0_i32_0 = arith.constant 0 : i32
    return %arg0, %c0_i32 : i32, i32
  }
}

</mosaic_0001>

<bundles_post_ra>
// kernel: state_value_forward.1
= control target key start
LH: loop header
LB: loop body
LE: loop exit
PB: predicated region body
PF: predicated region fallthrough
CT: control target
= control target key end

     0   :  { %vm249_vm0 = vcmask 261120   ;;  %vm3391_vm1 = vcmask 130112   ;;  %vm3398_vm2 = vcmask 195712   ;;  %vm3405_vm3 = vcmask 261312   ;;  %s6477_s1 = inlined_call_operand.vmem [shape: bf16[32,128], index: 1, kind: input, shape index: {}]   ;;  %s6478_s0 = inlined_call_operand.vmem [shape: f32[1024,32], index: 0, kind: input, shape index: {}]   ;;  %s6479_s3 = inlined_call_operand.vmem [shape: bf16[128,128], index: 3, kind: input, shape index: {}]   ;;  %s6480_s5 = inlined_call_operand.vmem [shape: bf16[128,128], index: 5, kind: input, shape index: {}]   ;;  %s6481_s2 = inlined_call_operand.vmem [shape: f32[1,128], index: 2, kind: input, shape index: {}]   ;;  %s6482_s4 = inlined_call_operand.vmem [shape: f32[1,128], index: 4, kind: input, shape index: {}]   ;;  %s6483_s6 = inlined_call_operand.vmem [shape: f32[1,128], index: 6, kind: input, shape index: {}]   ;;  %s6484_s7 = inlined_call_operand.vmem [shape: f32[1,128], index: 7, kind: input, shape index: {}]   ;;  %s6485_s8 = inlined_call_operand.<no memory space> [shape: f32[1,1], index: 8, kind: input, shape index: {}]   ;;  %s6486_s9 = inlined_call_operand.vmem [shape: f32[8,128], index: 9, kind: output, shape index: {}]  }
   0x1   :  { %v4784_v0 = vld [vmem:[%s6477_s1] sm:$0xff]   ;;  %v4785_v1 = vld [vmem:[%s6477_s1 + $0x8] sm:$0xff]   ;;  %v36_v5 = vld [vmem:[%s6478_s0 + $0x10] sm:$0xff]  ;;  %vm3412_vm4 = vcmask 326912   ;;  %vm3419_vm5 = vcmask 392512   ;;  %vm3426_vm6 = vcmask 458112  }
   0x2   :  { %4360 = vmatprep.subr.bf16.mxu0 %v4784_v0  ;;  %v34_v2 = vld [vmem:[%s6478_s0] sm:$0xff]  ;;  %v35_v3 = vld [vmem:[%s6478_s0 + $0x8] sm:$0xff]  ;;  %4780 = vmatprep.subr.bf16.mxu1 %v4784_v0  ;;  %v37_v6 = vld [vmem:[%s6478_s0 + $0x18] sm:$0xff]  ;;  %vm3433_vm7 = vcmask 523712   ;;  %vm3440_vm8 = vcmask 589312   ;;  %vm3447_vm9 = vcmask 654912  }
   0x3   :  { %4361 = vmatpush3.bf16.msra.mxu0 %v4784_v0  ;;  %v162_v4 = vpack.c.bf16 %v35_v3, %v34_v2  ;;  %4782 = vmatpush3.bf16.msra.mxu1 %v4784_v0  ;;  %v38_v7 = vld [vmem:[%s6478_s0 + $0x20] sm:$0xff]  ;;  %v39_v8 = vld [vmem:[%s6478_s0 + $0x28] sm:$0xff]  ;;  %v163_v9 = vpack.c.bf16 %v37_v6, %v36_v5  ;;  %v40_v11 = vld [vmem:[%s6478_s0 + $0x30] sm:$0xff]  ;;  %vm3454_vm10 = vcmask 720512   ;;  %vm3461_vm11 = vcmask 786112  }
   0x4   :  { %4362 = vmatprep.subr.bf16.mxu0 %v4785_v1  ;;  %4781 = vmatprep.subr.bf16.mxu1 %v4785_v1  ;;  %v164_v10 = vpack.c.bf16 %v39_v8, %v38_v7  ;;  %v41_v12 = vld [vmem:[%s6478_s0 + $0x38] sm:$0xff]  ;;  %v42_v13 = vld [vmem:[%s6478_s0 + $0x40] sm:$0xff]  ;;  %v43_v14 = vld [vmem:[%s6478_s0 + $0x48] sm:$0xff]  ;;  %vm3468_vm12 = vcmask 851712   ;;  %vm3475_vm13 = vcmask 917312   ;;  %vm3482_vm14 = vcmask 982912  }
   0x5   :  { %4364 = vmatprep.mubr.msk.bf16.mxu0 %vm249_vm0, %v162_v4  ;;  %v165_v15 = vpack.c.bf16 %v41_v12, %v40_v11  ;;  %v166_v16 = vpack.c.bf16 %v43_v14, %v42_v13  ;;  %v44_v17 = vld [vmem:[%s6478_s0 + $0x50] sm:$0xff]  ;;  %v45_v18 = vld [vmem:[%s6478_s0 + $0x58] sm:$0xff]  ;;  %v98_v19 = vld [vmem:[%s6478_s0 + $0x200] sm:$0xff]  ;;  %vm3489_vm15 = vcmask 1048512  }
   0x6   :  { %v99_v20 = vld [vmem:[%s6478_s0 + $0x208] sm:$0xff]  ;;  %v100_v21 = vld [vmem:[%s6478_s0 + $0x210] sm:$0xff]  ;;  %v101_v23 = vld [vmem:[%s6478_s0 + $0x218] sm:$0xff]  ;;  %v167_v29 = vpack.c.bf16 %v45_v18, %v44_v17 }
   0x7   :  { %4363 = vmatpush3.bf16.msra.mxu0 %v4785_v1  ;;  %4783 = vmatpush3.bf16.msra.mxu1 %v4785_v1  ;;  %v194_v22 = vpack.c.bf16 %v99_v20, %v98_v19  ;;  %v46_v24 = vld [vmem:[%s6478_s0 + $0x60] sm:$0xff]  ;;  %v47_v25 = vld [vmem:[%s6478_s0 + $0x68] sm:$0xff]  ;;  %v195_v26 = vpack.c.bf16 %v101_v23, %v100_v21  ;;  %v104_v33 = vld [vmem:[%s6478_s0 + $0x230] sm:$0xff] }
   0x8   :  { %v4786_v27 = vld [vmem:[%s6479_s3] sm:$0xff]   ;;  %v103_v30 = vld [vmem:[%s6478_s0 + $0x228] sm:$0xff]  ;;  %v168_v31 = vpack.c.bf16 %v47_v25, %v46_v24  ;;  %v105_v34 = vld [vmem:[%s6478_s0 + $0x238] sm:$0xff] }
   0x9   :  { %4428 = vmatprep.mubr.msk.bf16.mxu1 %vm249_vm0, %v194_v22  ;;  %v102_v28 = vld [vmem:[%s6478_s0 + $0x220] sm:$0xff]  ;;  %4492 = vmatprep.subr.bf16.mxu1 %v4786_v27  ;;  %v107_v36 = vld [vmem:[%s6478_s0 + $0x248] sm:$0xff]  ;;  %v197_v37 = vpack.c.bf16 %v105_v34, %v104_v33  ;;  %v48_v39 = vld [vmem:[%s6478_s0 + $0x70] sm:$0xff] }
   0xa   :  { %4365 = vmatmul.mubr.msk.bf16.vlgmr.msra.gmra.mrb[0].mxu0 %vm249_vm0, %v163_v9  ;;  %4429 = vmatmul.mubr.msk.bf16.vlgmr.msra.gmra.mrb[0].mxu1 %vm249_vm0, %v195_v26  ;;  %v196_v32 = vpack.c.bf16 %v103_v30, %v102_v28  ;;  %v106_v35 = vld [vmem:[%s6478_s0 + $0x240] sm:$0xff]  ;;  %v4787_v38 = vld [vmem:[%s6479_s3 + $0x8] sm:$0xff]   ;;  %v49_v40 = vld [vmem:[%s6478_s0 + $0x78] sm:$0xff] }
   0xb   :  { %4368 = vmatprep.mubr.msk.bf16.mxu0 %vm249_vm0, %v164_v10  ;;  %4493 = vmatpush3.bf16.msra.mxu1 %v4786_v27  ;;  %v198_v41 = vpack.c.bf16 %v107_v36, %v106_v35  ;;  %v50_v42 = vld [vmem:[%s6478_s0 + $0x80] sm:$0xff]  ;;  %v51_v43 = vld [vmem:[%s6478_s0 + $0x88] sm:$0xff]  ;;  %v169_v44 = vpack.c.bf16 %v49_v40, %v48_v39  ;;  %v108_v45 = vld [vmem:[%s6478_s0 + $0x250] sm:$0xff] }
   0xc   :  { %4432 = vmatprep.mubr.msk.bf16.mxu1 %vm249_vm0, %v196_v32  ;;  %4494 = vmatprep.subr.bf16.mxu1 %v4787_v38  ;;  %v170_v46 = vpack.c.bf16 %v51_v43, %v50_v42  ;;  %v109_v47 = vld [vmem:[%s6478_s0 + $0x258] sm:$0xff]  ;;  %v110_v48 = vld [vmem:[%s6478_s0 + $0x260] sm:$0xff]  ;;  %v111_v49 = vld [vmem:[%s6478_s0 + $0x268] sm:$0xff] }
   0xd   :  { %v4788_v50 = vld [vmem:[%s6479_s3 + $0x10] sm:$0xff]   ;;  %v199_v52 = vpack.c.bf16 %v109_v47, %v108_v45  ;;  %v53_v53 = vld [vmem:[%s6478_s0 + $0x98] sm:$0xff]  ;;  %v54_v54 = vld [vmem:[%s6478_s0 + $0xa0] sm:$0xff]  ;;  %v200_v55 = vpack.c.bf16 %v111_v49, %v110_v48 }
   0xe   :  { %v52_v51 = vld [vmem:[%s6478_s0 + $0x90] sm:$0xff]  ;;  %v55_v56 = vld [vmem:[%s6478_s0 + $0xa8] sm:$0xff]  ;;  %v4789_v57 = vld [vmem:[%s6479_s3 + $0x18] sm:$0xff]  }
   0xf   :  { %4495 = vmatpush3.bf16.msra.mxu1 %v4787_v38  ;;  %v171_v58 = vpack.c.bf16 %v53_v53, %v52_v51  ;;  %v112_v59 = vld [vmem:[%s6478_s0 + $0x270] sm:$0xff]  ;;  %v172_v60 = vpack.c.bf16 %v55_v56, %v54_v54  ;;  %v113_v61 = vld [vmem:[%s6478_s0 + $0x278] sm:$0xff]  ;;  %v114_v62 = vld [vmem:[%s6478_s0 + $0x280] sm:$0xff] }
  0x10   :  { %4496 = vmatprep.subr.bf16.mxu1 %v4788_v50  ;;  %v115_v63 = vld [vmem:[%s6478_s0 + $0x288] sm:$0xff]  ;;  %v4790_v0 = vld [vmem:[%s6479_s3 + $0x20] sm:$0xff]   ;;  %v56_v1 = vld [vmem:[%s6478_s0 + $0xb0] sm:$0xff]  ;;  %v201_v3 = vpack.c.bf16 %v113_v61, %v112_v59 }
  0x11   :  { %v57_v2 = vld [vmem:[%s6478_s0 + $0xb8] sm:$0xff]  ;;  %v202_v4 = vpack.c.bf16 %v115_v63, %v114_v62  ;;  %v4791_v5 = vld [vmem:[%s6479_s3 + $0x28] sm:$0xff]   ;;  %v58_v6 = vld [vmem:[%s6478_s0 + $0xc0] sm:$0xff] }
  0x12   :  { %4369 = vmatmul.mubr.msk.bf16.gmra.mrb[4].mxu0 %vm249_vm0, %v165_v15  ;;  %4433 = vmatmul.mubr.msk.bf16.gmra.mrb[4].mxu1 %vm249_vm0, %v197_v37  ;;  %v59_v7 = vld [vmem:[%s6478_s0 + $0xc8] sm:$0xff]  ;;  %v173_v8 = vpack.c.bf16 %v57_v2, %v56_v1  ;;  %v116_v9 = vld [vmem:[%s6478_s0 + $0x290] sm:$0xff]  ;;  %v117_v11 = vld [vmem:[%s6478_s0 + $0x298] sm:$0xff] }
  0x13   :  { %4372 = vmatprep.mubr.msk.bf16.mxu0 %vm249_vm0, %v166_v16  ;;  %4436 = vmatprep.mubr.msk.bf16.mxu1 %vm249_vm0, %v198_v41  ;;  %v174_v10 = vpack.c.bf16 %v59_v7, %v58_v6  ;;  %v4792_v12 = vld [vmem:[%s6479_s3 + $0x30] sm:$0xff]   ;;  %v118_v13 = vld [vmem:[%s6478_s0 + $0x2a0] sm:$0xff]  ;;  %v119_v14 = vld [vmem:[%s6478_s0 + $0x2a8] sm:$0xff]  ;;  %v203_v15 = vpack.c.bf16 %v117_v11, %v116_v9 }
  0x14   :  { %4497 = vmatpush3.bf16.msra.mxu1 %v4788_v50  ;;  %v60_v16 = vld [vmem:[%s6478_s0 + $0xd0] sm:$0xff]  ;;  %v61_v17 = vld [vmem:[%s6478_s0 + $0xd8] sm:$0xff]  ;;  %v204_v18 = vpack.c.bf16 %v119_v14, %v118_v13  ;;  %v62_v20 = vld [vmem:[%s6478_s0 + $0xe0] sm:$0xff] }
  0x15   :  { %4498 = vmatprep.subr.bf16.mxu1 %v4789_v57  ;;  %v4793_v19 = vld [vmem:[%s6479_s3 + $0x38] sm:$0xff]   ;;  %v63_v21 = vld [vmem:[%s6478_s0 + $0xe8] sm:$0xff]  ;;  %v175_v22 = vpack.c.bf16 %v61_v17, %v60_v16  ;;  %v120_v24 = vld [vmem:[%s6478_s0 + $0x2b0] sm:$0xff] }
  0x16   :  { %v176_v23 = vpack.c.bf16 %v63_v21, %v62_v20  ;;  %v121_v25 = vld [vmem:[%s6478_s0 + $0x2b8] sm:$0xff]  ;;  %v122_v26 = vld [vmem:[%s6478_s0 + $0x2c0] sm:$0xff]  ;;  %v123_v27 = vld [vmem:[%s6478_s0 + $0x2c8] sm:$0xff] }
  0x17   :  { %v205_v28 = vpack.c.bf16 %v121_v25, %v120_v24  ;;  %v65_v30 = vld [vmem:[%s6478_s0 + $0xf8] sm:$0xff]  ;;  %v66_v32 = vld [vmem:[%s6478_s0 + $0x100] sm:$0xff]  ;;  %v67_v33 = vld [vmem:[%s6478_s0 + $0x108] sm:$0xff] }
  0x18   :  { %4499 = vmatpush3.bf16.msra.mxu1 %v4789_v57  ;;  %v178_v35 = vpack.c.bf16 %v67_v33, %v66_v32  ;;  %v124_v36 = vld [vmem:[%s6478_s0 + $0x2d0] sm:$0xff]  ;;  %v125_v37 = vld [vmem:[%s6478_s0 + $0x2d8] sm:$0xff]  ;;  %v126_v38 = vld [vmem:[%s6478_s0 + $0x2e0] sm:$0xff] }
  0x19   :  { %4500 = vmatprep.subr.bf16.mxu1 %v4790_v0  ;;  %v127_v39 = vld [vmem:[%s6478_s0 + $0x2e8] sm:$0xff]  ;;  %v207_v40 = vpack.c.bf16 %v125_v37, %v124_v36  ;;  %v68_v41 = vld [vmem:[%s6478_s0 + $0x110] sm:$0xff]  ;;  %v69_v42 = vld [vmem:[%s6478_s0 + $0x118] sm:$0xff] }
  0x1a   :  { %4373 = vmatmul.mubr.msk.bf16.gmra.mrb[8].mxu0 %vm249_vm0, %v167_v29  ;;  %4437 = vmatmul.mubr.msk.bf16.gmra.mrb[8].mxu1 %vm249_vm0, %v199_v52  ;;  %v64_v29 = vld [vmem:[%s6478_s0 + $0xf0] sm:$0xff]  ;;  %v208_v43 = vpack.c.bf16 %v127_v39, %v126_v38  ;;  %v71_v45 = vld [vmem:[%s6478_s0 + $0x128] sm:$0xff]  ;;  %v129_v49 = vld [vmem:[%s6478_s0 + $0x2f8] sm:$0xff] }
  0x1b   :  { %4376 = vmatprep.mubr.msk.bf16.mxu0 %vm249_vm0, %v168_v31  ;;  %4440 = vmatprep.mubr.msk.bf16.mxu1 %vm249_vm0, %v200_v55  ;;  %v206_v31 = vpack.c.bf16 %v123_v27, %v122_v26  ;;  %v177_v34 = vpack.c.bf16 %v65_v30, %v64_v29  ;;  %v128_v48 = vld [vmem:[%s6478_s0 + $0x2f0] sm:$0xff]  ;;  %v130_v50 = vld [vmem:[%s6478_s0 + $0x300] sm:$0xff]  ;;  %v131_v51 = vld [vmem:[%s6478_s0 + $0x308] sm:$0xff] }
  0x1c   :  { %4501 = vmatpush3.bf16.msra.mxu1 %v4790_v0  ;;  %v209_v52 = vpack.c.bf16 %v129_v49, %v128_v48  ;;  %v72_v53 = vld [vmem:[%s6478_s0 + $0x130] sm:$0xff]  ;;  %v73_v54 = vld [vmem:[%s6478_s0 + $0x138] sm:$0xff]  ;;  %v210_v55 = vpack.c.bf16 %v131_v51, %v130_v50  ;;  %v74_v56 = vld [vmem:[%s6478_s0 + $0x140] sm:$0xff] }
  0x1d   :  { %4502 = vmatprep.subr.bf16.mxu1 %v4791_v5  ;;  %v75_v57 = vld [vmem:[%s6478_s0 + $0x148] sm:$0xff]  ;;  %v133_v61 = vld [vmem:[%s6478_s0 + $0x318] sm:$0xff]  ;;  %v134_v62 = vld [vmem:[%s6478_s0 + $0x320] sm:$0xff] }
  0x1e   :  { %v182_v59 = vpack.c.bf16 %v75_v57, %v74_v56  ;;  %v135_v63 = vld [vmem:[%s6478_s0 + $0x328] sm:$0xff]  ;;  %v76_v1 = vld [vmem:[%s6478_s0 + $0x150] sm:$0xff]  ;;  %v77_v2 = vld [vmem:[%s6478_s0 + $0x158] sm:$0xff] }
  0x1f   :  { %v183_v6 = vpack.c.bf16 %v77_v2, %v76_v1  ;;  %v137_v9 = vld [vmem:[%s6478_s0 + $0x338] sm:$0xff]  ;;  %v139_v11 = vld [vmem:[%s6478_s0 + $0x348] sm:$0xff]  ;;  %v80_v13 = vld [vmem:[%s6478_s0 + $0x170] sm:$0xff] }
  0x20   :  { %4503 = vmatpush3.bf16.msra.mxu1 %v4791_v5  ;;  %v79_v5 = vld [vmem:[%s6478_s0 + $0x168] sm:$0xff]  ;;  %v81_v14 = vld [vmem:[%s6478_s0 + $0x178] sm:$0xff]  ;;  %v82_v16 = vld [vmem:[%s6478_s0 + $0x180] sm:$0xff] }
  0x21   :  { %4504 = vmatprep.subr.bf16.mxu1 %v4792_v12  ;;  %v83_v17 = vld [vmem:[%s6478_s0 + $0x188] sm:$0xff]  ;;  %v140_v20 = vld [vmem:[%s6478_s0 + $0x350] sm:$0xff]  ;;  %v141_v21 = vld [vmem:[%s6478_s0 + $0x358] sm:$0xff] }
  0x22   :  { %4377 = vmatmul.mubr.msk.bf16.gmra.mrb[12].mxu0 %vm249_vm0, %v169_v44  ;;  %4441 = vmatmul.mubr.msk.bf16.gmra.mrb[12].mxu1 %vm249_vm0, %v201_v3  ;;  %v70_v44 = vld [vmem:[%s6478_s0 + $0x120] sm:$0xff]  ;;  %v212_v3 = vpack.c.bf16 %v135_v63, %v134_v62  ;;  %v215_v24 = vpack.c.bf16 %v141_v21, %v140_v20  ;;  %v84_v25 = vld [vmem:[%s6478_s0 + $0x190] sm:$0xff]  ;;  %v85_v26 = vld [vmem:[%s6478_s0 + $0x198] sm:$0xff] }
  0x23   :  { %4380 = vmatprep.mubr.msk.bf16.mxu0 %vm249_vm0, %v170_v46  ;;  %4444 = vmatprep.mubr.msk.bf16.mxu1 %vm249_vm0, %v202_v4  ;;  %v179_v46 = vpack.c.bf16 %v69_v42, %v68_v41  ;;  %v180_v47 = vpack.c.bf16 %v71_v45, %v70_v44  ;;  %v78_v4 = vld [vmem:[%s6478_s0 + $0x160] sm:$0xff]  ;;  %v87_v29 = vld [vmem:[%s6478_s0 + $0x1a8] sm:$0xff]  ;;  %v187_v30 = vpack.c.bf16 %v85_v26, %v84_v25  ;;  %v144_v32 = vld [vmem:[%s6478_s0 + $0x370] sm:$0xff] }
  0x24   :  { %4505 = vmatpush3.bf16.msra.mxu1 %v4792_v12  ;;  %v184_v7 = vpack.c.bf16 %v79_v5, %v78_v4  ;;  %v145_v33 = vld [vmem:[%s6478_s0 + $0x378] sm:$0xff]  ;;  %v88_v37 = vld [vmem:[%s6478_s0 + $0x1b0] sm:$0xff]  ;;  %v91_v41 = vld [vmem:[%s6478_s0 + $0x1c8] sm:$0xff] }
  0x25   :  { %4506 = vmatprep.subr.bf16.mxu1 %v4793_v19  ;;  %v217_v36 = vpack.c.bf16 %v145_v33, %v144_v32  ;;  %v89_v38 = vld [vmem:[%s6478_s0 + $0x1b8] sm:$0xff]  ;;  %v148_v44 = vld [vmem:[%s6478_s0 + $0x390] sm:$0xff]  ;;  %v159_v4 = vld [vmem:[%s6478_s0 + $0x3e8] sm:$0xff] }
  0x26   :  { %v189_v42 = vpack.c.bf16 %v89_v38, %v88_v37  ;;  %v149_v45 = vld [vmem:[%s6478_s0 + $0x398] sm:$0xff]  ;;  %v92_v49 = vld [vmem:[%s6478_s0 + $0x1d0] sm:$0xff] }
  0x27   :  { %v219_v48 = vpack.c.bf16 %v149_v45, %v148_v44  ;;  %v93_v50 = vld [vmem:[%s6478_s0 + $0x1d8] sm:$0xff]  ;;  %v152_v56 = vld [vmem:[%s6478_s0 + $0x3b0] sm:$0xff] }
  0x28   :  { %4507 = vmatpush3.bf16.msra.mxu1 %v4793_v19  ;;  %v186_v19 = vpack.c.bf16 %v83_v17, %v82_v16  ;;  %v153_v57 = vld [vmem:[%s6478_s0 + $0x3b8] sm:$0xff]  ;;  %v156_v1 = vld [vmem:[%s6478_s0 + $0x3d0] sm:$0xff] }
  0x29   :  { %v97_v62 = vld [vmem:[%s6478_s0 + $0x1f8] sm:$0xff]  ;;  %v4796_v21 = vld [vmem:[%s6480_s5 + $0x10] sm:$0xff]  }
  0x2a   :  { %4381 = vmatmul.mubr.msk.bf16.gmra.mrb[16].mxu0 %vm249_vm0, %v171_v58  ;;  %4445 = vmatmul.mubr.msk.bf16.gmra.mrb[16].mxu1 %vm249_vm0, %v203_v15  ;;  %v181_v58 = vpack.c.bf16 %v73_v54, %v72_v53  ;;  %v95_v53 = vld [vmem:[%s6478_s0 + $0x1e8] sm:$0xff]  ;;  %v191_v54 = vpack.c.bf16 %v93_v50, %v92_v49  ;;  %v157_v2 = vld [vmem:[%s6478_s0 + $0x3d8] sm:$0xff] }
  0x2b   :  { %4384 = vmatprep.mubr.msk.bf16.mxu0 %vm249_vm0, %v172_v60  ;;  %4448 = vmatprep.mubr.msk.bf16.mxu1 %vm249_vm0, %v204_v18  ;;  %v132_v60 = vld [vmem:[%s6478_s0 + $0x310] sm:$0xff]  ;;  %v185_v18 = vpack.c.bf16 %v81_v14, %v80_v13  ;;  %v223_v5 = vpack.c.bf16 %v157_v2, %v156_v1  ;;  %v4797_v1 = vld [vmem:[%s6480_s5 + $0x18] sm:$0xff]  }
  0x2c   :  { %v211_v0 = vpack.c.bf16 %v133_v61, %v132_v60  ;;  %v221_v60 = vpack.c.bf16 %v153_v57, %v152_v56  ;;  %v96_v61 = vld [vmem:[%s6478_s0 + $0x1f0] sm:$0xff] }
  0x32   :  { %4385 = vmatmul.mubr.msk.bf16.gmra.mrb[20].mxu0 %vm249_vm0, %v173_v8  ;;  %4449 = vmatmul.mubr.msk.bf16.gmra.mrb[20].mxu1 %vm249_vm0, %v205_v28  ;;  %v136_v8 = vld [vmem:[%s6478_s0 + $0x330] sm:$0xff]  ;;  %v86_v28 = vld [vmem:[%s6478_s0 + $0x1a0] sm:$0xff] }
  0x33   :  { %4388 = vmatprep.mubr.msk.bf16.mxu0 %vm249_vm0, %v174_v10  ;;  %4452 = vmatprep.mubr.msk.bf16.mxu1 %vm249_vm0, %v206_v31  ;;  %v138_v10 = vld [vmem:[%s6478_s0 + $0x340] sm:$0xff]  ;;  %v213_v12 = vpack.c.bf16 %v137_v9, %v136_v8  ;;  %v188_v31 = vpack.c.bf16 %v87_v29, %v86_v28  ;;  %v161_v8 = vld [vmem:[%s6478_s0 + $0x3f8] sm:$0xff] }
  0x34   :  { %v214_v15 = vpack.c.bf16 %v139_v11, %v138_v10  ;;  %v4794_v10 = vld [vmem:[%s6480_s5] sm:$0xff]   ;;  %v4795_v11 = vld [vmem:[%s6480_s5 + $0x8] sm:$0xff]  }
  0x35   :  { %4636 = vmatprep.subr.bf16.mxu0 %v4794_v10 }
  0x36   :  { %4637 = vmatpush3.bf16.msra.mxu0 %v4794_v10 }
  0x37   :  { %4638 = vmatprep.subr.bf16.mxu0 %v4795_v11 }
  0x3a   :  { %4389 = vmatmul.mubr.msk.bf16.gmra.mrb[24].mxu0 %vm249_vm0, %v175_v22  ;;  %4453 = vmatmul.mubr.msk.bf16.gmra.mrb[24].mxu1 %vm249_vm0, %v207_v40  ;;  %v142_v22 = vld [vmem:[%s6478_s0 + $0x360] sm:$0xff] }
  0x3b   :  { %4392 = vmatprep.mubr.msk.bf16.mxu0 %vm249_vm0, %v176_v23  ;;  %4456 = vmatprep.mubr.msk.bf16.mxu1 %vm249_vm0, %v208_v43  ;;  %v143_v23 = vld [vmem:[%s6478_s0 + $0x368] sm:$0xff]  ;;  %v90_v40 = vld [vmem:[%s6478_s0 + $0x1c0] sm:$0xff] }
  0x3c   :  { %v216_v27 = vpack.c.bf16 %v143_v23, %v142_v22  ;;  %v190_v43 = vpack.c.bf16 %v91_v41, %v90_v40  ;;  %4639 = vmatpush3.bf16.msra.mxu0 %v4795_v11 }
  0x3d   :  { %4640 = vmatprep.subr.bf16.mxu0 %v4796_v21 }
  0x40   :  { %4641 = vmatpush3.bf16.msra.mxu0 %v4796_v21 }
  0x41   :  { %4642 = vmatprep.subr.bf16.mxu0 %v4797_v1 }
  0x42   :  { %4393 = vmatmul.mubr.msk.bf16.gmra.mrb[28].mxu0 %vm249_vm0, %v177_v34  ;;  %4457 = vmatmul.mubr.msk.bf16.gmra.mrb[28].mxu1 %vm249_vm0, %v209_v52  ;;  %v146_v34 = vld [vmem:[%s6478_s0 + $0x380] sm:$0xff] }
  0x43   :  { %4396 = vmatprep.mubr.msk.bf16.mxu0 %vm249_vm0, %v178_v35  ;;  %4460 = vmatprep.mubr.msk.bf16.mxu1 %vm249_vm0, %v210_v55  ;;  %v147_v35 = vld [vmem:[%s6478_s0 + $0x388] sm:$0xff]  ;;  %v94_v52 = vld [vmem:[%s6478_s0 + $0x1e0] sm:$0xff] }
  0x44   :  { %v218_v39 = vpack.c.bf16 %v147_v35, %v146_v34  ;;  %v192_v55 = vpack.c.bf16 %v95_v53, %v94_v52  ;;  %4643 = vmatpush3.bf16.msra.mxu0 %v4797_v1 }
  0x4a   :  { %4397 = vmatmul.mubr.msk.bf16.gmra.mrb[32].mxu0 %vm249_vm0, %v179_v46  ;;  %4461 = vmatmul.mubr.msk.bf16.gmra.mrb[32].mxu1 %vm249_vm0, %v211_v0  ;;  %v150_v46 = vld [vmem:[%s6478_s0 + $0x3a0] sm:$0xff]  ;;  %v193_v0 = vpack.c.bf16 %v97_v62, %v96_v61 }
  0x4b   :  { %4400 = vmatprep.mubr.msk.bf16.mxu0 %vm249_vm0, %v180_v47  ;;  %4464 = vmatprep.mubr.msk.bf16.mxu1 %vm249_vm0, %v212_v3  ;;  %v151_v47 = vld [vmem:[%s6478_s0 + $0x3a8] sm:$0xff]  ;;  %v158_v3 = vld [vmem:[%s6478_s0 + $0x3e0] sm:$0xff] }
  0x4c   :  { %v220_v51 = vpack.c.bf16 %v151_v47, %v150_v46 }
  0x52   :  { %4401 = vmatmul.mubr.msk.bf16.gmra.mrb[36].mxu0 %vm249_vm0, %v181_v58  ;;  %4465 = vmatmul.mubr.msk.bf16.gmra.mrb[36].mxu1 %vm249_vm0, %v213_v12  ;;  %v154_v58 = vld [vmem:[%s6478_s0 + $0x3c0] sm:$0xff] }
  0x53   :  { %4404 = vmatprep.mubr.msk.bf16.mxu0 %vm249_vm0, %v182_v59  ;;  %4468 = vmatprep.mubr.msk.bf16.mxu1 %vm249_vm0, %v214_v15  ;;  %v155_v59 = vld [vmem:[%s6478_s0 + $0x3c8] sm:$0xff]  ;;  %v5342_v12 = vld [vmem:[%s6481_s2] ss:$0 sm:$0xff] }
  0x54   :  { %v222_v63 = vpack.c.bf16 %v155_v59, %v154_v58 }
  0x5a   :  { %4405 = vmatmul.mubr.msk.bf16.gmra.mrb[40].mxu0 %vm249_vm0, %v183_v6  ;;  %4469 = vmatmul.mubr.msk.bf16.gmra.mrb[40].mxu1 %vm249_vm0, %v215_v24  ;;  %v224_v6 = vpack.c.bf16 %v159_v4, %v158_v3 }
  0x5b   :  { %4408 = vmatprep.mubr.msk.bf16.mxu0 %vm249_vm0, %v184_v7  ;;  %4472 = vmatprep.mubr.msk.bf16.mxu1 %vm249_vm0, %v216_v27  ;;  %v160_v7 = vld [vmem:[%s6478_s0 + $0x3f0] sm:$0xff] }
  0x5c   :  { %v225_v9 = vpack.c.bf16 %v161_v8, %v160_v7 }
  0x62   :  { %4409 = vmatmul.mubr.msk.bf16.gmra.mrb[44].mxu0 %vm249_vm0, %v185_v18  ;;  %4473 = vmatmul.mubr.msk.bf16.gmra.mrb[44].mxu1 %vm249_vm0, %v217_v36 }
  0x63   :  { %4412 = vmatprep.mubr.msk.bf16.mxu0 %vm249_vm0, %v186_v19  ;;  %4476 = vmatprep.mubr.msk.bf16.mxu1 %vm249_vm0, %v218_v39 }
  0x6a   :  { %4413 = vmatmul.mubr.msk.bf16.gmra.mrb[48].mxu0 %vm249_vm0, %v187_v30  ;;  %4477 = vmatmul.mubr.msk.bf16.gmra.mrb[48].mxu1 %vm249_vm0, %v219_v48 }
  0x6b   :  { %4416 = vmatprep.mubr.msk.bf16.mxu0 %vm249_vm0, %v188_v31  ;;  %4480 = vmatprep.mubr.msk.bf16.mxu1 %vm249_vm0, %v220_v51 }
  0x72   :  { %4417 = vmatmul.mubr.msk.bf16.gmra.mrb[52].mxu0 %vm249_vm0, %v189_v42  ;;  %4481 = vmatmul.mubr.msk.bf16.gmra.mrb[52].mxu1 %vm249_vm0, %v221_v60 }
  0x73   :  { %4420 = vmatprep.mubr.msk.bf16.mxu0 %vm249_vm0, %v190_v43  ;;  %4484 = vmatprep.mubr.msk.bf16.mxu1 %vm249_vm0, %v222_v63 }
  0x7a   :  { %4421 = vmatmul.mubr.msk.bf16.gmra.mrb[56].mxu0 %vm249_vm0, %v191_v54  ;;  %4485 = vmatmul.mubr.msk.bf16.gmra.mrb[56].mxu1 %vm249_vm0, %v223_v5 }
  0x7b   :  { %4424 = vmatprep.mubr.msk.bf16.mxu0 %vm249_vm0, %v192_v55  ;;  %4488 = vmatprep.mubr.msk.bf16.mxu1 %vm249_vm0, %v224_v6 }
  0x82   :  { %4425 = vmatmul.mubr.msk.bf16.gmra.mrb[60].mxu0 %vm249_vm0, %v193_v0  ;;  %4489 = vmatmul.mubr.msk.bf16.gmra.mrb[60].mxu1 %vm249_vm0, %v225_v9  ;;  %vm4044_vm0 = vcmask 1041409  }
  0xdd   :  { %v4366_v13 = vpop.f32.mrb[0].mxu0  ;;  %v4430_v36 = vpop.f32.mrb[0].mxu1 }
  0xde   :  { %v485_v14 = vadd.f32 %v4366_v13, %v5342_v12  ;;  %v476_v15 = vpop.f32.mrb[1].mxu0  ;;  %v741_v39 = vadd.f32 %v4430_v36, %v5342_v12  ;;  %v732_v40 = vpop.f32.mrb[1].mxu1 }
  0xdf   :  { %v477_v16 = vadd.f32 %v5342_v12, %v476_v15  ;;  %v4367_v17 = vpop.f32.mrb[2].mxu0  ;;  %v733_v43 = vadd.f32 %v5342_v12, %v732_v40  ;;  %v4431_v44 = vpop.f32.mrb[2].mxu1 }
  0xe0   :  { %v488_v18 = vadd.f32 %v4367_v17, %v5342_v12  ;;  %v479_v19 = vpop.f32.mrb[3].mxu0  ;;  %v989_v22 = vmax.f32 %v485_v14, 0.0  ;;  %v1053_v46 = vmax.f32 %v741_v39, 0.0  ;;  %v744_v47 = vadd.f32 %v4431_v44, %v5342_v12  ;;  %v735_v48 = vpop.f32.mrb[3].mxu1 }
  0xe1   :  { %v480_v20 = vadd.f32 %v5342_v12, %v479_v19  ;;  %v987_v24 = vmax.f32 %v477_v16, 0.0  ;;  %v1051_v51 = vmax.f32 %v733_v43, 0.0  ;;  %v736_v52 = vadd.f32 %v5342_v12, %v735_v48 }
  0xe2   :  { %v990_v23 = vmax.f32 %v488_v18, 0.0  ;;  %v1054_v55 = vmax.f32 %v744_v47, 0.0 }
  0xe3   :  { %v988_v25 = vmax.f32 %v480_v20, 0.0  ;;  %v1052_v58 = vmax.f32 %v736_v52, 0.0 }
  0xe4   :  { %v1116_v26 = vpack.c.bf16 %v990_v23, %v989_v22  ;;  %v5362_v61 = vpack.c.bf16 %v1054_v55, %v1053_v46 }
  0xe5   :  { %v1115_v27 = vpack.c.bf16 %v988_v25, %v987_v24  ;;  %v4370_v28 = vpop.f32.mrb[4].mxu0  ;;  %v5365_v63 = vpack.c.bf16 %v1052_v58, %v1051_v51  ;;  %v4434_v0 = vpop.f32.mrb[4].mxu1 }
  0xe6   :  { %v501_v29 = vadd.f32 %v4370_v28, %v5342_v12  ;;  %v492_v30 = vpop.f32.mrb[5].mxu0  ;;  %v757_v4 = vadd.f32 %v4434_v0, %v5342_v12  ;;  %v748_v5 = vpop.f32.mrb[5].mxu1 }
  0xe7   :  { %v493_v31 = vadd.f32 %v5342_v12, %v492_v30  ;;  %v4371_v32 = vpop.f32.mrb[6].mxu0  ;;  %4508 = vmatprep.mubr.bf16.mxu1 %v1115_v27  ;;  %v749_v8 = vadd.f32 %v5342_v12, %v748_v5  ;;  %v4435_v9 = vpop.f32.mrb[6].mxu1 }
  0xe8   :  { %v504_v33 = vadd.f32 %v4371_v32, %v5342_v12  ;;  %v495_v34 = vpop.f32.mrb[7].mxu0  ;;  %4509 = vmatmul.mubr.bf16.vlgmr.msra.gmra.mrb[64].mxu1 %v1116_v26  ;;  %v993_v37 = vmax.f32 %v501_v29, 0.0  ;;  %v1057_v11 = vmax.f32 %v757_v4, 0.0  ;;  %v760_v13 = vadd.f32 %v4435_v9, %v5342_v12  ;;  %v751_v14 = vpop.f32.mrb[7].mxu1 }
  0xe9   :  { %v496_v35 = vadd.f32 %v5342_v12, %v495_v34  ;;  %v991_v41 = vmax.f32 %v493_v31, 0.0  ;;  %v1055_v17 = vmax.f32 %v749_v8, 0.0  ;;  %v752_v18 = vadd.f32 %v5342_v12, %v751_v14 }
  0xea   :  { %v994_v38 = vmax.f32 %v504_v33, 0.0  ;;  %v1058_v21 = vmax.f32 %v760_v13, 0.0 }
  0xeb   :  { %v992_v42 = vmax.f32 %v496_v35, 0.0  ;;  %v1056_v24 = vmax.f32 %v752_v18, 0.0 }
  0xec   :  { %v1118_v45 = vpack.c.bf16 %v994_v38, %v993_v37  ;;  %v5377_v27 = vpack.c.bf16 %v1058_v21, %v1057_v11 }
  0xed   :  { %v1117_v49 = vpack.c.bf16 %v992_v42, %v991_v41  ;;  %v4374_v50 = vpop.f32.mrb[8].mxu0  ;;  %v5380_v29 = vpack.c.bf16 %v1056_v24, %v1055_v17  ;;  %v4438_v30 = vpop.f32.mrb[8].mxu1 }
  0xee   :  { %v517_v53 = vadd.f32 %v4374_v50, %v5342_v12  ;;  %v508_v54 = vpop.f32.mrb[9].mxu0  ;;  %v773_v33 = vadd.f32 %v4438_v30, %v5342_v12  ;;  %v764_v34 = vpop.f32.mrb[9].mxu1 }
  0xef   :  { %v509_v56 = vadd.f32 %v5342_v12, %v508_v54  ;;  %v4375_v57 = vpop.f32.mrb[10].mxu0  ;;  %4512 = vmatprep.mubr.bf16.mxu1 %v1117_v49  ;;  %v765_v37 = vadd.f32 %v5342_v12, %v764_v34  ;;  %v4439_v38 = vpop.f32.mrb[10].mxu1 }
  0xf0   :  { %v520_v59 = vadd.f32 %v4375_v57, %v5342_v12  ;;  %v511_v60 = vpop.f32.mrb[11].mxu0  ;;  %4513 = vmatmul.mubr.bf16.gmra.mrb[68].mxu1 %v1118_v45  ;;  %v997_v2 = vmax.f32 %v517_v53, 0.0  ;;  %v1061_v40 = vmax.f32 %v773_v33, 0.0  ;;  %v776_v41 = vadd.f32 %v4439_v38, %v5342_v12  ;;  %v767_v42 = vpop.f32.mrb[11].mxu1 }
  0xf1   :  { %v512_v62 = vadd.f32 %v5342_v12, %v511_v60  ;;  %v995_v6 = vmax.f32 %v509_v56, 0.0  ;;  %v1059_v45 = vmax.f32 %v765_v37, 0.0  ;;  %v768_v46 = vadd.f32 %v5342_v12, %v767_v42 }
  0xf2   :  { %v998_v3 = vmax.f32 %v520_v59, 0.0  ;;  %v1062_v49 = vmax.f32 %v776_v41, 0.0  ;;  %v4798_v59 = vld [vmem:[%s6480_s5 + $0x20] sm:$0xff]  }
  0xf3   :  { %v996_v7 = vmax.f32 %v512_v62, 0.0  ;;  %v1060_v52 = vmax.f32 %v768_v46, 0.0  ;;  %4644 = vmatprep.subr.bf16.mxu0 %v4798_v59 }
  0xf4   :  { %v1120_v10 = vpack.c.bf16 %v998_v3, %v997_v2  ;;  %v5389_v55 = vpack.c.bf16 %v1062_v49, %v1061_v40  ;;  %4645 = vmatpush3.bf16.msra.mxu0 %v4798_v59  ;;  %v4799_v59 = vld [vmem:[%s6480_s5 + $0x28] sm:$0xff]  }
  0xf5   :  { %v1119_v15 = vpack.c.bf16 %v996_v7, %v995_v6  ;;  %v4378_v16 = vpop.f32.mrb[12].mxu0  ;;  %v5392_v57 = vpack.c.bf16 %v1060_v52, %v1059_v45  ;;  %v4442_v58 = vpop.f32.mrb[12].mxu1  ;;  %4646 = vmatprep.subr.bf16.mxu0 %v4799_v59 }
  0xf6   :  { %v533_v19 = vadd.f32 %v4378_v16, %v5342_v12  ;;  %v524_v20 = vpop.f32.mrb[13].mxu0  ;;  %v789_v0 = vadd.f32 %v4442_v58, %v5342_v12  ;;  %v780_v1 = vpop.f32.mrb[13].mxu1 }
  0xf7   :  { %v525_v22 = vadd.f32 %v5342_v12, %v524_v20  ;;  %v4379_v23 = vpop.f32.mrb[14].mxu0  ;;  %4516 = vmatprep.mubr.bf16.mxu1 %v1119_v15  ;;  %v781_v4 = vadd.f32 %v5342_v12, %v780_v1  ;;  %v4443_v5 = vpop.f32.mrb[14].mxu1 }
  0xf8   :  { %v536_v25 = vadd.f32 %v4379_v23, %v5342_v12  ;;  %v527_v26 = vpop.f32.mrb[15].mxu0  ;;  %4517 = vmatmul.mubr.bf16.gmra.mrb[72].mxu1 %v1120_v10  ;;  %v1001_v31 = vmax.f32 %v533_v19, 0.0  ;;  %v1065_v7 = vmax.f32 %v789_v0, 0.0  ;;  %v792_v8 = vadd.f32 %v4443_v5, %v5342_v12  ;;  %v783_v9 = vpop.f32.mrb[15].mxu1  ;;  %4647 = vmatpush3.bf16.msra.mxu0 %v4799_v59 }
  0xf9   :  { %v528_v28 = vadd.f32 %v5342_v12, %v527_v26  ;;  %v999_v35 = vmax.f32 %v525_v22, 0.0  ;;  %v1063_v13 = vmax.f32 %v781_v4, 0.0  ;;  %v784_v14 = vadd.f32 %v5342_v12, %v783_v9 }
  0xfa   :  { %v1002_v32 = vmax.f32 %v536_v25, 0.0  ;;  %v1066_v17 = vmax.f32 %v792_v8, 0.0 }
  0xfb   :  { %v1000_v36 = vmax.f32 %v528_v28, 0.0  ;;  %v1064_v20 = vmax.f32 %v784_v14, 0.0 }
  0xfc   :  { %v1122_v39 = vpack.c.bf16 %v1002_v32, %v1001_v31  ;;  %v5404_v23 = vpack.c.bf16 %v1066_v17, %v1065_v7 }
  0xfd   :  { %v1121_v43 = vpack.c.bf16 %v1000_v36, %v999_v35  ;;  %v4382_v44 = vpop.f32.mrb[16].mxu0  ;;  %v5407_v25 = vpack.c.bf16 %v1064_v20, %v1063_v13  ;;  %v4446_v26 = vpop.f32.mrb[16].mxu1 }
  0xfe   :  { %v549_v47 = vadd.f32 %v4382_v44, %v5342_v12  ;;  %v540_v48 = vpop.f32.mrb[17].mxu0  ;;  %v805_v31 = vadd.f32 %v4446_v26, %v5342_v12  ;;  %v796_v32 = vpop.f32.mrb[17].mxu1 }
  0xff   :  { %v541_v50 = vadd.f32 %v5342_v12, %v540_v48  ;;  %v4383_v51 = vpop.f32.mrb[18].mxu0  ;;  %4520 = vmatprep.mubr.bf16.mxu1 %v1121_v43  ;;  %v797_v35 = vadd.f32 %v5342_v12, %v796_v32  ;;  %v4447_v36 = vpop.f32.mrb[18].mxu1 }
 0x100   :  { %v552_v53 = vadd.f32 %v4383_v51, %v5342_v12  ;;  %v543_v54 = vpop.f32.mrb[19].mxu0  ;;  %4521 = vmatmul.mubr.bf16.gmra.mrb[76].mxu1 %v1122_v39  ;;  %v1005_v60 = vmax.f32 %v549_v47, 0.0  ;;  %v1069_v38 = vmax.f32 %v805_v31, 0.0  ;;  %v808_v39 = vadd.f32 %v4447_v36, %v5342_v12  ;;  %v799_v40 = vpop.f32.mrb[19].mxu1 }
 0x101   :  { %v544_v56 = vadd.f32 %v5342_v12, %v543_v54  ;;  %v1003_v2 = vmax.f32 %v541_v50, 0.0  ;;  %v1067_v43 = vmax.f32 %v797_v35, 0.0  ;;  %v800_v44 = vadd.f32 %v5342_v12, %v799_v40 }
 0x102   :  { %v1006_v62 = vmax.f32 %v552_v53, 0.0  ;;  %v1070_v47 = vmax.f32 %v808_v39, 0.0 }
 0x103   :  { %v1004_v3 = vmax.f32 %v544_v56, 0.0  ;;  %v1068_v50 = vmax.f32 %v800_v44, 0.0 }
 0x104   :  { %v1124_v6 = vpack.c.bf16 %v1006_v62, %v1005_v60  ;;  %v5416_v53 = vpack.c.bf16 %v1070_v47, %v1069_v38 }
 0x105   :  { %v1123_v10 = vpack.c.bf16 %v1004_v3, %v1003_v2  ;;  %v4386_v11 = vpop.f32.mrb[20].mxu0  ;;  %v5419_v56 = vpack.c.bf16 %v1068_v50, %v1067_v43  ;;  %v4450_v58 = vpop.f32.mrb[20].mxu1 }
 0x106   :  { %v565_v15 = vadd.f32 %v4386_v11, %v5342_v12  ;;  %v556_v16 = vpop.f32.mrb[21].mxu0  ;;  %v821_v0 = vadd.f32 %v4450_v58, %v5342_v12  ;;  %v812_v1 = vpop.f32.mrb[21].mxu1 }
 0x107   :  { %v557_v18 = vadd.f32 %v5342_v12, %v556_v16  ;;  %v4387_v19 = vpop.f32.mrb[22].mxu0  ;;  %4524 = vmatprep.mubr.bf16.mxu1 %v1123_v10  ;;  %v813_v4 = vadd.f32 %v5342_v12, %v812_v1  ;;  %v4451_v5 = vpop.f32.mrb[22].mxu1  ;;  %v4800_v1 = vld [vmem:[%s6480_s5 + $0x30] sm:$0xff]  }
 0x108   :  { %v568_v21 = vadd.f32 %v4387_v19, %v5342_v12  ;;  %v559_v22 = vpop.f32.mrb[23].mxu0  ;;  %4525 = vmatmul.mubr.bf16.gmra.mrb[80].mxu1 %v1124_v6  ;;  %v1009_v28 = vmax.f32 %v565_v15, 0.0  ;;  %v1073_v7 = vmax.f32 %v821_v0, 0.0  ;;  %v824_v8 = vadd.f32 %v4451_v5, %v5342_v12  ;;  %v815_v9 = vpop.f32.mrb[23].mxu1  ;;  %4648 = vmatprep.subr.bf16.mxu0 %v4800_v1 }
 0x109   :  { %v560_v24 = vadd.f32 %v5342_v12, %v559_v22  ;;  %v1007_v33 = vmax.f32 %v557_v18, 0.0  ;;  %v1071_v13 = vmax.f32 %v813_v4, 0.0  ;;  %v816_v14 = vadd.f32 %v5342_v12, %v815_v9  ;;  %4649 = vmatpush3.bf16.msra.mxu0 %v4800_v1 }
 0x10a   :  { %v1010_v30 = vmax.f32 %v568_v21, 0.0  ;;  %v1074_v17 = vmax.f32 %v824_v8, 0.0 }
 0x10b   :  { %v1008_v34 = vmax.f32 %v560_v24, 0.0  ;;  %v1072_v20 = vmax.f32 %v816_v14, 0.0 }
 0x10c   :  { %v1126_v37 = vpack.c.bf16 %v1010_v30, %v1009_v28  ;;  %v5431_v24 = vpack.c.bf16 %v1074_v17, %v1073_v7 }
 0x10d   :  { %v1125_v41 = vpack.c.bf16 %v1008_v34, %v1007_v33  ;;  %v4390_v42 = vpop.f32.mrb[24].mxu0  ;;  %v5434_v28 = vpack.c.bf16 %v1072_v20, %v1071_v13  ;;  %v4454_v30 = vpop.f32.mrb[24].mxu1 }
 0x10e   :  { %v581_v45 = vadd.f32 %v4390_v42, %v5342_v12  ;;  %v572_v46 = vpop.f32.mrb[25].mxu0  ;;  %v837_v33 = vadd.f32 %v4454_v30, %v5342_v12  ;;  %v828_v34 = vpop.f32.mrb[25].mxu1 }
 0x10f   :  { %v573_v48 = vadd.f32 %v5342_v12, %v572_v46  ;;  %v4391_v49 = vpop.f32.mrb[26].mxu0  ;;  %4528 = vmatprep.mubr.bf16.mxu1 %v1125_v41  ;;  %v4455_v38 = vpop.f32.mrb[26].mxu1 }
 0x110   :  { %v584_v51 = vadd.f32 %v4391_v49, %v5342_v12  ;;  %v575_v52 = vpop.f32.mrb[27].mxu0  ;;  %4529 = vmatmul.mubr.bf16.gmra.mrb[84].mxu1 %v1126_v37  ;;  %v1013_v60 = vmax.f32 %v581_v45, 0.0  ;;  %v829_v37 = vadd.f32 %v5342_v12, %v828_v34  ;;  %v1077_v40 = vmax.f32 %v837_v33, 0.0  ;;  %v831_v42 = vpop.f32.mrb[27].mxu1 }
 0x111   :  { %v576_v54 = vadd.f32 %v5342_v12, %v575_v52  ;;  %v1011_v2 = vmax.f32 %v573_v48, 0.0  ;;  %v840_v41 = vadd.f32 %v4455_v38, %v5342_v12  ;;  %v832_v46 = vadd.f32 %v5342_v12, %v831_v42 }
 0x112   :  { %v1014_v62 = vmax.f32 %v584_v51, 0.0  ;;  %v1075_v45 = vmax.f32 %v829_v37, 0.0 }
 0x113   :  { %v1012_v3 = vmax.f32 %v576_v54, 0.0  ;;  %v1078_v49 = vmax.f32 %v840_v41, 0.0  ;;  %v1076_v52 = vmax.f32 %v832_v46, 0.0 }
 0x114   :  { %v1128_v6 = vpack.c.bf16 %v1014_v62, %v1013_v60 }
 0x115   :  { %v1127_v10 = vpack.c.bf16 %v1012_v3, %v1011_v2  ;;  %v4394_v11 = vpop.f32.mrb[28].mxu0  ;;  %v5443_v59 = vpack.c.bf16 %v1078_v49, %v1077_v40  ;;  %v5446_v62 = vpack.c.bf16 %v1076_v52, %v1075_v45  ;;  %v4458_v0 = vpop.f32.mrb[28].mxu1 }
 0x116   :  { %v597_v15 = vadd.f32 %v4394_v11, %v5342_v12  ;;  %v588_v16 = vpop.f32.mrb[29].mxu0  ;;  %v853_v4 = vadd.f32 %v4458_v0, %v5342_v12  ;;  %v844_v5 = vpop.f32.mrb[29].mxu1 }
 0x117   :  { %v589_v18 = vadd.f32 %v5342_v12, %v588_v16  ;;  %v4395_v19 = vpop.f32.mrb[30].mxu0  ;;  %4532 = vmatprep.mubr.bf16.mxu1 %v1127_v10  ;;  %v845_v8 = vadd.f32 %v5342_v12, %v844_v5  ;;  %v4459_v9 = vpop.f32.mrb[30].mxu1 }
 0x118   :  { %v600_v21 = vadd.f32 %v4395_v19, %v5342_v12  ;;  %v591_v22 = vpop.f32.mrb[31].mxu0  ;;  %4533 = vmatmul.mubr.bf16.gmra.mrb[88].mxu1 %v1128_v6  ;;  %v1017_v31 = vmax.f32 %v597_v15, 0.0  ;;  %v1081_v11 = vmax.f32 %v853_v4, 0.0  ;;  %v856_v13 = vadd.f32 %v4459_v9, %v5342_v12  ;;  %v847_v14 = vpop.f32.mrb[31].mxu1  ;;  %v4801_v9 = vld [vmem:[%s6480_s5 + $0x38] sm:$0xff]  }
 0x119   :  { %v592_v26 = vadd.f32 %v5342_v12, %v591_v22  ;;  %v1015_v35 = vmax.f32 %v589_v18, 0.0  ;;  %v1079_v17 = vmax.f32 %v845_v8, 0.0  ;;  %v848_v18 = vadd.f32 %v5342_v12, %v847_v14  ;;  %4650 = vmatprep.subr.bf16.mxu0 %v4801_v9 }
 0x11a   :  { %v1018_v32 = vmax.f32 %v600_v21, 0.0  ;;  %v1082_v21 = vmax.f32 %v856_v13, 0.0  ;;  %4651 = vmatpush3.bf16.msra.mxu0 %v4801_v9 }
 0x11b   :  { %v1016_v36 = vmax.f32 %v592_v26, 0.0  ;;  %v1080_v30 = vmax.f32 %v848_v18, 0.0 }
 0x11c   :  { %v1130_v39 = vpack.c.bf16 %v1018_v32, %v1017_v31  ;;  %v5458_v33 = vpack.c.bf16 %v1082_v21, %v1081_v11 }
 0x11d   :  { %v1129_v43 = vpack.c.bf16 %v1016_v36, %v1015_v35  ;;  %v4398_v44 = vpop.f32.mrb[32].mxu0  ;;  %v5461_v35 = vpack.c.bf16 %v1080_v30, %v1079_v17  ;;  %v4462_v36 = vpop.f32.mrb[32].mxu1 }
 0x11e   :  { %v613_v47 = vadd.f32 %v4398_v44, %v5342_v12  ;;  %v604_v48 = vpop.f32.mrb[33].mxu0  ;;  %v860_v40 = vpop.f32.mrb[33].mxu1 }
 0x11f   :  { %v605_v50 = vadd.f32 %v5342_v12, %v604_v48  ;;  %v4399_v51 = vpop.f32.mrb[34].mxu0  ;;  %4536 = vmatprep.mubr.bf16.mxu1 %v1129_v43  ;;  %v861_v43 = vadd.f32 %v5342_v12, %v860_v40  ;;  %v4463_v44 = vpop.f32.mrb[34].mxu1 }
 0x120   :  { %v616_v54 = vadd.f32 %v4399_v51, %v5342_v12  ;;  %v607_v58 = vpop.f32.mrb[35].mxu0  ;;  %4537 = vmatmul.mubr.bf16.gmra.mrb[92].mxu1 %v1130_v39  ;;  %v1021_v2 = vmax.f32 %v613_v47, 0.0  ;;  %v869_v39 = vadd.f32 %v4462_v36, %v5342_v12  ;;  %v872_v47 = vadd.f32 %v4463_v44, %v5342_v12  ;;  %v863_v48 = vpop.f32.mrb[35].mxu1 }
 0x121   :  { %v608_v60 = vadd.f32 %v5342_v12, %v607_v58  ;;  %v1019_v6 = vmax.f32 %v605_v50, 0.0  ;;  %v1083_v51 = vmax.f32 %v861_v43, 0.0  ;;  %v864_v52 = vadd.f32 %v5342_v12, %v863_v48 }
 0x122   :  { %v1022_v3 = vmax.f32 %v616_v54, 0.0  ;;  %v1085_v46 = vmax.f32 %v869_v39, 0.0 }
 0x123   :  { %v1020_v7 = vmax.f32 %v608_v60, 0.0  ;;  %v1086_v60 = vmax.f32 %v872_v47, 0.0 }
 0x124   :  { %v1132_v10 = vpack.c.bf16 %v1022_v3, %v1021_v2  ;;  %v1084_v2 = vmax.f32 %v864_v52, 0.0 }
 0x125   :  { %v1131_v15 = vpack.c.bf16 %v1020_v7, %v1019_v6  ;;  %v4402_v16 = vpop.f32.mrb[36].mxu0  ;;  %v5470_v5 = vpack.c.bf16 %v1086_v60, %v1085_v46  ;;  %v4466_v8 = vpop.f32.mrb[36].mxu1 }
 0x126   :  { %v629_v19 = vadd.f32 %v4402_v16, %v5342_v12  ;;  %v620_v20 = vpop.f32.mrb[37].mxu0  ;;  %v5473_v7 = vpack.c.bf16 %v1084_v2, %v1083_v51  ;;  %v885_v13 = vadd.f32 %v4466_v8, %v5342_v12  ;;  %v876_v14 = vpop.f32.mrb[37].mxu1 }
 0x127   :  { %v621_v22 = vadd.f32 %v5342_v12, %v620_v20  ;;  %v4403_v26 = vpop.f32.mrb[38].mxu0  ;;  %4540 = vmatprep.mubr.bf16.mxu1 %v1131_v15  ;;  %v877_v17 = vadd.f32 %v5342_v12, %v876_v14  ;;  %v4467_v18 = vpop.f32.mrb[38].mxu1 }
 0x128   :  { %v632_v31 = vadd.f32 %v4403_v26, %v5342_v12  ;;  %v623_v32 = vpop.f32.mrb[39].mxu0  ;;  %4541 = vmatmul.mubr.bf16.gmra.mrb[96].mxu1 %v1132_v10  ;;  %v1025_v37 = vmax.f32 %v629_v19, 0.0  ;;  %v1089_v20 = vmax.f32 %v885_v13, 0.0  ;;  %v888_v21 = vadd.f32 %v4467_v18, %v5342_v12 }
 0x129   :  { %v624_v34 = vadd.f32 %v5342_v12, %v623_v32  ;;  %v1023_v41 = vmax.f32 %v621_v22, 0.0  ;;  %v879_v22 = vpop.f32.mrb[39].mxu1 }
 0x12a   :  { %v1026_v38 = vmax.f32 %v632_v31, 0.0  ;;  %v1087_v31 = vmax.f32 %v877_v17, 0.0  ;;  %v880_v32 = vadd.f32 %v5342_v12, %v879_v22 }
 0x12b   :  { %v1024_v42 = vmax.f32 %v624_v34, 0.0 }
 0x12c   :  { %v1134_v45 = vpack.c.bf16 %v1026_v38, %v1025_v37  ;;  %v1090_v37 = vmax.f32 %v888_v21, 0.0  ;;  %v1088_v40 = vmax.f32 %v880_v32, 0.0 }
 0x12d   :  { %v1133_v49 = vpack.c.bf16 %v1024_v42, %v1023_v41  ;;  %v4406_v50 = vpop.f32.mrb[40].mxu0  ;;  %v4470_v46 = vpop.f32.mrb[40].mxu1 }
 0x12e   :  { %v645_v54 = vadd.f32 %v4406_v50, %v5342_v12  ;;  %v636_v58 = vpop.f32.mrb[41].mxu0  ;;  %v5485_v43 = vpack.c.bf16 %v1090_v37, %v1089_v20  ;;  %v892_v50 = vpop.f32.mrb[41].mxu1 }
 0x12f   :  { %v637_v0 = vadd.f32 %v5342_v12, %v636_v58  ;;  %v4407_v1 = vpop.f32.mrb[42].mxu0  ;;  %4544 = vmatprep.mubr.bf16.mxu1 %v1133_v49  ;;  %v901_v49 = vadd.f32 %v4470_v46, %v5342_v12  ;;  %v4471_v58 = vpop.f32.mrb[42].mxu1 }
 0x130   :  { %v648_v3 = vadd.f32 %v4407_v1, %v5342_v12  ;;  %v639_v4 = vpop.f32.mrb[43].mxu0  ;;  %4545 = vmatmul.mubr.bf16.gmra.mrb[100].mxu1 %v1134_v45  ;;  %v1029_v10 = vmax.f32 %v645_v54, 0.0  ;;  %v5488_v45 = vpack.c.bf16 %v1088_v40, %v1087_v31  ;;  %v893_v54 = vadd.f32 %v5342_v12, %v892_v50  ;;  %v895_v2 = vpop.f32.mrb[43].mxu1 }
 0x131   :  { %v640_v6 = vadd.f32 %v5342_v12, %v639_v4  ;;  %v1027_v15 = vmax.f32 %v637_v0, 0.0  ;;  %v1093_v0 = vmax.f32 %v901_v49, 0.0  ;;  %v904_v1 = vadd.f32 %v4471_v58, %v5342_v12 }
 0x132   :  { %v1030_v11 = vmax.f32 %v648_v3, 0.0  ;;  %v896_v8 = vadd.f32 %v5342_v12, %v895_v2 }
 0x133   :  { %v1028_v16 = vmax.f32 %v640_v6, 0.0  ;;  %v1091_v6 = vmax.f32 %v893_v54, 0.0 }
 0x134   :  { %v1136_v19 = vpack.c.bf16 %v1030_v11, %v1029_v10  ;;  %v1094_v11 = vmax.f32 %v904_v1, 0.0 }
 0x135   :  { %v1135_v26 = vpack.c.bf16 %v1028_v16, %v1027_v15  ;;  %v4410_v30 = vpop.f32.mrb[44].mxu0  ;;  %v1092_v15 = vmax.f32 %v896_v8, 0.0  ;;  %v4474_v21 = vpop.f32.mrb[44].mxu1 }
 0x136   :  { %v661_v34 = vadd.f32 %v4410_v30, %v5342_v12  ;;  %v652_v36 = vpop.f32.mrb[45].mxu0  ;;  %v5497_v18 = vpack.c.bf16 %v1094_v11, %v1093_v0  ;;  %v917_v30 = vadd.f32 %v4474_v21, %v5342_v12  ;;  %v908_v31 = vpop.f32.mrb[45].mxu1 }
 0x137   :  { %v653_v38 = vadd.f32 %v5342_v12, %v652_v36  ;;  %v4411_v39 = vpop.f32.mrb[46].mxu0  ;;  %4548 = vmatprep.mubr.bf16.mxu1 %v1135_v26  ;;  %v5500_v20 = vpack.c.bf16 %v1092_v15, %v1091_v6  ;;  %v909_v36 = vadd.f32 %v5342_v12, %v908_v31  ;;  %v4475_v37 = vpop.f32.mrb[46].mxu1 }
 0x138   :  { %v664_v41 = vadd.f32 %v4411_v39, %v5342_v12  ;;  %v655_v42 = vpop.f32.mrb[47].mxu0  ;;  %4549 = vmatmul.mubr.bf16.gmra.mrb[104].mxu1 %v1136_v19  ;;  %v1033_v47 = vmax.f32 %v661_v34, 0.0  ;;  %v1097_v39 = vmax.f32 %v917_v30, 0.0  ;;  %v920_v40 = vadd.f32 %v4475_v37, %v5342_v12 }
 0x139   :  { %v656_v44 = vadd.f32 %v5342_v12, %v655_v42  ;;  %v1031_v51 = vmax.f32 %v653_v38, 0.0  ;;  %v1095_v46 = vmax.f32 %v909_v36, 0.0 }
 0x13a   :  { %v1034_v48 = vmax.f32 %v664_v41, 0.0  ;;  %v911_v41 = vpop.f32.mrb[47].mxu1  ;;  %v1098_v50 = vmax.f32 %v920_v40, 0.0 }
 0x13b   :  { %v1032_v52 = vmax.f32 %v656_v44, 0.0 }
 0x13c   :  { %v1138_v60 = vpack.c.bf16 %v1034_v48, %v1033_v47  ;;  %v912_v47 = vadd.f32 %v5342_v12, %v911_v41  ;;  %v5509_v0 = vpack.c.bf16 %v1098_v50, %v1097_v39 }
 0x13d   :  { %v1137_v3 = vpack.c.bf16 %v1032_v52, %v1031_v51  ;;  %v4414_v4 = vpop.f32.mrb[48].mxu0 }
 0x13e   :  { %v677_v9 = vadd.f32 %v4414_v4, %v5342_v12  ;;  %v668_v10 = vpop.f32.mrb[49].mxu0  ;;  %v1096_v54 = vmax.f32 %v912_v47, 0.0 }
 0x13f   :  { %v669_v13 = vadd.f32 %v5342_v12, %v668_v10  ;;  %v4415_v14 = vpop.f32.mrb[50].mxu0  ;;  %4552 = vmatprep.mubr.bf16.mxu1 %v1137_v3  ;;  %v4478_v3 = vpop.f32.mrb[48].mxu1 }
 0x140   :  { %v680_v16 = vadd.f32 %v4415_v14, %v5342_v12  ;;  %v671_v17 = vpop.f32.mrb[51].mxu0  ;;  %4553 = vmatmul.mubr.bf16.gmra.mrb[108].mxu1 %v1138_v60  ;;  %v1037_v22 = vmax.f32 %v677_v9, 0.0  ;;  %v5512_v2 = vpack.c.bf16 %v1096_v54, %v1095_v46  ;;  %v933_v8 = vadd.f32 %v4478_v3, %v5342_v12  ;;  %v924_v9 = vpop.f32.mrb[49].mxu1 }
 0x141   :  { %v672_v19 = vadd.f32 %v5342_v12, %v671_v17  ;;  %v1035_v32 = vmax.f32 %v669_v13, 0.0  ;;  %v925_v13 = vadd.f32 %v5342_v12, %v924_v9  ;;  %v4479_v14 = vpop.f32.mrb[50].mxu1 }
 0x142   :  { %v1038_v26 = vmax.f32 %v680_v16, 0.0  ;;  %v1101_v16 = vmax.f32 %v933_v8, 0.0  ;;  %v936_v17 = vadd.f32 %v4479_v14, %v5342_v12 }
 0x143   :  { %v1036_v34 = vmax.f32 %v672_v19, 0.0  ;;  %v927_v19 = vpop.f32.mrb[51].mxu1 }
 0x144   :  { %v1140_v38 = vpack.c.bf16 %v1038_v26, %v1037_v22  ;;  %v1099_v26 = vmax.f32 %v925_v13, 0.0  ;;  %v928_v30 = vadd.f32 %v5342_v12, %v927_v19 }
 0x145   :  { %v1139_v42 = vpack.c.bf16 %v1036_v34, %v1035_v32  ;;  %v4418_v44 = vpop.f32.mrb[52].mxu0  ;;  %v1102_v34 = vmax.f32 %v936_v17, 0.0  ;;  %v4482_v46 = vpop.f32.mrb[52].mxu1 }
 0x146   :  { %v693_v48 = vadd.f32 %v4418_v44, %v5342_v12  ;;  %v684_v49 = vpop.f32.mrb[53].mxu0  ;;  %v940_v50 = vpop.f32.mrb[53].mxu1 }
 0x147   :  { %v685_v51 = vadd.f32 %v5342_v12, %v684_v49  ;;  %v4419_v52 = vpop.f32.mrb[54].mxu0  ;;  %4556 = vmatprep.mubr.bf16.mxu1 %v1139_v42  ;;  %v5521_v41 = vpack.c.bf16 %v1102_v34, %v1101_v16  ;;  %v949_v49 = vadd.f32 %v4482_v46, %v5342_v12  ;;  %v941_v54 = vadd.f32 %v5342_v12, %v940_v50 }
 0x148   :  { %v696_v58 = vadd.f32 %v4419_v52, %v5342_v12  ;;  %v687_v60 = vpop.f32.mrb[55].mxu0  ;;  %4557 = vmatmul.mubr.bf16.gmra.mrb[112].mxu1 %v1140_v38  ;;  %v1041_v4 = vmax.f32 %v693_v48, 0.0  ;;  %v1100_v38 = vmax.f32 %v928_v30, 0.0 }
 0x149   :  { %v688_v1 = vadd.f32 %v5342_v12, %v687_v60  ;;  %v1039_v10 = vmax.f32 %v685_v51, 0.0  ;;  %v1103_v9 = vmax.f32 %v941_v54, 0.0 }
 0x14a   :  { %v1042_v6 = vmax.f32 %v696_v58, 0.0  ;;  %v5524_v44 = vpack.c.bf16 %v1100_v38, %v1099_v26  ;;  %v4483_v58 = vpop.f32.mrb[54].mxu1 }
 0x14b   :  { %v1040_v11 = vmax.f32 %v688_v1, 0.0  ;;  %v1105_v1 = vmax.f32 %v949_v49, 0.0  ;;  %v952_v3 = vadd.f32 %v4483_v58, %v5342_v12 }
 0x14c   :  { %v1142_v15 = vpack.c.bf16 %v1042_v6, %v1041_v4  ;;  %v943_v4 = vpop.f32.mrb[55].mxu1 }
 0x14d   :  { %v1141_v21 = vpack.c.bf16 %v1040_v11, %v1039_v10  ;;  %v4422_v22 = vpop.f32.mrb[56].mxu0  ;;  %v944_v10 = vadd.f32 %v5342_v12, %v943_v4  ;;  %v1106_v14 = vmax.f32 %v952_v3, 0.0 }
 0x14e   :  { %v709_v31 = vadd.f32 %v4422_v22, %v5342_v12  ;;  %v700_v32 = vpop.f32.mrb[57].mxu0 }
 0x14f   :  { %v701_v36 = vadd.f32 %v5342_v12, %v700_v32  ;;  %v4423_v37 = vpop.f32.mrb[58].mxu0  ;;  %4560 = vmatprep.mubr.bf16.mxu1 %v1141_v21  ;;  %v1104_v17 = vmax.f32 %v944_v10, 0.0  ;;  %v5533_v22 = vpack.c.bf16 %v1106_v14, %v1105_v1 }
 0x150   :  { %v712_v39 = vadd.f32 %v4423_v37, %v5342_v12  ;;  %v703_v40 = vpop.f32.mrb[59].mxu0  ;;  %4561 = vmatmul.mubr.bf16.gmra.mrb[116].mxu1 %v1142_v15  ;;  %v1045_v47 = vmax.f32 %v709_v31, 0.0  ;;  %v4486_v31 = vpop.f32.mrb[56].mxu1 }
 0x151   :  { %v704_v42 = vadd.f32 %v5342_v12, %v703_v40  ;;  %v1043_v51 = vmax.f32 %v701_v36, 0.0  ;;  %v5536_v30 = vpack.c.bf16 %v1104_v17, %v1103_v9  ;;  %v965_v36 = vadd.f32 %v4486_v31, %v5342_v12  ;;  %v956_v37 = vpop.f32.mrb[57].mxu1 }
 0x152   :  { %v1046_v48 = vmax.f32 %v712_v39, 0.0  ;;  %v957_v40 = vadd.f32 %v5342_v12, %v956_v37 }
 0x153   :  { %v1044_v52 = vmax.f32 %v704_v42, 0.0  ;;  %v4487_v42 = vpop.f32.mrb[58].mxu1 }
 0x154   :  { %v1144_v60 = vpack.c.bf16 %v1046_v48, %v1045_v47  ;;  %v1109_v47 = vmax.f32 %v965_v36, 0.0  ;;  %v968_v48 = vadd.f32 %v4487_v42, %v5342_v12  ;;  %v959_v49 = vpop.f32.mrb[59].mxu1 }
 0x155   :  { %v1143_v6 = vpack.c.bf16 %v1044_v52, %v1043_v51  ;;  %v4426_v8 = vpop.f32.mrb[60].mxu0  ;;  %v1107_v51 = vmax.f32 %v957_v40, 0.0  ;;  %v960_v52 = vadd.f32 %v5342_v12, %v959_v49  ;;  %v4490_v3 = vpop.f32.mrb[60].mxu1 }
 0x156   :  { %v725_v11 = vadd.f32 %v4426_v8, %v5342_v12  ;;  %v716_v13 = vpop.f32.mrb[61].mxu0  ;;  %v1110_v54 = vmax.f32 %v968_v48, 0.0  ;;  %v981_v4 = vadd.f32 %v4490_v3, %v5342_v12 }
 0x157   :  { %v717_v15 = vadd.f32 %v5342_v12, %v716_v13  ;;  %v4427_v16 = vpop.f32.mrb[62].mxu0  ;;  %4564 = vmatprep.mubr.bf16.mxu1 %v1143_v6  ;;  %v1108_v58 = vmax.f32 %v960_v52, 0.0  ;;  %v972_v6 = vpop.f32.mrb[61].mxu1 }
 0x158   :  { %v728_v19 = vadd.f32 %v4427_v16, %v5342_v12  ;;  %v719_v21 = vpop.f32.mrb[63].mxu0  ;;  %4565 = vmatmul.mubr.bf16.gmra.mrb[120].mxu1 %v1144_v60  ;;  %v1049_v32 = vmax.f32 %v725_v11, 0.0  ;;  %v5542_v60 = vpack.c.bf16 %v1110_v54, %v1109_v47  ;;  %v973_v8 = vadd.f32 %v5342_v12, %v972_v6  ;;  %v4491_v9 = vpop.f32.mrb[62].mxu1 }
 0x159   :  { %v720_v26 = vadd.f32 %v5342_v12, %v719_v21  ;;  %v1047_v38 = vmax.f32 %v717_v15, 0.0  ;;  %v5545_v1 = vpack.c.bf16 %v1108_v58, %v1107_v51  ;;  %v1113_v10 = vmax.f32 %v981_v4, 0.0  ;;  %v975_v13 = vpop.f32.mrb[63].mxu1 }
 0x15a   :  { %v1050_v34 = vmax.f32 %v728_v19, 0.0  ;;  %v984_v11 = vadd.f32 %v4491_v9, %v5342_v12  ;;  %v1111_v14 = vmax.f32 %v973_v8, 0.0  ;;  %v976_v15 = vadd.f32 %v5342_v12, %v975_v13  ;;  %v5580_v12 = vld [vmem:[%s6482_s4] ss:$0 sm:$0xff] }
 0x15b   :  { %v1048_v39 = vmax.f32 %v720_v26, 0.0 }
 0x15c   :  { %v1146_v46 = vpack.c.bf16 %v1050_v34, %v1049_v32  ;;  %v1114_v16 = vmax.f32 %v984_v11, 0.0  ;;  %v1112_v17 = vmax.f32 %v976_v15, 0.0 }
 0x15d   :  { %v1145_v50 = vpack.c.bf16 %v1048_v39, %v1047_v38 }
 0x15e   :  { %v5555_v19 = vpack.c.bf16 %v1112_v17, %v1111_v14 }
 0x15f   :  { %4568 = vmatprep.mubr.bf16.mxu1 %v1145_v50 }
 0x160   :  { %4569 = vmatmul.mubr.bf16.gmra.mrb[124].mxu1 %v1146_v46 }
 0x161   :  { %4572 = vmatprep.mubr.bf16.mxu1 %v5365_v63  ;;  %v5552_v63 = vpack.c.bf16 %v1114_v16, %v1113_v10 }
 0x168   :  { %4573 = vmatmul.mubr.bf16.gmra.mrb[128].mxu1 %v5362_v61 }
 0x169   :  { %4576 = vmatprep.mubr.bf16.mxu1 %v5380_v29 }
 0x170   :  { %4577 = vmatmul.mubr.bf16.gmra.mrb[132].mxu1 %v5377_v27 }
 0x171   :  { %4580 = vmatprep.mubr.bf16.mxu1 %v5392_v57 }
 0x178   :  { %4581 = vmatmul.mubr.bf16.gmra.mrb[136].mxu1 %v5389_v55 }
 0x179   :  { %4584 = vmatprep.mubr.bf16.mxu1 %v5407_v25 }
 0x180   :  { %4585 = vmatmul.mubr.bf16.gmra.mrb[140].mxu1 %v5404_v23 }
 0x181   :  { %4588 = vmatprep.mubr.bf16.mxu1 %v5419_v56 }
 0x188   :  { %4589 = vmatmul.mubr.bf16.gmra.mrb[144].mxu1 %v5416_v53 }
 0x189   :  { %4592 = vmatprep.mubr.bf16.mxu1 %v5434_v28 }
 0x190   :  { %4593 = vmatmul.mubr.bf16.gmra.mrb[148].mxu1 %v5431_v24 }
 0x191   :  { %4596 = vmatprep.mubr.bf16.mxu1 %v5446_v62 }
 0x198   :  { %4597 = vmatmul.mubr.bf16.gmra.mrb[152].mxu1 %v5443_v59 }
 0x199   :  { %4600 = vmatprep.mubr.bf16.mxu1 %v5461_v35 }
 0x1a0   :  { %4601 = vmatmul.mubr.bf16.gmra.mrb[156].mxu1 %v5458_v33 }
 0x1a1   :  { %4604 = vmatprep.mubr.bf16.mxu1 %v5473_v7 }
 0x1a8   :  { %4605 = vmatmul.mubr.bf16.gmra.mrb[160].mxu1 %v5470_v5 }
 0x1a9   :  { %4608 = vmatprep.mubr.bf16.mxu1 %v5488_v45 }
 0x1b0   :  { %4609 = vmatmul.mubr.bf16.gmra.mrb[164].mxu1 %v5485_v43 }
 0x1b1   :  { %4612 = vmatprep.mubr.bf16.mxu1 %v5500_v20 }
 0x1b8   :  { %4613 = vmatmul.mubr.bf16.gmra.mrb[168].mxu1 %v5497_v18 }
 0x1b9   :  { %4616 = vmatprep.mubr.bf16.mxu1 %v5512_v2 }
 0x1bb   :  { %v4510_v61 = vpop.f32.mrb[64].mxu1 }
 0x1bc   :  { %v1293_v27 = vadd.f32 %v4510_v61, %v5580_v12  ;;  %v1284_v29 = vpop.f32.mrb[65].mxu1 }
 0x1bd   :  { %v1285_v55 = vadd.f32 %v5580_v12, %v1284_v29  ;;  %v4511_v57 = vpop.f32.mrb[66].mxu1 }
 0x1be   :  { %v1296_v23 = vadd.f32 %v4511_v57, %v5580_v12  ;;  %v1287_v25 = vpop.f32.mrb[67].mxu1  ;;  %v1797_v56 = vmax.f32 %v1293_v27, 0.0 }
 0x1bf   :  { %v1288_v53 = vadd.f32 %v5580_v12, %v1287_v25  ;;  %v1795_v28 = vmax.f32 %v1285_v55, 0.0 }
 0x1c0   :  { %v1798_v24 = vmax.f32 %v1296_v23, 0.0  ;;  %4617 = vmatmul.mubr.bf16.gmra.mrb[172].mxu1 %v5509_v0 }
 0x1c1   :  { %v1796_v59 = vmax.f32 %v1288_v53, 0.0  ;;  %4620 = vmatprep.mubr.bf16.mxu1 %v5524_v44 }
 0x1c2   :  { %v1924_v62 = vpack.c.bf16 %v1798_v24, %v1797_v56 }
 0x1c3   :  { %v1923_v33 = vpack.c.bf16 %v1796_v59, %v1795_v28  ;;  %v4514_v35 = vpop.f32.mrb[68].mxu1 }
 0x1c4   :  { %v1309_v5 = vadd.f32 %v4514_v35, %v5580_v12  ;;  %v1300_v7 = vpop.f32.mrb[69].mxu1 }
 0x1c5   :  { %v1301_v43 = vadd.f32 %v5580_v12, %v1300_v7  ;;  %v4515_v45 = vpop.f32.mrb[70].mxu1  ;;  %4652 = vmatprep.mubr.bf16.mxu0 %v1923_v33 }
 0x1c6   :  { %v1312_v18 = vadd.f32 %v4515_v45, %v5580_v12  ;;  %v1303_v20 = vpop.f32.mrb[71].mxu1  ;;  %4653 = vmatmul.mubr.bf16.vlgmr.msra.gmra.mrb[64].mxu0 %v1924_v62  ;;  %v1801_v2 = vmax.f32 %v1309_v5, 0.0 }
 0x1c7   :  { %v1304_v0 = vadd.f32 %v5580_v12, %v1303_v20  ;;  %v1799_v44 = vmax.f32 %v1301_v43, 0.0 }
 0x1c8   :  { %v1802_v21 = vmax.f32 %v1312_v18, 0.0  ;;  %4621 = vmatmul.mubr.bf16.gmra.mrb[176].mxu1 %v5521_v41 }
 0x1c9   :  { %v1800_v26 = vmax.f32 %v1304_v0, 0.0  ;;  %4624 = vmatprep.mubr.bf16.mxu1 %v5536_v30 }
 0x1ca   :  { %v1926_v31 = vpack.c.bf16 %v1802_v21, %v1801_v2 }
 0x1cb   :  { %v1925_v32 = vpack.c.bf16 %v1800_v26, %v1799_v44  ;;  %v4518_v34 = vpop.f32.mrb[72].mxu1 }
 0x1cc   :  { %v1325_v36 = vadd.f32 %v4518_v34, %v5580_v12  ;;  %v1316_v37 = vpop.f32.mrb[73].mxu1 }
 0x1cd   :  { %v1317_v38 = vadd.f32 %v5580_v12, %v1316_v37  ;;  %v4519_v39 = vpop.f32.mrb[74].mxu1  ;;  %4656 = vmatprep.mubr.bf16.mxu0 %v1925_v32 }
 0x1ce   :  { %v1328_v40 = vadd.f32 %v4519_v39, %v5580_v12  ;;  %v1319_v42 = vpop.f32.mrb[75].mxu1  ;;  %4657 = vmatmul.mubr.bf16.gmra.mrb[68].mxu0 %v1926_v31  ;;  %v1805_v46 = vmax.f32 %v1325_v36, 0.0 }
 0x1cf   :  { %v1320_v41 = vadd.f32 %v5580_v12, %v1319_v42  ;;  %v1803_v30 = vmax.f32 %v1317_v38, 0.0 }
 0x1d0   :  { %v1806_v47 = vmax.f32 %v1328_v40, 0.0  ;;  %4625 = vmatmul.mubr.bf16.gmra.mrb[180].mxu1 %v5533_v22 }
 0x1d1   :  { %v1804_v48 = vmax.f32 %v1320_v41, 0.0  ;;  %4628 = vmatprep.mubr.bf16.mxu1 %v5545_v1 }
 0x1d2   :  { %v1928_v49 = vpack.c.bf16 %v1806_v47, %v1805_v46 }
 0x1d3   :  { %v1927_v50 = vpack.c.bf16 %v1804_v48, %v1803_v30  ;;  %v4522_v51 = vpop.f32.mrb[76].mxu1 }
 0x1d4   :  { %v1341_v52 = vadd.f32 %v4522_v51, %v5580_v12  ;;  %v1332_v54 = vpop.f32.mrb[77].mxu1 }
 0x1d5   :  { %v1333_v58 = vadd.f32 %v5580_v12, %v1332_v54  ;;  %v4523_v3 = vpop.f32.mrb[78].mxu1  ;;  %4660 = vmatprep.mubr.bf16.mxu0 %v1927_v50 }
 0x1d6   :  { %v1344_v4 = vadd.f32 %v4523_v3, %v5580_v12  ;;  %v1335_v6 = vpop.f32.mrb[79].mxu1  ;;  %4661 = vmatmul.mubr.bf16.gmra.mrb[72].mxu0 %v1928_v49  ;;  %v1809_v8 = vmax.f32 %v1341_v52, 0.0 }
 0x1d7   :  { %v1336_v22 = vadd.f32 %v5580_v12, %v1335_v6  ;;  %v1807_v1 = vmax.f32 %v1333_v58, 0.0 }
 0x1d8   :  { %v1810_v9 = vmax.f32 %v1344_v4, 0.0  ;;  %4629 = vmatmul.mubr.bf16.gmra.mrb[184].mxu1 %v5542_v60 }
 0x1d9   :  { %v1808_v10 = vmax.f32 %v1336_v22, 0.0  ;;  %4632 = vmatprep.mubr.bf16.mxu1 %v5555_v19 }
 0x1da   :  { %v1930_v11 = vpack.c.bf16 %v1810_v9, %v1809_v8 }
 0x1db   :  { %v1929_v13 = vpack.c.bf16 %v1808_v10, %v1807_v1  ;;  %v4526_v14 = vpop.f32.mrb[80].mxu1 }
 0x1dc   :  { %v1357_v15 = vadd.f32 %v4526_v14, %v5580_v12  ;;  %v1348_v16 = vpop.f32.mrb[81].mxu1 }
 0x1dd   :  { %v1349_v17 = vadd.f32 %v5580_v12, %v1348_v16  ;;  %v4527_v61 = vpop.f32.mrb[82].mxu1  ;;  %4664 = vmatprep.mubr.bf16.mxu0 %v1929_v13 }
 0x1de   :  { %v1360_v27 = vadd.f32 %v4527_v61, %v5580_v12  ;;  %v1351_v29 = vpop.f32.mrb[83].mxu1  ;;  %4665 = vmatmul.mubr.bf16.gmra.mrb[76].mxu0 %v1930_v11  ;;  %v1813_v55 = vmax.f32 %v1357_v15, 0.0 }
 0x1df   :  { %v1352_v60 = vadd.f32 %v5580_v12, %v1351_v29  ;;  %v1811_v19 = vmax.f32 %v1349_v17, 0.0 }
 0x1e0   :  { %v1814_v57 = vmax.f32 %v1360_v27, 0.0  ;;  %4633 = vmatmul.mubr.bf16.gmra.mrb[188].mxu1 %v5552_v63 }
 0x1e1   :  { %v1812_v23 = vmax.f32 %v1352_v60, 0.0 }
 0x1e2   :  { %v1932_v25 = vpack.c.bf16 %v1814_v57, %v1813_v55 }
 0x1e3   :  { %v1931_v53 = vpack.c.bf16 %v1812_v23, %v1811_v19  ;;  %v4530_v56 = vpop.f32.mrb[84].mxu1 }
 0x1e4   :  { %v1373_v24 = vadd.f32 %v4530_v56, %v5580_v12  ;;  %v1364_v28 = vpop.f32.mrb[85].mxu1 }
 0x1e5   :  { %v1365_v59 = vadd.f32 %v5580_v12, %v1364_v28  ;;  %v4531_v62 = vpop.f32.mrb[86].mxu1  ;;  %4668 = vmatprep.mubr.bf16.mxu0 %v1931_v53 }
 0x1e6   :  { %v1376_v33 = vadd.f32 %v4531_v62, %v5580_v12  ;;  %v1367_v35 = vpop.f32.mrb[87].mxu1  ;;  %4669 = vmatmul.mubr.bf16.gmra.mrb[80].mxu0 %v1932_v25  ;;  %v1817_v7 = vmax.f32 %v1373_v24, 0.0 }
 0x1e7   :  { %v1368_v5 = vadd.f32 %v5580_v12, %v1367_v35  ;;  %v1815_v43 = vmax.f32 %v1365_v59, 0.0 }
 0x1e8   :  { %v1818_v63 = vmax.f32 %v1376_v33, 0.0 }
 0x1e9   :  { %v1816_v45 = vmax.f32 %v1368_v5, 0.0 }
 0x1ea   :  { %v1934_v18 = vpack.c.bf16 %v1818_v63, %v1817_v7 }
 0x1eb   :  { %v1933_v20 = vpack.c.bf16 %v1816_v45, %v1815_v43  ;;  %v4534_v0 = vpop.f32.mrb[88].mxu1 }
 0x1ec   :  { %v1389_v2 = vadd.f32 %v4534_v0, %v5580_v12  ;;  %v1380_v21 = vpop.f32.mrb[89].mxu1 }
 0x1ed   :  { %v1381_v44 = vadd.f32 %v5580_v12, %v1380_v21  ;;  %v4535_v26 = vpop.f32.mrb[90].mxu1  ;;  %4672 = vmatprep.mubr.bf16.mxu0 %v1933_v20 }
 0x1ee   :  { %v1392_v31 = vadd.f32 %v4535_v26, %v5580_v12  ;;  %v1383_v32 = vpop.f32.mrb[91].mxu1  ;;  %4673 = vmatmul.mubr.bf16.gmra.mrb[84].mxu0 %v1934_v18  ;;  %v1821_v36 = vmax.f32 %v1389_v2, 0.0 }
 0x1ef   :  { %v1384_v34 = vadd.f32 %v5580_v12, %v1383_v32  ;;  %v1819_v38 = vmax.f32 %v1381_v44, 0.0 }
 0x1f0   :  { %v1822_v37 = vmax.f32 %v1392_v31, 0.0 }
 0x1f1   :  { %v1820_v39 = vmax.f32 %v1384_v34, 0.0 }
 0x1f2   :  { %v1936_v40 = vpack.c.bf16 %v1822_v37, %v1821_v36 }
 0x1f3   :  { %v1935_v42 = vpack.c.bf16 %v1820_v39, %v1819_v38  ;;  %v4538_v41 = vpop.f32.mrb[92].mxu1 }
 0x1f4   :  { %v1405_v46 = vadd.f32 %v4538_v41, %v5580_v12  ;;  %v1396_v47 = vpop.f32.mrb[93].mxu1 }
 0x1f5   :  { %v1397_v30 = vadd.f32 %v5580_v12, %v1396_v47  ;;  %v4539_v48 = vpop.f32.mrb[94].mxu1  ;;  %4676 = vmatprep.mubr.bf16.mxu0 %v1935_v42 }
 0x1f6   :  { %v1408_v49 = vadd.f32 %v4539_v48, %v5580_v12  ;;  %v1399_v50 = vpop.f32.mrb[95].mxu1  ;;  %4677 = vmatmul.mubr.bf16.gmra.mrb[88].mxu0 %v1936_v40  ;;  %v1825_v52 = vmax.f32 %v1405_v46, 0.0 }
 0x1f7   :  { %v1400_v51 = vadd.f32 %v5580_v12, %v1399_v50  ;;  %v1823_v58 = vmax.f32 %v1397_v30, 0.0 }
 0x1f8   :  { %v1826_v54 = vmax.f32 %v1408_v49, 0.0 }
 0x1f9   :  { %v1824_v3 = vmax.f32 %v1400_v51, 0.0 }
 0x1fa   :  { %v1938_v4 = vpack.c.bf16 %v1826_v54, %v1825_v52 }
 0x1fb   :  { %v1937_v6 = vpack.c.bf16 %v1824_v3, %v1823_v58  ;;  %v4542_v22 = vpop.f32.mrb[96].mxu1 }
 0x1fc   :  { %v1421_v8 = vadd.f32 %v4542_v22, %v5580_v12  ;;  %v1412_v9 = vpop.f32.mrb[97].mxu1 }
 0x1fd   :  { %v1413_v1 = vadd.f32 %v5580_v12, %v1412_v9  ;;  %v4543_v10 = vpop.f32.mrb[98].mxu1  ;;  %4680 = vmatprep.mubr.bf16.mxu0 %v1937_v6 }
 0x1fe   :  { %v1424_v11 = vadd.f32 %v4543_v10, %v5580_v12  ;;  %v1415_v13 = vpop.f32.mrb[99].mxu1  ;;  %4681 = vmatmul.mubr.bf16.gmra.mrb[92].mxu0 %v1938_v4  ;;  %v1829_v15 = vmax.f32 %v1421_v8, 0.0 }
 0x1ff   :  { %v1416_v14 = vadd.f32 %v5580_v12, %v1415_v13  ;;  %v1827_v17 = vmax.f32 %v1413_v1, 0.0 }
 0x200   :  { %v1830_v16 = vmax.f32 %v1424_v11, 0.0 }
 0x201   :  { %v1828_v61 = vmax.f32 %v1416_v14, 0.0 }
 0x202   :  { %v1940_v27 = vpack.c.bf16 %v1830_v16, %v1829_v15 }
 0x203   :  { %v1939_v29 = vpack.c.bf16 %v1828_v61, %v1827_v17  ;;  %v4546_v60 = vpop.f32.mrb[100].mxu1 }
 0x204   :  { %v1437_v55 = vadd.f32 %v4546_v60, %v5580_v12  ;;  %v1428_v57 = vpop.f32.mrb[101].mxu1 }
 0x205   :  { %v1429_v19 = vadd.f32 %v5580_v12, %v1428_v57  ;;  %v4547_v23 = vpop.f32.mrb[102].mxu1  ;;  %4684 = vmatprep.mubr.bf16.mxu0 %v1939_v29 }
 0x206   :  { %v1440_v25 = vadd.f32 %v4547_v23, %v5580_v12  ;;  %v1431_v53 = vpop.f32.mrb[103].mxu1  ;;  %4685 = vmatmul.mubr.bf16.gmra.mrb[96].mxu0 %v1940_v27  ;;  %v1833_v24 = vmax.f32 %v1437_v55, 0.0 }
 0x207   :  { %v1432_v56 = vadd.f32 %v5580_v12, %v1431_v53  ;;  %v1831_v59 = vmax.f32 %v1429_v19, 0.0 }
 0x208   :  { %v1834_v28 = vmax.f32 %v1440_v25, 0.0 }
 0x209   :  { %v1832_v62 = vmax.f32 %v1432_v56, 0.0 }
 0x20a   :  { %v1942_v33 = vpack.c.bf16 %v1834_v28, %v1833_v24 }
 0x20b   :  { %v1941_v35 = vpack.c.bf16 %v1832_v62, %v1831_v59  ;;  %v4550_v5 = vpop.f32.mrb[104].mxu1 }
 0x20c   :  { %v1453_v7 = vadd.f32 %v4550_v5, %v5580_v12  ;;  %v1444_v63 = vpop.f32.mrb[105].mxu1 }
 0x20d   :  { %v1445_v43 = vadd.f32 %v5580_v12, %v1444_v63  ;;  %v4551_v45 = vpop.f32.mrb[106].mxu1  ;;  %4688 = vmatprep.mubr.bf16.mxu0 %v1941_v35 }
 0x20e   :  { %v1456_v18 = vadd.f32 %v4551_v45, %v5580_v12  ;;  %v1447_v20 = vpop.f32.mrb[107].mxu1  ;;  %4689 = vmatmul.mubr.bf16.gmra.mrb[100].mxu0 %v1942_v33  ;;  %v1837_v2 = vmax.f32 %v1453_v7, 0.0 }
 0x20f   :  { %v1448_v0 = vadd.f32 %v5580_v12, %v1447_v20  ;;  %v1835_v44 = vmax.f32 %v1445_v43, 0.0 }
 0x210   :  { %v1838_v21 = vmax.f32 %v1456_v18, 0.0 }
 0x211   :  { %v1836_v26 = vmax.f32 %v1448_v0, 0.0 }
 0x212   :  { %v1944_v31 = vpack.c.bf16 %v1838_v21, %v1837_v2 }
 0x213   :  { %v1943_v32 = vpack.c.bf16 %v1836_v26, %v1835_v44  ;;  %v4554_v34 = vpop.f32.mrb[108].mxu1 }
 0x214   :  { %v1469_v36 = vadd.f32 %v4554_v34, %v5580_v12  ;;  %v1460_v37 = vpop.f32.mrb[109].mxu1 }
 0x215   :  { %v1461_v38 = vadd.f32 %v5580_v12, %v1460_v37  ;;  %v4555_v39 = vpop.f32.mrb[110].mxu1  ;;  %4692 = vmatprep.mubr.bf16.mxu0 %v1943_v32 }
 0x216   :  { %v1472_v40 = vadd.f32 %v4555_v39, %v5580_v12  ;;  %v1463_v42 = vpop.f32.mrb[111].mxu1  ;;  %4693 = vmatmul.mubr.bf16.gmra.mrb[104].mxu0 %v1944_v31  ;;  %v1841_v46 = vmax.f32 %v1469_v36, 0.0 }
 0x217   :  { %v1464_v41 = vadd.f32 %v5580_v12, %v1463_v42  ;;  %v1839_v30 = vmax.f32 %v1461_v38, 0.0 }
 0x218   :  { %v1842_v47 = vmax.f32 %v1472_v40, 0.0 }
 0x219   :  { %v1840_v48 = vmax.f32 %v1464_v41, 0.0 }
 0x21a   :  { %v1946_v49 = vpack.c.bf16 %v1842_v47, %v1841_v46 }
 0x21b   :  { %v1945_v50 = vpack.c.bf16 %v1840_v48, %v1839_v30  ;;  %v4558_v51 = vpop.f32.mrb[112].mxu1 }
 0x21c   :  { %v1485_v52 = vadd.f32 %v4558_v51, %v5580_v12  ;;  %v1476_v54 = vpop.f32.mrb[113].mxu1 }
 0x21d   :  { %v1477_v58 = vadd.f32 %v5580_v12, %v1476_v54  ;;  %v4559_v3 = vpop.f32.mrb[114].mxu1  ;;  %4696 = vmatprep.mubr.bf16.mxu0 %v1945_v50 }
 0x21e   :  { %v1488_v4 = vadd.f32 %v4559_v3, %v5580_v12  ;;  %v1479_v6 = vpop.f32.mrb[115].mxu1  ;;  %4697 = vmatmul.mubr.bf16.gmra.mrb[108].mxu0 %v1946_v49  ;;  %v1845_v8 = vmax.f32 %v1485_v52, 0.0 }
 0x21f   :  { %v1480_v22 = vadd.f32 %v5580_v12, %v1479_v6  ;;  %v1843_v1 = vmax.f32 %v1477_v58, 0.0 }
 0x220   :  { %v1846_v9 = vmax.f32 %v1488_v4, 0.0 }
 0x221   :  { %v1844_v10 = vmax.f32 %v1480_v22, 0.0 }
 0x222   :  { %v1948_v11 = vpack.c.bf16 %v1846_v9, %v1845_v8 }
 0x223   :  { %v1947_v13 = vpack.c.bf16 %v1844_v10, %v1843_v1  ;;  %v4562_v14 = vpop.f32.mrb[116].mxu1 }
 0x224   :  { %v1501_v15 = vadd.f32 %v4562_v14, %v5580_v12  ;;  %v1492_v16 = vpop.f32.mrb[117].mxu1 }
 0x225   :  { %v1493_v17 = vadd.f32 %v5580_v12, %v1492_v16  ;;  %v4563_v61 = vpop.f32.mrb[118].mxu1  ;;  %4700 = vmatprep.mubr.bf16.mxu0 %v1947_v13 }
 0x226   :  { %v1504_v27 = vadd.f32 %v4563_v61, %v5580_v12  ;;  %v1495_v29 = vpop.f32.mrb[119].mxu1  ;;  %4701 = vmatmul.mubr.bf16.gmra.mrb[112].mxu0 %v1948_v11  ;;  %v1849_v55 = vmax.f32 %v1501_v15, 0.0 }
 0x227   :  { %v1496_v60 = vadd.f32 %v5580_v12, %v1495_v29  ;;  %v1847_v19 = vmax.f32 %v1493_v17, 0.0 }
 0x228   :  { %v1850_v57 = vmax.f32 %v1504_v27, 0.0 }
 0x229   :  { %v1848_v23 = vmax.f32 %v1496_v60, 0.0 }
 0x22a   :  { %v1950_v25 = vpack.c.bf16 %v1850_v57, %v1849_v55 }
 0x22b   :  { %v1949_v53 = vpack.c.bf16 %v1848_v23, %v1847_v19  ;;  %v4566_v56 = vpop.f32.mrb[120].mxu1 }
 0x22c   :  { %v1517_v24 = vadd.f32 %v4566_v56, %v5580_v12  ;;  %v1508_v28 = vpop.f32.mrb[121].mxu1 }
 0x22d   :  { %v1509_v59 = vadd.f32 %v5580_v12, %v1508_v28  ;;  %v4567_v62 = vpop.f32.mrb[122].mxu1  ;;  %4704 = vmatprep.mubr.bf16.mxu0 %v1949_v53 }
 0x22e   :  { %v1520_v33 = vadd.f32 %v4567_v62, %v5580_v12  ;;  %v1511_v35 = vpop.f32.mrb[123].mxu1  ;;  %4705 = vmatmul.mubr.bf16.gmra.mrb[116].mxu0 %v1950_v25  ;;  %v1853_v7 = vmax.f32 %v1517_v24, 0.0 }
 0x22f   :  { %v1512_v5 = vadd.f32 %v5580_v12, %v1511_v35  ;;  %v1851_v43 = vmax.f32 %v1509_v59, 0.0 }
 0x230   :  { %v1854_v63 = vmax.f32 %v1520_v33, 0.0 }
 0x231   :  { %v1852_v45 = vmax.f32 %v1512_v5, 0.0 }
 0x232   :  { %v1952_v18 = vpack.c.bf16 %v1854_v63, %v1853_v7 }
 0x233   :  { %v1951_v20 = vpack.c.bf16 %v1852_v45, %v1851_v43  ;;  %v4570_v0 = vpop.f32.mrb[124].mxu1 }
 0x234   :  { %v1533_v2 = vadd.f32 %v4570_v0, %v5580_v12  ;;  %v1524_v21 = vpop.f32.mrb[125].mxu1 }
 0x235   :  { %v1525_v44 = vadd.f32 %v5580_v12, %v1524_v21  ;;  %v4571_v26 = vpop.f32.mrb[126].mxu1  ;;  %4708 = vmatprep.mubr.bf16.mxu0 %v1951_v20 }
 0x236   :  { %v1536_v31 = vadd.f32 %v4571_v26, %v5580_v12  ;;  %v1527_v32 = vpop.f32.mrb[127].mxu1  ;;  %4709 = vmatmul.mubr.bf16.gmra.mrb[120].mxu0 %v1952_v18  ;;  %v1857_v36 = vmax.f32 %v1533_v2, 0.0 }
 0x237   :  { %v1528_v34 = vadd.f32 %v5580_v12, %v1527_v32  ;;  %v1855_v38 = vmax.f32 %v1525_v44, 0.0 }
 0x238   :  { %v1858_v37 = vmax.f32 %v1536_v31, 0.0 }
 0x239   :  { %v1856_v39 = vmax.f32 %v1528_v34, 0.0 }
 0x23a   :  { %v1954_v40 = vpack.c.bf16 %v1858_v37, %v1857_v36 }
 0x23b   :  { %v1953_v42 = vpack.c.bf16 %v1856_v39, %v1855_v38  ;;  %v4574_v41 = vpop.f32.mrb[128].mxu1 }
 0x23c   :  { %v1549_v46 = vadd.f32 %v4574_v41, %v5580_v12  ;;  %v1540_v47 = vpop.f32.mrb[129].mxu1 }
 0x23d   :  { %v1541_v30 = vadd.f32 %v5580_v12, %v1540_v47  ;;  %v4575_v48 = vpop.f32.mrb[130].mxu1  ;;  %4712 = vmatprep.mubr.bf16.mxu0 %v1953_v42 }
 0x23e   :  { %v1552_v49 = vadd.f32 %v4575_v48, %v5580_v12  ;;  %v1543_v50 = vpop.f32.mrb[131].mxu1  ;;  %4713 = vmatmul.mubr.bf16.gmra.mrb[124].mxu0 %v1954_v40  ;;  %v1861_v52 = vmax.f32 %v1549_v46, 0.0 }
 0x23f   :  { %v1544_v51 = vadd.f32 %v5580_v12, %v1543_v50  ;;  %v1859_v58 = vmax.f32 %v1541_v30, 0.0 }
 0x240   :  { %v1862_v54 = vmax.f32 %v1552_v49, 0.0 }
 0x241   :  { %v1860_v3 = vmax.f32 %v1544_v51, 0.0 }
 0x242   :  { %v1956_v4 = vpack.c.bf16 %v1862_v54, %v1861_v52 }
 0x243   :  { %v1955_v6 = vpack.c.bf16 %v1860_v3, %v1859_v58  ;;  %v4578_v22 = vpop.f32.mrb[132].mxu1 }
 0x244   :  { %v1565_v8 = vadd.f32 %v4578_v22, %v5580_v12  ;;  %v1556_v9 = vpop.f32.mrb[133].mxu1 }
 0x245   :  { %v1557_v1 = vadd.f32 %v5580_v12, %v1556_v9  ;;  %v4579_v10 = vpop.f32.mrb[134].mxu1  ;;  %4716 = vmatprep.mubr.bf16.mxu0 %v1955_v6 }
 0x246   :  { %v1568_v11 = vadd.f32 %v4579_v10, %v5580_v12  ;;  %v1559_v13 = vpop.f32.mrb[135].mxu1  ;;  %4717 = vmatmul.mubr.bf16.gmra.mrb[128].mxu0 %v1956_v4  ;;  %v1865_v15 = vmax.f32 %v1565_v8, 0.0 }
 0x247   :  { %v1560_v14 = vadd.f32 %v5580_v12, %v1559_v13  ;;  %v1863_v17 = vmax.f32 %v1557_v1, 0.0 }
 0x248   :  { %v1866_v16 = vmax.f32 %v1568_v11, 0.0 }
 0x249   :  { %v1864_v61 = vmax.f32 %v1560_v14, 0.0 }
 0x24a   :  { %v1958_v27 = vpack.c.bf16 %v1866_v16, %v1865_v15 }
 0x24b   :  { %v1957_v29 = vpack.c.bf16 %v1864_v61, %v1863_v17  ;;  %v4582_v60 = vpop.f32.mrb[136].mxu1 }
 0x24c   :  { %v1581_v55 = vadd.f32 %v4582_v60, %v5580_v12  ;;  %v1572_v57 = vpop.f32.mrb[137].mxu1 }
 0x24d   :  { %v1573_v19 = vadd.f32 %v5580_v12, %v1572_v57  ;;  %v4583_v23 = vpop.f32.mrb[138].mxu1  ;;  %4720 = vmatprep.mubr.bf16.mxu0 %v1957_v29 }
 0x24e   :  { %v1584_v25 = vadd.f32 %v4583_v23, %v5580_v12  ;;  %v1575_v53 = vpop.f32.mrb[139].mxu1  ;;  %4721 = vmatmul.mubr.bf16.gmra.mrb[132].mxu0 %v1958_v27  ;;  %v1869_v24 = vmax.f32 %v1581_v55, 0.0 }
 0x24f   :  { %v1576_v56 = vadd.f32 %v5580_v12, %v1575_v53  ;;  %v1867_v59 = vmax.f32 %v1573_v19, 0.0 }
 0x250   :  { %v1870_v28 = vmax.f32 %v1584_v25, 0.0 }
 0x251   :  { %v1868_v62 = vmax.f32 %v1576_v56, 0.0 }
 0x252   :  { %v1960_v33 = vpack.c.bf16 %v1870_v28, %v1869_v24 }
 0x253   :  { %v1959_v35 = vpack.c.bf16 %v1868_v62, %v1867_v59  ;;  %v4586_v5 = vpop.f32.mrb[140].mxu1 }
 0x254   :  { %v1597_v7 = vadd.f32 %v4586_v5, %v5580_v12  ;;  %v1588_v63 = vpop.f32.mrb[141].mxu1 }
 0x255   :  { %v1589_v43 = vadd.f32 %v5580_v12, %v1588_v63  ;;  %v4587_v45 = vpop.f32.mrb[142].mxu1  ;;  %4724 = vmatprep.mubr.bf16.mxu0 %v1959_v35 }
 0x256   :  { %v1600_v18 = vadd.f32 %v4587_v45, %v5580_v12  ;;  %v1591_v20 = vpop.f32.mrb[143].mxu1  ;;  %4725 = vmatmul.mubr.bf16.gmra.mrb[136].mxu0 %v1960_v33  ;;  %v1873_v2 = vmax.f32 %v1597_v7, 0.0 }
 0x257   :  { %v1592_v0 = vadd.f32 %v5580_v12, %v1591_v20  ;;  %v1871_v44 = vmax.f32 %v1589_v43, 0.0 }
 0x258   :  { %v1874_v21 = vmax.f32 %v1600_v18, 0.0 }
 0x259   :  { %v1872_v26 = vmax.f32 %v1592_v0, 0.0 }
 0x25a   :  { %v1962_v31 = vpack.c.bf16 %v1874_v21, %v1873_v2 }
 0x25b   :  { %v1961_v32 = vpack.c.bf16 %v1872_v26, %v1871_v44  ;;  %v4590_v34 = vpop.f32.mrb[144].mxu1 }
 0x25c   :  { %v1613_v36 = vadd.f32 %v4590_v34, %v5580_v12  ;;  %v1604_v37 = vpop.f32.mrb[145].mxu1 }
 0x25d   :  { %v1605_v38 = vadd.f32 %v5580_v12, %v1604_v37  ;;  %v4591_v39 = vpop.f32.mrb[146].mxu1  ;;  %4728 = vmatprep.mubr.bf16.mxu0 %v1961_v32 }
 0x25e   :  { %v1616_v40 = vadd.f32 %v4591_v39, %v5580_v12  ;;  %v1607_v42 = vpop.f32.mrb[147].mxu1  ;;  %4729 = vmatmul.mubr.bf16.gmra.mrb[140].mxu0 %v1962_v31  ;;  %v1877_v46 = vmax.f32 %v1613_v36, 0.0 }
 0x25f   :  { %v1608_v41 = vadd.f32 %v5580_v12, %v1607_v42  ;;  %v1875_v30 = vmax.f32 %v1605_v38, 0.0 }
 0x260   :  { %v1878_v47 = vmax.f32 %v1616_v40, 0.0 }
 0x261   :  { %v1876_v48 = vmax.f32 %v1608_v41, 0.0 }
 0x262   :  { %v1964_v49 = vpack.c.bf16 %v1878_v47, %v1877_v46 }
 0x263   :  { %v1963_v50 = vpack.c.bf16 %v1876_v48, %v1875_v30  ;;  %v4594_v51 = vpop.f32.mrb[148].mxu1 }
 0x264   :  { %v1629_v52 = vadd.f32 %v4594_v51, %v5580_v12  ;;  %v1620_v54 = vpop.f32.mrb[149].mxu1 }
 0x265   :  { %v1621_v58 = vadd.f32 %v5580_v12, %v1620_v54  ;;  %v4595_v3 = vpop.f32.mrb[150].mxu1  ;;  %4732 = vmatprep.mubr.bf16.mxu0 %v1963_v50 }
 0x266   :  { %v1632_v4 = vadd.f32 %v4595_v3, %v5580_v12  ;;  %v1623_v6 = vpop.f32.mrb[151].mxu1  ;;  %4733 = vmatmul.mubr.bf16.gmra.mrb[144].mxu0 %v1964_v49  ;;  %v1881_v8 = vmax.f32 %v1629_v52, 0.0 }
 0x267   :  { %v1624_v22 = vadd.f32 %v5580_v12, %v1623_v6  ;;  %v1879_v1 = vmax.f32 %v1621_v58, 0.0 }
 0x268   :  { %v1882_v9 = vmax.f32 %v1632_v4, 0.0 }
 0x269   :  { %v1880_v10 = vmax.f32 %v1624_v22, 0.0 }
 0x26a   :  { %v1966_v11 = vpack.c.bf16 %v1882_v9, %v1881_v8 }
 0x26b   :  { %v1965_v13 = vpack.c.bf16 %v1880_v10, %v1879_v1  ;;  %v4598_v14 = vpop.f32.mrb[152].mxu1 }
 0x26c   :  { %v1645_v15 = vadd.f32 %v4598_v14, %v5580_v12  ;;  %v1636_v16 = vpop.f32.mrb[153].mxu1 }
 0x26d   :  { %v1637_v17 = vadd.f32 %v5580_v12, %v1636_v16  ;;  %v4599_v61 = vpop.f32.mrb[154].mxu1  ;;  %4736 = vmatprep.mubr.bf16.mxu0 %v1965_v13 }
 0x26e   :  { %v1648_v27 = vadd.f32 %v4599_v61, %v5580_v12  ;;  %v1639_v29 = vpop.f32.mrb[155].mxu1  ;;  %4737 = vmatmul.mubr.bf16.gmra.mrb[148].mxu0 %v1966_v11  ;;  %v1885_v55 = vmax.f32 %v1645_v15, 0.0 }
 0x26f   :  { %v1640_v60 = vadd.f32 %v5580_v12, %v1639_v29  ;;  %v1883_v19 = vmax.f32 %v1637_v17, 0.0 }
 0x270   :  { %v1886_v57 = vmax.f32 %v1648_v27, 0.0 }
 0x271   :  { %v1884_v23 = vmax.f32 %v1640_v60, 0.0 }
 0x272   :  { %v1968_v25 = vpack.c.bf16 %v1886_v57, %v1885_v55 }
 0x273   :  { %v1967_v53 = vpack.c.bf16 %v1884_v23, %v1883_v19  ;;  %v4602_v56 = vpop.f32.mrb[156].mxu1 }
 0x274   :  { %v1661_v24 = vadd.f32 %v4602_v56, %v5580_v12  ;;  %v1652_v28 = vpop.f32.mrb[157].mxu1 }
 0x275   :  { %v1653_v59 = vadd.f32 %v5580_v12, %v1652_v28  ;;  %v4603_v62 = vpop.f32.mrb[158].mxu1  ;;  %4740 = vmatprep.mubr.bf16.mxu0 %v1967_v53 }
 0x276   :  { %v1664_v33 = vadd.f32 %v4603_v62, %v5580_v12  ;;  %v1655_v35 = vpop.f32.mrb[159].mxu1  ;;  %4741 = vmatmul.mubr.bf16.gmra.mrb[152].mxu0 %v1968_v25  ;;  %v1889_v7 = vmax.f32 %v1661_v24, 0.0  ;;  %v5706_v24 = vld [vmem:[%s6483_s6] ss:$0 sm:$0xff] }
 0x277   :  { %v1656_v5 = vadd.f32 %v5580_v12, %v1655_v35  ;;  %v1887_v43 = vmax.f32 %v1653_v59, 0.0 }
 0x278   :  { %v1890_v63 = vmax.f32 %v1664_v33, 0.0 }
 0x279   :  { %v1888_v45 = vmax.f32 %v1656_v5, 0.0 }
 0x27a   :  { %v1970_v18 = vpack.c.bf16 %v1890_v63, %v1889_v7 }
 0x27b   :  { %v1969_v20 = vpack.c.bf16 %v1888_v45, %v1887_v43  ;;  %v4606_v0 = vpop.f32.mrb[160].mxu1 }
 0x27c   :  { %v1677_v2 = vadd.f32 %v4606_v0, %v5580_v12  ;;  %v1668_v21 = vpop.f32.mrb[161].mxu1  ;;  %v5713_v0 = vld [vmem:[%s6484_s7] ss:$0 sm:$0xff] }
 0x27d   :  { %v1669_v44 = vadd.f32 %v5580_v12, %v1668_v21  ;;  %v4607_v26 = vpop.f32.mrb[162].mxu1  ;;  %4744 = vmatprep.mubr.bf16.mxu0 %v1969_v20 }
 0x27e   :  { %v1680_v31 = vadd.f32 %v4607_v26, %v5580_v12  ;;  %v1671_v32 = vpop.f32.mrb[163].mxu1  ;;  %4745 = vmatmul.mubr.bf16.gmra.mrb[156].mxu0 %v1970_v18  ;;  %v1893_v36 = vmax.f32 %v1677_v2, 0.0 }
 0x27f   :  { %v1672_v34 = vadd.f32 %v5580_v12, %v1671_v32  ;;  %v1891_v38 = vmax.f32 %v1669_v44, 0.0 }
 0x280   :  { %v1894_v37 = vmax.f32 %v1680_v31, 0.0 }
 0x281   :  { %v1892_v39 = vmax.f32 %v1672_v34, 0.0 }
 0x282   :  { %v1972_v40 = vpack.c.bf16 %v1894_v37, %v1893_v36 }
 0x283   :  { %v1971_v42 = vpack.c.bf16 %v1892_v39, %v1891_v38  ;;  %v4610_v41 = vpop.f32.mrb[164].mxu1 }
 0x284   :  { %v1693_v46 = vadd.f32 %v4610_v41, %v5580_v12  ;;  %v1684_v47 = vpop.f32.mrb[165].mxu1 }
 0x285   :  { %v1685_v30 = vadd.f32 %v5580_v12, %v1684_v47  ;;  %v4611_v48 = vpop.f32.mrb[166].mxu1  ;;  %4748 = vmatprep.mubr.bf16.mxu0 %v1971_v42 }
 0x286   :  { %v1696_v49 = vadd.f32 %v4611_v48, %v5580_v12  ;;  %v1687_v50 = vpop.f32.mrb[167].mxu1  ;;  %4749 = vmatmul.mubr.bf16.gmra.mrb[160].mxu0 %v1972_v40  ;;  %v1897_v52 = vmax.f32 %v1693_v46, 0.0 }
 0x287   :  { %v1688_v51 = vadd.f32 %v5580_v12, %v1687_v50  ;;  %v1895_v58 = vmax.f32 %v1685_v30, 0.0 }
 0x288   :  { %v1898_v54 = vmax.f32 %v1696_v49, 0.0 }
 0x289   :  { %v1896_v3 = vmax.f32 %v1688_v51, 0.0 }
 0x28a   :  { %v1974_v4 = vpack.c.bf16 %v1898_v54, %v1897_v52 }
 0x28b   :  { %v1973_v6 = vpack.c.bf16 %v1896_v3, %v1895_v58  ;;  %v4614_v22 = vpop.f32.mrb[168].mxu1 }
 0x28c   :  { %v1709_v8 = vadd.f32 %v4614_v22, %v5580_v12  ;;  %v1700_v9 = vpop.f32.mrb[169].mxu1 }
 0x28d   :  { %v1701_v1 = vadd.f32 %v5580_v12, %v1700_v9  ;;  %v4615_v10 = vpop.f32.mrb[170].mxu1  ;;  %4752 = vmatprep.mubr.bf16.mxu0 %v1973_v6 }
 0x28e   :  { %v1712_v11 = vadd.f32 %v4615_v10, %v5580_v12  ;;  %v1703_v13 = vpop.f32.mrb[171].mxu1  ;;  %4753 = vmatmul.mubr.bf16.gmra.mrb[164].mxu0 %v1974_v4  ;;  %v1901_v15 = vmax.f32 %v1709_v8, 0.0 }
 0x28f   :  { %v1704_v14 = vadd.f32 %v5580_v12, %v1703_v13  ;;  %v1899_v17 = vmax.f32 %v1701_v1, 0.0 }
 0x290   :  { %v1902_v16 = vmax.f32 %v1712_v11, 0.0 }
 0x291   :  { %v1900_v61 = vmax.f32 %v1704_v14, 0.0 }
 0x292   :  { %v1976_v27 = vpack.c.bf16 %v1902_v16, %v1901_v15 }
 0x293   :  { %v1975_v29 = vpack.c.bf16 %v1900_v61, %v1899_v17  ;;  %v4618_v60 = vpop.f32.mrb[172].mxu1 }
 0x294   :  { %v1725_v55 = vadd.f32 %v4618_v60, %v5580_v12  ;;  %v1716_v57 = vpop.f32.mrb[173].mxu1 }
 0x295   :  { %v1717_v19 = vadd.f32 %v5580_v12, %v1716_v57  ;;  %v4619_v23 = vpop.f32.mrb[174].mxu1  ;;  %4756 = vmatprep.mubr.bf16.mxu0 %v1975_v29 }
 0x296   :  { %v1728_v25 = vadd.f32 %v4619_v23, %v5580_v12  ;;  %v1719_v53 = vpop.f32.mrb[175].mxu1  ;;  %4757 = vmatmul.mubr.bf16.gmra.mrb[168].mxu0 %v1976_v27  ;;  %v1905_v28 = vmax.f32 %v1725_v55, 0.0  ;;  %v5734_v27 = vld [vmem:[%s6482_s4] ss:$0 sm:$0xff] }
 0x297   :  { %v1720_v56 = vadd.f32 %v5580_v12, %v1719_v53  ;;  %v1903_v62 = vmax.f32 %v1717_v19, 0.0 }
 0x298   :  { %v1906_v59 = vmax.f32 %v1728_v25, 0.0 }
 0x299   :  { %v1904_v33 = vmax.f32 %v1720_v56, 0.0  ;;  %v4654_v35 = vpop.f32.mrb[64].mxu0 }
 0x29a   :  { %v1978_v5 = vpack.c.bf16 %v1906_v59, %v1905_v28  ;;  %v2101_v7 = vadd.f32 %v4654_v35, %v5706_v24  ;;  %v2092_v63 = vpop.f32.mrb[65].mxu0 }
 0x29b   :  { %v1977_v43 = vpack.c.bf16 %v1904_v33, %v1903_v62  ;;  %v2093_v45 = vadd.f32 %v5706_v24, %v2092_v63  ;;  %v4622_v18 = vpop.f32.mrb[176].mxu1  ;;  %v4655_v20 = vpop.f32.mrb[66].mxu0 }
 0x29c   :  { %v2605_v2 = vmax.f32 %v2101_v7, 0.0  ;;  %v1741_v21 = vadd.f32 %v4622_v18, %v5580_v12  ;;  %v2104_v44 = vadd.f32 %v4655_v20, %v5706_v24  ;;  %v1732_v26 = vpop.f32.mrb[177].mxu1  ;;  %v2095_v31 = vpop.f32.mrb[67].mxu0 }
 0x29d   :  { %v2603_v32 = vmax.f32 %v2093_v45, 0.0  ;;  %v1733_v34 = vadd.f32 %v5580_v12, %v1732_v26  ;;  %v2096_v36 = vadd.f32 %v5706_v24, %v2095_v31  ;;  %v4623_v37 = vpop.f32.mrb[178].mxu1  ;;  %4760 = vmatprep.mubr.bf16.mxu0 %v1977_v43 }
 0x29e   :  { %v2606_v38 = vmax.f32 %v2104_v44, 0.0  ;;  %v1744_v39 = vadd.f32 %v4623_v37, %v5580_v12  ;;  %v1735_v40 = vpop.f32.mrb[179].mxu1  ;;  %4761 = vmatmul.mubr.bf16.gmra.mrb[172].mxu0 %v1978_v5  ;;  %v2740_v42 = vmul.f32 %v5713_v0, %v2605_v2  ;;  %v1909_v30 = vmax.f32 %v1741_v21, 0.0 }
 0x29f   :  { %v2604_v41 = vmax.f32 %v2096_v36, 0.0  ;;  %v1736_v46 = vadd.f32 %v5580_v12, %v1735_v40  ;;  %v2738_v47 = vmul.f32 %v5713_v0, %v2603_v32  ;;  %v1907_v49 = vmax.f32 %v1733_v34, 0.0 }
 0x2a0   :  { %v1910_v48 = vmax.f32 %v1744_v39, 0.0  ;;  %2870 = vadd.xlane.f32.xlu1 %v2740_v42  ;;  %v2741_v3 = vmul.f32 %v5713_v0, %v2606_v38 }
 0x2a1   :  { %v1908_v50 = vmax.f32 %v1736_v46, 0.0  ;;  %v4658_v51 = vpop.f32.mrb[68].mxu0  ;;  %2866 = vadd.xlane.f32.xlu0 %v2738_v47  ;;  %v2739_v9 = vmul.f32 %v5713_v0, %v2604_v41 }
 0x2a2   :  { %v1980_v52 = vpack.c.bf16 %v1910_v48, %v1909_v30  ;;  %v2117_v54 = vadd.f32 %v4658_v51, %v5706_v24  ;;  %v2108_v58 = vpop.f32.mrb[69].mxu0 }
 0x2a3   :  { %v1979_v4 = vpack.c.bf16 %v1908_v50, %v1907_v49  ;;  %v2109_v6 = vadd.f32 %v5706_v24, %v2108_v58  ;;  %v4626_v22 = vpop.f32.mrb[180].mxu1  ;;  %v4659_v8 = vpop.f32.mrb[70].mxu0 }
 0x2a4   :  { %v2609_v1 = vmax.f32 %v2117_v54, 0.0  ;;  %v1757_v10 = vadd.f32 %v4626_v22, %v5580_v12  ;;  %v2120_v11 = vadd.f32 %v4659_v8, %v5706_v24  ;;  %v1748_v13 = vpop.f32.mrb[181].mxu1  ;;  %2872 = vadd.xlane.f32.xlu1 %v2741_v3  ;;  %v2111_v14 = vpop.f32.mrb[71].mxu0 }
 0x2a5   :  { %v1749_v15 = vadd.f32 %v5580_v12, %v1748_v13  ;;  %v2112_v16 = vadd.f32 %v5706_v24, %v2111_v14  ;;  %v4627_v17 = vpop.f32.mrb[182].mxu1  ;;  %4764 = vmatprep.mubr.bf16.mxu0 %v1979_v4  ;;  %2868 = vadd.xlane.f32.xlu0 %v2739_v9  ;;  %v2607_v57 = vmax.f32 %v2109_v6, 0.0 }
 0x2a6   :  { %v2610_v61 = vmax.f32 %v2120_v11, 0.0  ;;  %v1760_v29 = vadd.f32 %v5734_v27, %v4627_v17  ;;  %v1751_v60 = vpop.f32.mrb[183].mxu1  ;;  %4765 = vmatmul.mubr.bf16.gmra.mrb[176].mxu0 %v1980_v52  ;;  %v2744_v55 = vmul.f32 %v5713_v0, %v2609_v1  ;;  %v1913_v19 = vmax.f32 %v1757_v10, 0.0 }
 0x2a7   :  { %v1752_v12 = vadd.f32 %v5734_v27, %v1751_v60  ;;  %v2608_v23 = vmax.f32 %v2112_v16, 0.0  ;;  %v1911_v56 = vmax.f32 %v1749_v15, 0.0  ;;  %v2742_v45 = vmul.f32 %v5713_v0, %v2607_v57 }
 0x2a8   :  { %v1914_v25 = vmax.f32 %v1760_v29, 0.0  ;;  %v2745_v53 = vmul.f32 %v5713_v0, %v2610_v61 }
 0x2a9   :  { %v1912_v28 = vmax.f32 %v1752_v12, 0.0  ;;  %v4662_v59 = vpop.f32.mrb[72].mxu0  ;;  %2878 = vadd.xlane.f32.xlu0 %v2744_v55  ;;  %v2743_v26 = vmul.f32 %v5713_v0, %v2608_v23 }
 0x2aa   :  { %v1982_v62 = vpack.c.bf16 %v1914_v25, %v1913_v19  ;;  %v2133_v33 = vadd.f32 %v4662_v59, %v5706_v24  ;;  %2880 = vadd.xlane.f32.xlu1 %v2745_v53  ;;  %v2124_v35 = vpop.f32.mrb[73].mxu0 }
 0x2ab   :  { %v1981_v5 = vpack.c.bf16 %v1912_v28, %v1911_v56  ;;  %v2125_v7 = vadd.f32 %v5706_v24, %v2124_v35  ;;  %v4630_v63 = vpop.f32.mrb[184].mxu1  ;;  %v4663_v43 = vpop.f32.mrb[74].mxu0 }
 0x2ac   :  { %v2613_v18 = vmax.f32 %v2133_v33, 0.0  ;;  %v1773_v20 = vadd.f32 %v5734_v27, %v4630_v63  ;;  %v2136_v2 = vadd.f32 %v4663_v43, %v5706_v24  ;;  %v1764_v21 = vpop.f32.mrb[185].mxu1  ;;  %v2127_v44 = vpop.f32.mrb[75].mxu0 }
 0x2ad   :  { %v1765_v31 = vadd.f32 %v5734_v27, %v1764_v21  ;;  %v2128_v32 = vadd.f32 %v5706_v24, %v2127_v44  ;;  %v4631_v34 = vpop.f32.mrb[186].mxu1  ;;  %4768 = vmatprep.mubr.bf16.mxu0 %v1981_v5  ;;  %2874 = vadd.xlane.f32.xlu0 %v2742_v45  ;;  %v2611_v40 = vmax.f32 %v2125_v7, 0.0 }
 0x2ae   :  { %v2614_v36 = vmax.f32 %v2136_v2, 0.0  ;;  %v1776_v37 = vadd.f32 %v5734_v27, %v4631_v34  ;;  %v1767_v38 = vpop.f32.mrb[187].mxu1  ;;  %4769 = vmatmul.mubr.bf16.gmra.mrb[180].mxu0 %v1982_v62  ;;  %2876 = vadd.xlane.f32.xlu1 %v2743_v26  ;;  %v2748_v39 = vmul.f32 %v5713_v0, %v2613_v18  ;;  %v1917_v41 = vmax.f32 %v1773_v20, 0.0 }
 0x2af   :  { %v1768_v42 = vadd.f32 %v5734_v27, %v1767_v38  ;;  %v2612_v46 = vmax.f32 %v2128_v32, 0.0  ;;  %v1915_v48 = vmax.f32 %v1765_v31, 0.0  ;;  %v2746_v22 = vmul.f32 %v5713_v0, %v2611_v40 }
 0x2b0   :  { %v1918_v47 = vmax.f32 %v1776_v37, 0.0  ;;  %v2749_v30 = vmul.f32 %v5713_v0, %v2614_v36 }
 0x2b1   :  { %v1916_v49 = vmax.f32 %v1768_v42, 0.0  ;;  %v4666_v50 = vpop.f32.mrb[76].mxu0  ;;  %2886 = vadd.xlane.f32.xlu0 %v2748_v39  ;;  %v2747_v13 = vmul.f32 %v5713_v0, %v2612_v46 }
 0x2b2   :  { %v1984_v51 = vpack.c.bf16 %v1918_v47, %v1917_v41  ;;  %v2149_v52 = vadd.f32 %v4666_v50, %v5706_v24  ;;  %v2140_v54 = vpop.f32.mrb[77].mxu0  ;;  %2888 = vadd.xlane.f32.xlu1 %v2749_v30 }
 0x2b3   :  { %v1983_v58 = vpack.c.bf16 %v1916_v49, %v1915_v48  ;;  %v2141_v3 = vadd.f32 %v5706_v24, %v2140_v54  ;;  %v4634_v4 = vpop.f32.mrb[188].mxu1  ;;  %v4667_v6 = vpop.f32.mrb[78].mxu0 }
 0x2b4   :  { %v2617_v8 = vmax.f32 %v2149_v52, 0.0  ;;  %v1789_v9 = vadd.f32 %v5734_v27, %v4634_v4  ;;  %v2152_v1 = vadd.f32 %v4667_v6, %v5706_v24  ;;  %v1780_v10 = vpop.f32.mrb[189].mxu1  ;;  %v2143_v11 = vpop.f32.mrb[79].mxu0 }
 0x2b5   :  { %v1781_v14 = vadd.f32 %v5734_v27, %v1780_v10  ;;  %v2144_v15 = vadd.f32 %v5706_v24, %v2143_v11  ;;  %v4635_v16 = vpop.f32.mrb[190].mxu1  ;;  %4772 = vmatprep.mubr.bf16.mxu0 %v1983_v58  ;;  %2882 = vadd.xlane.f32.xlu0 %v2746_v22  ;;  %v2615_v55 = vmax.f32 %v2141_v3, 0.0 }
 0x2b6   :  { %v2618_v17 = vmax.f32 %v2152_v1, 0.0  ;;  %v1792_v61 = vadd.f32 %v5734_v27, %v4635_v16  ;;  %v1783_v29 = vpop.f32.mrb[191].mxu1  ;;  %4773 = vmatmul.mubr.bf16.gmra.mrb[184].mxu0 %v1984_v51  ;;  %2884 = vadd.xlane.f32.xlu1 %v2747_v13  ;;  %v2752_v60 = vmul.f32 %v5713_v0, %v2617_v8  ;;  %v1921_v12 = vmax.f32 %v1789_v9, 0.0 }
 0x2b7   :  { %v1784_v57 = vadd.f32 %v5734_v27, %v1783_v29  ;;  %v2616_v19 = vmax.f32 %v2144_v15, 0.0  ;;  %v1919_v53 = vmax.f32 %v1781_v14, 0.0  ;;  %v2750_v27 = vmul.f32 %v5713_v0, %v2615_v55 }
 0x2b8   :  { %v1922_v23 = vmax.f32 %v1792_v61, 0.0  ;;  %v2753_v25 = vmul.f32 %v5713_v0, %v2618_v17 }
 0x2b9   :  { %v1920_v56 = vmax.f32 %v1784_v57, 0.0  ;;  %v4670_v28 = vpop.f32.mrb[80].mxu0  ;;  %2894 = vadd.xlane.f32.xlu0 %v2752_v60  ;;  %v2751_v18 = vmul.f32 %v5713_v0, %v2616_v19 }
 0x2ba   :  { %v1986_v59 = vpack.c.bf16 %v1922_v23, %v1921_v12  ;;  %v2165_v62 = vadd.f32 %v4670_v28, %v5706_v24  ;;  %v2156_v33 = vpop.f32.mrb[81].mxu0  ;;  %2896 = vadd.xlane.f32.xlu1 %v2753_v25 }
 0x2bb   :  { %v1985_v35 = vpack.c.bf16 %v1920_v56, %v1919_v53  ;;  %v2157_v5 = vadd.f32 %v5706_v24, %v2156_v33  ;;  %v4671_v7 = vpop.f32.mrb[82].mxu0 }
 0x2bc   :  { %v2621_v63 = vmax.f32 %v2165_v62, 0.0  ;;  %v2168_v43 = vadd.f32 %v4671_v7, %v5706_v24  ;;  %v2159_v45 = vpop.f32.mrb[83].mxu0 }
 0x2bd   :  { %v2160_v20 = vadd.f32 %v5706_v24, %v2159_v45  ;;  %4776 = vmatprep.mubr.bf16.mxu0 %v1985_v35  ;;  %2890 = vadd.xlane.f32.xlu0 %v2750_v27  ;;  %v2619_v44 = vmax.f32 %v2157_v5, 0.0 }
 0x2be   :  { %v2622_v2 = vmax.f32 %v2168_v43, 0.0  ;;  %4777 = vmatmul.mubr.bf16.gmra.mrb[188].mxu0 %v1986_v59  ;;  %2892 = vadd.xlane.f32.xlu1 %v2751_v18  ;;  %v2756_v21 = vmul.f32 %v5713_v0, %v2621_v63 }
 0x2bf   :  { %v2620_v26 = vmax.f32 %v2160_v20, 0.0  ;;  %v2754_v39 = vmul.f32 %v5713_v0, %v2619_v44 }
 0x2c0   :  { %v2757_v31 = vmul.f32 %v5713_v0, %v2622_v2 }
 0x2c1   :  { %v4674_v32 = vpop.f32.mrb[84].mxu0  ;;  %2902 = vadd.xlane.f32.xlu0 %v2756_v21  ;;  %v2755_v46 = vmul.f32 %v5713_v0, %v2620_v26 }
 0x2c2   :  { %v2181_v34 = vadd.f32 %v4674_v32, %v5706_v24  ;;  %v2172_v36 = vpop.f32.mrb[85].mxu0  ;;  %2904 = vadd.xlane.f32.xlu1 %v2757_v31 }
 0x2c3   :  { %v2173_v37 = vadd.f32 %v5706_v24, %v2172_v36  ;;  %v4675_v38 = vpop.f32.mrb[86].mxu0 }
 0x2c4   :  { %v2625_v40 = vmax.f32 %v2181_v34, 0.0  ;;  %v2184_v42 = vadd.f32 %v4675_v38, %v5706_v24  ;;  %v2175_v41 = vpop.f32.mrb[87].mxu0 }
 0x2c5   :  { %v2176_v47 = vadd.f32 %v5706_v24, %v2175_v41  ;;  %2898 = vadd.xlane.f32.xlu0 %v2754_v39  ;;  %v2623_v49 = vmax.f32 %v2173_v37, 0.0 }
 0x2c6   :  { %v2626_v30 = vmax.f32 %v2184_v42, 0.0  ;;  %2900 = vadd.xlane.f32.xlu1 %v2755_v46  ;;  %v2760_v48 = vmul.f32 %v5713_v0, %v2625_v40 }
 0x2c7   :  { %v2624_v50 = vmax.f32 %v2176_v47, 0.0  ;;  %v2758_v6 = vmul.f32 %v5713_v0, %v2623_v49 }
 0x2c8   :  { %v2761_v51 = vmul.f32 %v5713_v0, %v2626_v30 }
 0x2c9   :  { %v4678_v52 = vpop.f32.mrb[88].mxu0  ;;  %2910 = vadd.xlane.f32.xlu0 %v2760_v48  ;;  %v2759_v1 = vmul.f32 %v5713_v0, %v2624_v50 }
 0x2ca   :  { %v2197_v54 = vadd.f32 %v4678_v52, %v5706_v24  ;;  %v2188_v58 = vpop.f32.mrb[89].mxu0  ;;  %2912 = vadd.xlane.f32.xlu1 %v2761_v51 }
 0x2cb   :  { %v2189_v3 = vadd.f32 %v5706_v24, %v2188_v58  ;;  %v4679_v4 = vpop.f32.mrb[90].mxu0 }
 0x2cc   :  { %v2629_v22 = vmax.f32 %v2197_v54, 0.0  ;;  %v2200_v8 = vadd.f32 %v4679_v4, %v5706_v24  ;;  %v2191_v9 = vpop.f32.mrb[91].mxu0 }
 0x2cd   :  { %v2192_v10 = vadd.f32 %v5706_v24, %v2191_v9  ;;  %2906 = vadd.xlane.f32.xlu0 %v2758_v6  ;;  %v2627_v14 = vmax.f32 %v2189_v3, 0.0 }
 0x2ce   :  { %v2630_v11 = vmax.f32 %v2200_v8, 0.0  ;;  %2908 = vadd.xlane.f32.xlu1 %v2759_v1  ;;  %v2764_v13 = vmul.f32 %v5713_v0, %v2629_v22 }
 0x2cf   :  { %v2628_v15 = vmax.f32 %v2192_v10, 0.0  ;;  %v2762_v57 = vmul.f32 %v5713_v0, %v2627_v14 }
 0x2d0   :  { %v2765_v16 = vmul.f32 %v5713_v0, %v2630_v11 }
 0x2d1   :  { %v4682_v17 = vpop.f32.mrb[92].mxu0  ;;  %2918 = vadd.xlane.f32.xlu0 %v2764_v13  ;;  %v2763_v25 = vmul.f32 %v5713_v0, %v2628_v15 }
 0x2d2   :  { %v2213_v61 = vadd.f32 %v4682_v17, %v5706_v24  ;;  %v2204_v29 = vpop.f32.mrb[93].mxu0  ;;  %2920 = vadd.xlane.f32.xlu1 %v2765_v16 }
 0x2d3   :  { %v2205_v60 = vadd.f32 %v5706_v24, %v2204_v29  ;;  %v4683_v55 = vpop.f32.mrb[94].mxu0 }
 0x2d4   :  { %v2633_v12 = vmax.f32 %v2213_v61, 0.0  ;;  %v2216_v19 = vadd.f32 %v4683_v55, %v5706_v24  ;;  %v2207_v23 = vpop.f32.mrb[95].mxu0 }
 0x2d5   :  { %v2208_v53 = vadd.f32 %v5706_v24, %v2207_v23  ;;  %2914 = vadd.xlane.f32.xlu0 %v2762_v57  ;;  %v2631_v59 = vmax.f32 %v2205_v60, 0.0 }
 0x2d6   :  { %v2634_v56 = vmax.f32 %v2216_v19, 0.0  ;;  %2916 = vadd.xlane.f32.xlu1 %v2763_v25  ;;  %v2768_v28 = vmul.f32 %v5713_v0, %v2633_v12 }
 0x2d7   :  { %v2632_v62 = vmax.f32 %v2208_v53, 0.0  ;;  %v2766_v43 = vmul.f32 %v5713_v0, %v2631_v59 }
 0x2d8   :  { %v2769_v33 = vmul.f32 %v5713_v0, %v2634_v56 }
 0x2d9   :  { %v4686_v35 = vpop.f32.mrb[96].mxu0  ;;  %2926 = vadd.xlane.f32.xlu0 %v2768_v28  ;;  %v2767_v2 = vmul.f32 %v5713_v0, %v2632_v62 }
 0x2da   :  { %v2229_v5 = vadd.f32 %v4686_v35, %v5706_v24  ;;  %v2220_v7 = vpop.f32.mrb[97].mxu0  ;;  %2928 = vadd.xlane.f32.xlu1 %v2769_v33 }
 0x2db   :  { %v2221_v27 = vadd.f32 %v5706_v24, %v2220_v7  ;;  %v4687_v63 = vpop.f32.mrb[98].mxu0 }
 0x2dc   :  { %v2637_v45 = vmax.f32 %v2229_v5, 0.0  ;;  %v2232_v18 = vadd.f32 %v4687_v63, %v5706_v24  ;;  %v2223_v20 = vpop.f32.mrb[99].mxu0 }
 0x2dd   :  { %v2224_v21 = vadd.f32 %v5706_v24, %v2223_v20  ;;  %2922 = vadd.xlane.f32.xlu0 %v2766_v43  ;;  %v2635_v31 = vmax.f32 %v2221_v27, 0.0 }
 0x2de   :  { %v2638_v44 = vmax.f32 %v2232_v18, 0.0  ;;  %2924 = vadd.xlane.f32.xlu1 %v2767_v2  ;;  %v2772_v26 = vmul.f32 %v5713_v0, %v2637_v45 }
 0x2df   :  { %v2636_v32 = vmax.f32 %v2224_v21, 0.0  ;;  %v2770_v42 = vmul.f32 %v5713_v0, %v2635_v31 }
 0x2e0   :  { %v2773_v34 = vmul.f32 %v5713_v0, %v2638_v44 }
 0x2e1   :  { %v4690_v36 = vpop.f32.mrb[100].mxu0  ;;  %2934 = vadd.xlane.f32.xlu0 %v2772_v26  ;;  %v2771_v30 = vmul.f32 %v5713_v0, %v2636_v32 }
 0x2e2   :  { %v2245_v37 = vadd.f32 %v4690_v36, %v5706_v24  ;;  %v2236_v38 = vpop.f32.mrb[101].mxu0  ;;  %2936 = vadd.xlane.f32.xlu1 %v2773_v34 }
 0x2e3   :  { %v2237_v39 = vadd.f32 %v5706_v24, %v2236_v38  ;;  %v4691_v40 = vpop.f32.mrb[102].mxu0 }
 0x2e4   :  { %v2641_v41 = vmax.f32 %v2245_v37, 0.0  ;;  %v2248_v46 = vadd.f32 %v4691_v40, %v5706_v24  ;;  %v2239_v47 = vpop.f32.mrb[103].mxu0 }
 0x2e5   :  { %v2240_v48 = vadd.f32 %v5706_v24, %v2239_v47  ;;  %2930 = vadd.xlane.f32.xlu0 %v2770_v42  ;;  %v2639_v51 = vmax.f32 %v2237_v39, 0.0 }
 0x2e6   :  { %v2642_v49 = vmax.f32 %v2248_v46, 0.0  ;;  %2932 = vadd.xlane.f32.xlu1 %v2771_v30  ;;  %v2776_v50 = vmul.f32 %v5713_v0, %v2641_v41 }
 0x2e7   :  { %v2640_v52 = vmax.f32 %v2240_v48, 0.0  ;;  %v2774_v8 = vmul.f32 %v5713_v0, %v2639_v51 }
 0x2e8   :  { %v2777_v54 = vmul.f32 %v5713_v0, %v2642_v49 }
 0x2e9   :  { %v4694_v58 = vpop.f32.mrb[104].mxu0  ;;  %2942 = vadd.xlane.f32.xlu0 %v2776_v50  ;;  %v2775_v11 = vmul.f32 %v5713_v0, %v2640_v52 }
 0x2ea   :  { %v2261_v3 = vadd.f32 %v4694_v58, %v5706_v24  ;;  %v2252_v4 = vpop.f32.mrb[105].mxu0  ;;  %2944 = vadd.xlane.f32.xlu1 %v2777_v54 }
 0x2eb   :  { %v2253_v6 = vadd.f32 %v5706_v24, %v2252_v4  ;;  %v4695_v22 = vpop.f32.mrb[106].mxu0 }
 0x2ec   :  { %v2645_v9 = vmax.f32 %v2261_v3, 0.0  ;;  %v2264_v1 = vadd.f32 %v4695_v22, %v5706_v24  ;;  %v2255_v10 = vpop.f32.mrb[107].mxu0 }
 0x2ed   :  { %v2256_v13 = vadd.f32 %v5706_v24, %v2255_v10  ;;  %2938 = vadd.xlane.f32.xlu0 %v2774_v8  ;;  %v2643_v16 = vmax.f32 %v2253_v6, 0.0 }
 0x2ee   :  { %v2646_v14 = vmax.f32 %v2264_v1, 0.0  ;;  %2940 = vadd.xlane.f32.xlu1 %v2775_v11  ;;  %v2780_v15 = vmul.f32 %v5713_v0, %v2645_v9 }
 0x2ef   :  { %v2644_v17 = vmax.f32 %v2256_v13, 0.0  ;;  %v2778_v19 = vmul.f32 %v5713_v0, %v2643_v16 }
 0x2f0   :  { %v2781_v61 = vmul.f32 %v5713_v0, %v2646_v14 }
 0x2f1   :  { %v4698_v29 = vpop.f32.mrb[108].mxu0  ;;  %2950 = vadd.xlane.f32.xlu0 %v2780_v15  ;;  %v2779_v56 = vmul.f32 %v5713_v0, %v2644_v17 }
 0x2f2   :  { %v2277_v60 = vadd.f32 %v4698_v29, %v5706_v24  ;;  %v2268_v55 = vpop.f32.mrb[109].mxu0  ;;  %2952 = vadd.xlane.f32.xlu1 %v2781_v61 }
 0x2f3   :  { %v2269_v57 = vadd.f32 %v5706_v24, %v2268_v55  ;;  %v4699_v12 = vpop.f32.mrb[110].mxu0 }
 0x2f4   :  { %v2649_v23 = vmax.f32 %v2277_v60, 0.0  ;;  %v2280_v25 = vadd.f32 %v4699_v12, %v5706_v24  ;;  %v2271_v53 = vpop.f32.mrb[111].mxu0 }
 0x2f5   :  { %v2272_v28 = vadd.f32 %v5706_v24, %v2271_v53  ;;  %2946 = vadd.xlane.f32.xlu0 %v2778_v19  ;;  %v2647_v33 = vmax.f32 %v2269_v57, 0.0 }
 0x2f6   :  { %v2650_v59 = vmax.f32 %v2280_v25, 0.0  ;;  %2948 = vadd.xlane.f32.xlu1 %v2779_v56  ;;  %v2784_v62 = vmul.f32 %v5713_v0, %v2649_v23 }
 0x2f7   :  { %v2648_v35 = vmax.f32 %v2272_v28, 0.0  ;;  %v2782_v18 = vmul.f32 %v5713_v0, %v2647_v33 }
 0x2f8   :  { %v2785_v5 = vmul.f32 %v5713_v0, %v2650_v59 }
 0x2f9   :  { %v4702_v7 = vpop.f32.mrb[112].mxu0  ;;  %2958 = vadd.xlane.f32.xlu0 %v2784_v62  ;;  %v2783_v44 = vmul.f32 %v5713_v0, %v2648_v35 }
 0x2fa   :  { %v2293_v27 = vadd.f32 %v4702_v7, %v5706_v24  ;;  %v2284_v63 = vpop.f32.mrb[113].mxu0  ;;  %2960 = vadd.xlane.f32.xlu1 %v2785_v5 }
 0x2fb   :  { %v2285_v43 = vadd.f32 %v5706_v24, %v2284_v63  ;;  %v4703_v45 = vpop.f32.mrb[114].mxu0 }
 0x2fc   :  { %v2653_v20 = vmax.f32 %v2293_v27, 0.0  ;;  %v2296_v2 = vadd.f32 %v4703_v45, %v5706_v24  ;;  %v2287_v21 = vpop.f32.mrb[115].mxu0 }
 0x2fd   :  { %v2288_v26 = vadd.f32 %v5706_v24, %v2287_v21  ;;  %2954 = vadd.xlane.f32.xlu0 %v2782_v18  ;;  %v2651_v34 = vmax.f32 %v2285_v43, 0.0 }
 0x2fe   :  { %v2654_v31 = vmax.f32 %v2296_v2, 0.0  ;;  %2956 = vadd.xlane.f32.xlu1 %v2783_v44  ;;  %v2788_v32 = vmul.f32 %v5713_v0, %v2653_v20 }
 0x2ff   :  { %v2652_v36 = vmax.f32 %v2288_v26, 0.0  ;;  %v2786_v46 = vmul.f32 %v5713_v0, %v2651_v34 }
 0x300   :  { %v2789_v37 = vmul.f32 %v5713_v0, %v2654_v31 }
 0x301   :  { %v4706_v38 = vpop.f32.mrb[116].mxu0  ;;  %2966 = vadd.xlane.f32.xlu0 %v2788_v32  ;;  %v2787_v49 = vmul.f32 %v5713_v0, %v2652_v36 }
 0x302   :  { %v2309_v39 = vadd.f32 %v4706_v38, %v5706_v24  ;;  %v2300_v40 = vpop.f32.mrb[117].mxu0  ;;  %2968 = vadd.xlane.f32.xlu1 %v2789_v37 }
 0x303   :  { %v2301_v42 = vadd.f32 %v5706_v24, %v2300_v40  ;;  %v4707_v41 = vpop.f32.mrb[118].mxu0 }
 0x304   :  { %v2657_v47 = vmax.f32 %v2309_v39, 0.0  ;;  %v2312_v30 = vadd.f32 %v4707_v41, %v5706_v24  ;;  %v2303_v48 = vpop.f32.mrb[119].mxu0 }
 0x305   :  { %v2304_v50 = vadd.f32 %v5706_v24, %v2303_v48  ;;  %2962 = vadd.xlane.f32.xlu0 %v2786_v46  ;;  %v2655_v54 = vmax.f32 %v2301_v42, 0.0  ;;  %v3380_v46 = vlaneseq }
 0x306   :  { %v2658_v51 = vmax.f32 %v2312_v30, 0.0  ;;  %2964 = vadd.xlane.f32.xlu1 %v2787_v49  ;;  %v2792_v52 = vmul.f32 %v5713_v0, %v2657_v47 }
 0x307   :  { %v2656_v58 = vmax.f32 %v2304_v50, 0.0  ;;  %v2790_v1 = vmul.f32 %v5713_v0, %v2655_v54 }
 0x308   :  { %v2793_v3 = vmul.f32 %v5713_v0, %v2658_v51 }
 0x309   :  { %v4710_v4 = vpop.f32.mrb[120].mxu0  ;;  %2974 = vadd.xlane.f32.xlu0 %v2792_v52  ;;  %v2791_v14 = vmul.f32 %v5713_v0, %v2656_v58 }
 0x30a   :  { %v2325_v6 = vadd.f32 %v4710_v4, %v5706_v24  ;;  %v2316_v22 = vpop.f32.mrb[121].mxu0  ;;  %2976 = vadd.xlane.f32.xlu1 %v2793_v3  ;;  %v5875_v4 = vand.u32 127, %v3380_v46 }
 0x30b   :  { %v2317_v8 = vadd.f32 %v5706_v24, %v2316_v22  ;;  %v4711_v9 = vpop.f32.mrb[122].mxu0 }
 0x30c   :  { %v2661_v10 = vmax.f32 %v2325_v6, 0.0  ;;  %v2328_v11 = vadd.f32 %v4711_v9, %v5706_v24  ;;  %v2319_v13 = vpop.f32.mrb[123].mxu0 }
 0x30d   :  { %v2320_v15 = vadd.f32 %v5706_v24, %v2319_v13  ;;  %2970 = vadd.xlane.f32.xlu0 %v2790_v1  ;;  %v2659_v61 = vmax.f32 %v2317_v8, 0.0  ;;  %v3393_v13 = vadd.s32 4294967280, %v5875_v4 }
 0x30e   :  { %v2662_v16 = vmax.f32 %v2328_v11, 0.0  ;;  %2972 = vadd.xlane.f32.xlu1 %v2791_v14  ;;  %v2796_v17 = vmul.f32 %v5713_v0, %v2661_v10  ;;  %v5879_v11 = vshrl.u32 %v3380_v46, 7 }
 0x30f   :  { %v2660_v29 = vmax.f32 %v2320_v15, 0.0  ;;  %v2794_v25 = vmul.f32 %v5713_v0, %v2659_v61  ;;  %v3386_v61 = vadd.s32 4294967288, %v5875_v4 }
 0x310   :  { %v2797_v60 = vmul.f32 %v5713_v0, %v2662_v16 }
 0x311   :  { %v4714_v55 = vpop.f32.mrb[124].mxu0  ;;  %2982 = vadd.xlane.f32.xlu0 %v2796_v17  ;;  %v2795_v59 = vmul.f32 %v5713_v0, %v2660_v29  ;;  %v3400_v17 = vadd.s32 4294967272, %v5875_v4 }
 0x312   :  { %v2341_v57 = vadd.f32 %v4714_v55, %v5706_v24  ;;  %v2332_v12 = vpop.f32.mrb[125].mxu0  ;;  %2984 = vadd.xlane.f32.xlu1 %v2797_v60 }
 0x313   :  { %v2333_v19 = vadd.f32 %v5706_v24, %v2332_v12  ;;  %v4715_v23 = vpop.f32.mrb[126].mxu0 }
 0x314   :  { %v2665_v53 = vmax.f32 %v2341_v57, 0.0  ;;  %v2344_v56 = vadd.f32 %v4715_v23, %v5706_v24  ;;  %v2335_v28 = vpop.f32.mrb[127].mxu0 }
 0x315   :  { %v2336_v62 = vadd.f32 %v5706_v24, %v2335_v28  ;;  %2978 = vadd.xlane.f32.xlu0 %v2794_v25  ;;  %v2663_v5 = vmax.f32 %v2333_v19, 0.0  ;;  %v5892_v19 = vstv %s6485_s8  ;;  %v3421_v25 = vadd.s32 4294967248, %v5875_v4 }
 0x316   :  { %v2666_v33 = vmax.f32 %v2344_v56, 0.0  ;;  %2980 = vadd.xlane.f32.xlu1 %v2795_v59  ;;  %v2800_v35 = vmul.f32 %v5713_v0, %v2665_v53  ;;  %v3428_v53 = vadd.s32 4294967240, %v5875_v4  ;;  %v5898_v28 = vsub.s32 %v5875_v4, %v5879_v11 }
 0x317   :  { %v2664_v7 = vmax.f32 %v2336_v62, 0.0  ;;  %v2798_v2 = vmul.f32 %v5713_v0, %v2663_v5  ;;  %v5903_v5 = vsub.s32 %v3393_v13, %v5879_v11 }
 0x318   :  { %v2801_v27 = vmul.f32 %v5713_v0, %v2666_v33  ;;  %v3407_v33 = vadd.s32 4294967264, %v5875_v4 }
 0x319   :  { %v4718_v63 = vpop.f32.mrb[128].mxu0  ;;  %2990 = vadd.xlane.f32.xlu0 %v2800_v35  ;;  %v2799_v31 = vmul.f32 %v5713_v0, %v2664_v7  ;;  %v5906_v7 = vsub.s32 %v3400_v17, %v5879_v11 }
 0x31a   :  { %v2357_v43 = vadd.f32 %v4718_v63, %v5706_v24  ;;  %v2348_v45 = vpop.f32.mrb[129].mxu0  ;;  %2992 = vadd.xlane.f32.xlu1 %v2801_v27  ;;  %v5909_v27 = vsub.s32 %v3386_v61, %v5879_v11  ;;  %v3435_v61 = vadd.s32 4294967232, %v5875_v4 }
 0x31b   :  { %v2349_v18 = vadd.f32 %v5706_v24, %v2348_v45  ;;  %v4719_v20 = vpop.f32.mrb[130].mxu0 }
 0x31c   :  { %v2669_v21 = vmax.f32 %v2357_v43, 0.0  ;;  %v2360_v44 = vadd.f32 %v4719_v20, %v5706_v24  ;;  %v2351_v26 = vpop.f32.mrb[131].mxu0 }
 0x31d   :  { %v2352_v32 = vadd.f32 %v5706_v24, %v2351_v26  ;;  %2986 = vadd.xlane.f32.xlu0 %v2798_v2  ;;  %v2667_v37 = vmax.f32 %v2349_v18, 0.0  ;;  %v5914_v2 = vsub.s32 %v3421_v25, %v5879_v11 }
 0x31e   :  { %v2670_v34 = vmax.f32 %v2360_v44, 0.0  ;;  %2988 = vadd.xlane.f32.xlu1 %v2799_v31  ;;  %v2804_v36 = vmul.f32 %v5713_v0, %v2669_v21  ;;  %v5917_v21 = vsub.s32 %v3428_v53, %v5879_v11 }
 0x31f   :  { %v2668_v38 = vmax.f32 %v2352_v32, 0.0  ;;  %v2802_v48 = vmul.f32 %v5713_v0, %v2667_v37 }
 0x320   :  { %v2805_v39 = vmul.f32 %v5713_v0, %v2670_v34  ;;  %v5922_v34 = vsub.s32 %v3407_v33, %v5879_v11  ;;  %v5967_v33 = vld [vmem:[%s6484_s7] ss:$0 sm:$0xff] }
 0x321   :  { %v4722_v40 = vpop.f32.mrb[132].mxu0  ;;  %2998 = vadd.xlane.f32.xlu0 %v2804_v36  ;;  %v2803_v52 = vmul.f32 %v5713_v0, %v2668_v38  ;;  %v3414_v36 = vadd.s32 4294967256, %v5875_v4 }
 0x322   :  { %v2373_v42 = vadd.f32 %v4722_v40, %v5706_v24  ;;  %v2364_v41 = vpop.f32.mrb[133].mxu0  ;;  %3000 = vadd.xlane.f32.xlu1 %v2805_v39 }
 0x323   :  { %v2365_v47 = vadd.f32 %v5706_v24, %v2364_v41  ;;  %v4723_v30 = vpop.f32.mrb[134].mxu0 }
 0x324   :  { %v2673_v49 = vmax.f32 %v2373_v42, 0.0  ;;  %v2376_v50 = vadd.f32 %v4723_v30, %v5706_v24  ;;  %v2367_v51 = vpop.f32.mrb[135].mxu0 }
 0x325   :  { %v2368_v54 = vadd.f32 %v5706_v24, %v2367_v51  ;;  %2994 = vadd.xlane.f32.xlu0 %v2802_v48  ;;  %v2671_v6 = vmax.f32 %v2365_v47, 0.0  ;;  %v3449_v51 = vadd.s32 4294967216, %v5875_v4 }
 0x326   :  { %v2674_v58 = vmax.f32 %v2376_v50, 0.0  ;;  %2996 = vadd.xlane.f32.xlu1 %v2803_v52  ;;  %v2808_v3 = vmul.f32 %v5713_v0, %v2673_v49 }
 0x327   :  { %v2672_v22 = vmax.f32 %v2368_v54, 0.0  ;;  %v2806_v16 = vmul.f32 %v5713_v0, %v2671_v6  ;;  %v3456_v6 = vadd.s32 4294967208, %v5875_v4  ;;  %v5947_v17 = vsub.s32 %v3449_v51, %v5879_v11 }
 0x328   :  { %v2809_v8 = vmul.f32 %v5713_v0, %v2674_v58 }
 0x329   :  { %v4726_v9 = vpop.f32.mrb[136].mxu0  ;;  %3006 = vadd.xlane.f32.xlu0 %v2808_v3  ;;  %v2807_v57 = vmul.f32 %v5713_v0, %v2672_v22 }
 0x32a   :  { %v2389_v1 = vadd.f32 %v4726_v9, %v5706_v24  ;;  %v2380_v10 = vpop.f32.mrb[137].mxu0  ;;  %3008 = vadd.xlane.f32.xlu1 %v2809_v8 }
 0x32b   :  { %v2381_v14 = vadd.f32 %v5706_v24, %v2380_v10  ;;  %v4727_v15 = vpop.f32.mrb[138].mxu0 }
 0x32c   :  { %v2677_v29 = vmax.f32 %v2389_v1, 0.0  ;;  %v2392_v60 = vadd.f32 %v4727_v15, %v5706_v24  ;;  %v2383_v55 = vpop.f32.mrb[139].mxu0 }
 0x32d   :  { %v2384_v12 = vadd.f32 %v5706_v24, %v2383_v55  ;;  %v2871_v23 = vpop.xlane.xlu1 %2870  ;;  %3002 = vadd.xlane.f32.xlu0 %v2806_v16  ;;  %v2675_v35 = vmax.f32 %v2381_v14, 0.0 }
 0x32e   :  { %v2678_v56 = vmax.f32 %v2392_v60, 0.0  ;;  %3004 = vadd.xlane.f32.xlu1 %v2807_v57  ;;  %v2867_v59 = vpop.xlane.xlu0 %2866  ;;  %v2812_v62 = vmul.f32 %v5713_v0, %v2677_v29  ;;  %v3126_v44 = vadd.f32 %v5892_v19, %v2871_v23  ;;  %v5954_v60 = vld [vmem:[%s6483_s6] ss:$0 sm:$0xff]  ;;  %v3442_v23 = vadd.s32 4294967224, %v5875_v4 }
 0x32f   :  { %v2676_v63 = vmax.f32 %v2384_v12, 0.0  ;;  %v3124_v45 = vadd.f32 %v5892_v19, %v2867_v59  ;;  %v2810_v42 = vmul.f32 %v5713_v0, %v2675_v35  ;;  %v5958_v12 = vsub.s32 %v3456_v6, %v5879_v11 }
 0x330   :  { %v2813_v43 = vmul.f32 %v5713_v0, %v2678_v56  ;;  %v3397_v52 = vrot.slane %v3126_v44, %v5903_v5 }
 0x331   :  { %v2873_v18 = vpop.xlane.xlu1 %2872  ;;  %v4730_v20 = vpop.f32.mrb[140].mxu0  ;;  %3014 = vadd.xlane.f32.xlu0 %v2812_v62  ;;  %v2811_v30 = vmul.f32 %v5713_v0, %v2676_v63  ;;  %v3385_v48 = vrot.slane %v3124_v45, %v5898_v28 }
 0x332   :  { %v2405_v26 = vadd.f32 %v4730_v20, %v5706_v24  ;;  %v2396_v31 = vpop.f32.mrb[141].mxu0  ;;  %3016 = vadd.xlane.f32.xlu1 %v2813_v43  ;;  %v2869_v32 = vpop.xlane.xlu0 %2868  ;;  %v3127_v37 = vadd.f32 %v5892_v19, %v2873_v18 }
 0x333   :  { %v2397_v38 = vadd.f32 %v5706_v24, %v2396_v31  ;;  %v3125_v39 = vadd.f32 %v5892_v19, %v2869_v32  ;;  %v4731_v40 = vpop.f32.mrb[142].mxu0  ;;  %v5976_v31 = vsub.s32 %v3435_v61, %v5879_v11 }
 0x334   :  { %v2681_v41 = vmax.f32 %v2405_v26, 0.0  ;;  %v2408_v46 = vadd.f32 %v4731_v40, %v5706_v24  ;;  %v2399_v47 = vpop.f32.mrb[143].mxu0  ;;  %v3404_v22 = vrot.slane %v3127_v37, %v5906_v7 }
 0x335   :  { %v3390_v49 = vrot.slane %v3125_v39, %v5909_v27  ;;  %v2400_v50 = vadd.f32 %v5706_v24, %v2399_v47  ;;  %3010 = vadd.xlane.f32.xlu0 %v2810_v42  ;;  %v2679_v8 = vmax.f32 %v2397_v38, 0.0  ;;  %v5941_v24 = vsub.s32 %v3414_v36, %v5879_v11 }
 0x336   :  { %v2682_v54 = vmax.f32 %v2408_v46, 0.0  ;;  %3012 = vadd.xlane.f32.xlu1 %v2811_v30  ;;  %v2879_v58 = vpop.xlane.xlu0 %2878  ;;  %v2816_v3 = vmul.f32 %v5713_v0, %v2681_v41  ;;  %v5981_v39 = vsub.s32 %v3442_v23, %v5879_v11 }
 0x337   :  { %v3392_v9 = vsel %vm3391_vm1, %v3390_v49, %v3385_v48  ;;  %v2881_v1 = vpop.xlane.xlu1 %2880  ;;  %v2680_v13 = vmax.f32 %v2400_v50, 0.0  ;;  %v3130_v29 = vadd.f32 %v5892_v19, %v2879_v58  ;;  %v2814_v35 = vmul.f32 %v5967_v33, %v2679_v8 }
 0x338   :  { %v3399_v10 = vsel %vm3398_vm2, %v3397_v52, %v3392_v9  ;;  %v2817_v14 = vmul.f32 %v5713_v0, %v2682_v54  ;;  %v3131_v25 = vadd.f32 %v5892_v19, %v2881_v1  ;;  %v3477_v52 = vadd.s32 4294967184, %v5875_v4 }
 0x339   :  { %v4734_v15 = vpop.f32.mrb[144].mxu0  ;;  %3022 = vadd.xlane.f32.xlu0 %v2816_v3  ;;  %v3406_v16 = vsel %vm3405_vm3, %v3404_v22, %v3399_v10  ;;  %v2815_v20 = vmul.f32 %v5967_v33, %v2680_v13  ;;  %v3425_v40 = vrot.slane %v3130_v29, %v5914_v2  ;;  %v3484_v54 = vadd.s32 4294967176, %v5875_v4 }
 0x33a   :  { %v2421_v0 = vadd.f32 %v5954_v60, %v4734_v15  ;;  %v2412_v55 = vpop.f32.mrb[145].mxu0  ;;  %3024 = vadd.xlane.f32.xlu1 %v2817_v14  ;;  %v2875_v57 = vpop.xlane.xlu0 %2874  ;;  %v3432_v47 = vrot.slane %v3131_v25, %v5917_v21  ;;  %v3463_v25 = vadd.s32 4294967200, %v5875_v4 }
 0x33b   :  { %v2413_v53 = vadd.f32 %v5954_v60, %v2412_v55  ;;  %v3128_v56 = vadd.f32 %v5892_v19, %v2875_v57  ;;  %v4735_v59 = vpop.f32.mrb[146].mxu0  ;;  %v2877_v62 = vpop.xlane.xlu1 %2876 }
 0x33c   :  { %v2685_v63 = vmax.f32 %v2421_v0, 0.0  ;;  %v2424_v43 = vadd.f32 %v5954_v60, %v4735_v59  ;;  %v3129_v45 = vadd.f32 %v5892_v19, %v2877_v62  ;;  %v2415_v18 = vpop.f32.mrb[147].mxu0  ;;  %v6007_v62 = vsub.s32 %v3477_v52, %v5879_v11 }
 0x33d   :  { %v3411_v44 = vrot.slane %v3128_v56, %v5922_v34  ;;  %v2416_v26 = vadd.f32 %v5954_v60, %v2415_v18  ;;  %3018 = vadd.xlane.f32.xlu0 %v2814_v35  ;;  %v2683_v42 = vmax.f32 %v2413_v53, 0.0  ;;  %v3470_v53 = vadd.s32 4294967192, %v5875_v4 }
 0x33e   :  { %v2686_v32 = vmax.f32 %v2424_v43, 0.0  ;;  %v3418_v36 = vrot.slane %v3129_v45, %v5941_v24  ;;  %3020 = vadd.xlane.f32.xlu1 %v2815_v20  ;;  %v2887_v37 = vpop.xlane.xlu0 %2886  ;;  %v2820_v38 = vmul.f32 %v5967_v33, %v2685_v63 }
 0x33f   :  { %v3413_v41 = vsel %vm3412_vm4, %v3411_v44, %v3406_v16  ;;  %v2889_v46 = vpop.xlane.xlu1 %2888  ;;  %v2684_v48 = vmax.f32 %v2416_v26, 0.0  ;;  %v3134_v58 = vadd.f32 %v5892_v19, %v2887_v37  ;;  %v2818_v15 = vmul.f32 %v5967_v33, %v2683_v42 }
 0x340   :  { %v3420_v30 = vsel %vm3419_vm5, %v3418_v36, %v3413_v41  ;;  %v2821_v49 = vmul.f32 %v5967_v33, %v2686_v32  ;;  %v3135_v9 = vadd.f32 %v5892_v19, %v2889_v46  ;;  %v6017_v37 = vsub.s32 %v3484_v54, %v5879_v11 }
 0x341   :  { %v3427_v50 = vsel %vm3426_vm6, %v3425_v40, %v3420_v30  ;;  %v4738_v51 = vpop.f32.mrb[148].mxu0  ;;  %3030 = vadd.xlane.f32.xlu0 %v2820_v38  ;;  %v2819_v55 = vmul.f32 %v5967_v33, %v2684_v48  ;;  %v3453_v63 = vrot.slane %v3134_v58, %v5947_v17  ;;  %v6020_v40 = vsub.s32 %v3463_v25, %v5879_v11 }
 0x342   :  { %v2437_v3 = vadd.f32 %v5954_v60, %v4738_v51  ;;  %v2428_v6 = vpop.f32.mrb[149].mxu0  ;;  %3032 = vadd.xlane.f32.xlu1 %v2821_v49  ;;  %v3434_v22 = vsel %vm3433_vm7, %v3432_v47, %v3427_v50  ;;  %v2883_v8 = vpop.xlane.xlu0 %2882  ;;  %v3460_v43 = vrot.slane %v3135_v9, %v5958_v12  ;;  %v6023_v42 = vsub.s32 %v3470_v53, %v5879_v11 }
 0x343   :  { %v2429_v1 = vadd.f32 %v5954_v60, %v2428_v6  ;;  %v3132_v10 = vadd.f32 %v5892_v19, %v2883_v8  ;;  %v4739_v13 = vpop.f32.mrb[150].mxu0  ;;  %v2885_v14 = vpop.xlane.xlu1 %2884 }
 0x344   :  { %v2689_v16 = vmax.f32 %v2437_v3, 0.0  ;;  %v2440_v61 = vadd.f32 %v5954_v60, %v4739_v13  ;;  %v3133_v29 = vadd.f32 %v5892_v19, %v2885_v14  ;;  %v2431_v0 = vpop.f32.mrb[151].mxu0 }
 0x345   :  { %v3439_v57 = vrot.slane %v3132_v10, %v5976_v31  ;;  %v2432_v23 = vadd.f32 %v5954_v60, %v2431_v0  ;;  %3026 = vadd.xlane.f32.xlu0 %v2818_v15  ;;  %v2687_v45 = vmax.f32 %v2429_v1, 0.0 }
 0x346   :  { %v2690_v56 = vmax.f32 %v2440_v61, 0.0  ;;  %v3446_v59 = vrot.slane %v3133_v29, %v5981_v39  ;;  %3028 = vadd.xlane.f32.xlu1 %v2819_v55  ;;  %v2895_v35 = vpop.xlane.xlu0 %2894  ;;  %v2824_v26 = vmul.f32 %v5967_v33, %v2689_v16 }
 0x347   :  { %v3441_v18 = vsel %vm3440_vm8, %v3439_v57, %v3434_v22  ;;  %v2897_v20 = vpop.xlane.xlu1 %2896  ;;  %v2688_v4 = vmax.f32 %v2432_v23, 0.0  ;;  %v3138_v41 = vadd.f32 %v5892_v19, %v2895_v35  ;;  %v2822_v54 = vmul.f32 %v5967_v33, %v2687_v45 }
 0x348   :  { %v3448_v44 = vsel %vm3447_vm9, %v3446_v59, %v3441_v18  ;;  %v2825_v32 = vmul.f32 %v5967_v33, %v2690_v56  ;;  %v3139_v49 = vadd.f32 %v5892_v19, %v2897_v20 }
 0x349   :  { %v3455_v36 = vsel %vm3454_vm10, %v3453_v63, %v3448_v44  ;;  %v4742_v38 = vpop.f32.mrb[152].mxu0  ;;  %v2823_v8 = vmul.f32 %v5967_v33, %v2688_v4  ;;  %v3481_v15 = vrot.slane %v3138_v41, %v6007_v62 }
 0x34a   :  { %v2453_v46 = vadd.f32 %v5954_v60, %v4742_v38  ;;  %v2444_v47 = vpop.f32.mrb[153].mxu0  ;;  %3038 = vadd.xlane.f32.xlu1 %v2824_v26  ;;  %3040 = vadd.xlane.f32.xlu0 %v2825_v32  ;;  %v3462_v30 = vsel %vm3461_vm11, %v3460_v43, %v3455_v36  ;;  %v2891_v48 = vpop.xlane.xlu0 %2890  ;;  %v3488_v16 = vrot.slane %v3139_v49, %v6017_v37 }
 0x34b   :  { %v2445_v50 = vadd.f32 %v5954_v60, %v2444_v47  ;;  %v3136_v51 = vadd.f32 %v5892_v19, %v2891_v48  ;;  %v4743_v52 = vpop.f32.mrb[154].mxu0  ;;  %v2893_v11 = vpop.xlane.xlu1 %2892 }
 0x34c   :  { %v2693_v58 = vmax.f32 %v2453_v46, 0.0  ;;  %v2456_v3 = vadd.f32 %v5954_v60, %v4743_v52  ;;  %v3137_v6 = vadd.f32 %v5892_v19, %v2893_v11  ;;  %v2447_v22 = vpop.f32.mrb[155].mxu0 }
 0x34d   :  { %v3467_v9 = vrot.slane %v3136_v51, %v6020_v40  ;;  %v2448_v1 = vadd.f32 %v5954_v60, %v2447_v22  ;;  %v2691_v61 = vmax.f32 %v2445_v50, 0.0 }
 0x34e   :  { %v2694_v10 = vmax.f32 %v2456_v3, 0.0  ;;  %v3474_v13 = vrot.slane %v3137_v6, %v6023_v42  ;;  %3034 = vadd.xlane.f32.xlu1 %v2822_v54  ;;  %3036 = vadd.xlane.f32.xlu0 %v2823_v8  ;;  %v2903_v14 = vpop.xlane.xlu0 %2902  ;;  %v2828_v23 = vmul.f32 %v5967_v33, %v2693_v58 }
 0x34f   :  { %v3469_v29 = vsel %vm3468_vm12, %v3467_v9, %v3462_v30  ;;  %v2905_v0 = vpop.xlane.xlu1 %2904  ;;  %v2692_v57 = vmax.f32 %v2448_v1, 0.0  ;;  %v3142_v35 = vadd.f32 %v5892_v19, %v2903_v14  ;;  %v2826_v32 = vmul.f32 %v5967_v33, %v2691_v61 }
 0x350   :  { %v3476_v55 = vsel %vm3475_vm13, %v3474_v13, %v3469_v29  ;;  %v2829_v25 = vmul.f32 %v5967_v33, %v2694_v10  ;;  %v3143_v18 = vadd.f32 %v5892_v19, %v2905_v0 }
 0x351   :  { %v3483_v53 = vsel %vm3482_vm14, %v3481_v15, %v3476_v55  ;;  %v4746_v56 = vpop.f32.mrb[156].mxu0  ;;  %v2827_v47 = vmul.f32 %v5967_v33, %v2692_v57  ;;  %v3503_v52 = vrot.slane %v3142_v35, %v5903_v5 }
 0x352   :  { %v6046_v59 = vsel %vm3489_vm15, %v3488_v16, %v3483_v53  ;;  %v2469_v63 = vadd.f32 %v5954_v60, %v4746_v56  ;;  %v2460_v43 = vpop.f32.mrb[157].mxu0  ;;  %3046 = vadd.xlane.f32.xlu1 %v2828_v23  ;;  %3048 = vadd.xlane.f32.xlu0 %v2829_v25  ;;  %v2899_v45 = vpop.xlane.xlu0 %2898  ;;  %v3508_v11 = vrot.slane %v3143_v18, %v5906_v7 }
 0x353   :  { %v2461_v20 = vadd.f32 %v5954_v60, %v2460_v43  ;;  %v3140_v44 = vadd.f32 %v5892_v19, %v2899_v45  ;;  %v4747_v4 = vpop.f32.mrb[158].mxu0  ;;  %v2901_v26 = vpop.xlane.xlu1 %2900 }
 0x354   :  { %v2697_v36 = vmax.f32 %v2469_v63, 0.0  ;;  %v2472_v38 = vadd.f32 %v5954_v60, %v4747_v4  ;;  %v3141_v41 = vadd.f32 %v5892_v19, %v2901_v26  ;;  %v2463_v46 = vpop.f32.mrb[159].mxu0 }
 0x355   :  { %v3494_v30 = vrot.slane %v3140_v44, %v5898_v28  ;;  %v2464_v48 = vadd.f32 %v5954_v60, %v2463_v46  ;;  %v2695_v54 = vmax.f32 %v2461_v20, 0.0 }
 0x356   :  { %v2698_v49 = vmax.f32 %v2472_v38, 0.0  ;;  %v3498_v50 = vrot.slane %v3141_v41, %v5909_v27  ;;  %3042 = vadd.xlane.f32.xlu1 %v2826_v32  ;;  %3044 = vadd.xlane.f32.xlu0 %v2827_v47  ;;  %v2911_v51 = vpop.xlane.xlu0 %2910  ;;  %v2832_v22 = vmul.f32 %v5967_v33, %v2697_v36 }
 0x357   :  { %v2913_v58 = vpop.xlane.xlu1 %2912  ;;  %v2696_v6 = vmax.f32 %v2464_v48, 0.0  ;;  %v3146_v10 = vadd.f32 %v5892_v19, %v2911_v51  ;;  %v2830_v23 = vmul.f32 %v5967_v33, %v2695_v54 }
 0x358   :  { %v3499_v3 = vsel %vm3391_vm1, %v3498_v50, %v3494_v30  ;;  %v2833_v8 = vmul.f32 %v5967_v33, %v2698_v49  ;;  %v3147_v61 = vadd.f32 %v5892_v19, %v2913_v58 }
 0x359   :  { %v3504_v9 = vsel %vm3398_vm2, %v3503_v52, %v3499_v3  ;;  %v4750_v1 = vpop.f32.mrb[160].mxu0  ;;  %v2831_v63 = vmul.f32 %v5967_v33, %v2696_v6  ;;  %v3523_v4 = vrot.slane %v3146_v10, %v5914_v2 }
 0x35a   :  { %v2485_v13 = vadd.f32 %v5954_v60, %v4750_v1  ;;  %v2476_v14 = vpop.f32.mrb[161].mxu0  ;;  %3054 = vadd.xlane.f32.xlu1 %v2832_v22  ;;  %3056 = vadd.xlane.f32.xlu0 %v2833_v8  ;;  %v3509_v15 = vsel %vm3405_vm3, %v3508_v11, %v3504_v9  ;;  %v2907_v16 = vpop.xlane.xlu0 %2906  ;;  %v3528_v41 = vrot.slane %v3147_v61, %v5917_v21 }
 0x35b   :  { %v2477_v29 = vadd.f32 %v5954_v60, %v2476_v14  ;;  %v3144_v0 = vadd.f32 %v5892_v19, %v2907_v16  ;;  %v4751_v55 = vpop.f32.mrb[162].mxu0  ;;  %v2909_v57 = vpop.xlane.xlu1 %2908 }
 0x35c   :  { %v2701_v25 = vmax.f32 %v2485_v13, 0.0  ;;  %v2488_v53 = vadd.f32 %v5954_v60, %v4751_v55  ;;  %v3145_v56 = vadd.f32 %v5892_v19, %v2909_v57  ;;  %v2479_v35 = vpop.f32.mrb[163].mxu0 }
 0x35d   :  { %v2699_v43 = vmax.f32 %v2477_v29, 0.0  ;;  %v3513_v45 = vrot.slane %v3144_v0, %v5922_v34  ;;  %v2480_v20 = vadd.f32 %v5954_v60, %v2479_v35 }
 0x35e   :  { %v3518_v18 = vrot.slane %v3145_v56, %v5941_v24  ;;  %3050 = vadd.xlane.f32.xlu1 %v2830_v23  ;;  %3052 = vadd.xlane.f32.xlu0 %v2831_v63  ;;  %v2919_v44 = vpop.xlane.xlu0 %2918  ;;  %v2702_v32 = vmax.f32 %v2488_v53, 0.0  ;;  %v2836_v47 = vmul.f32 %v5967_v33, %v2701_v25 }
 0x35f   :  { %v3514_v26 = vsel %vm3412_vm4, %v3513_v45, %v3509_v15  ;;  %v2921_v36 = vpop.xlane.xlu1 %2920  ;;  %v2834_v38 = vmul.f32 %v5967_v33, %v2699_v43  ;;  %v2700_v49 = vmax.f32 %v2480_v20, 0.0  ;;  %v3150_v58 = vadd.f32 %v5892_v19, %v2919_v44 }
 0x360   :  { %v3519_v46 = vsel %vm3419_vm5, %v3518_v18, %v3514_v26  ;;  %v2837_v54 = vmul.f32 %v5967_v33, %v2702_v32  ;;  %v3151_v9 = vadd.f32 %v5892_v19, %v2921_v36 }
 0x361   :  { %v3524_v30 = vsel %vm3426_vm6, %v3523_v4, %v3519_v46  ;;  %v4754_v48 = vpop.f32.mrb[164].mxu0  ;;  %v3543_v57 = vrot.slane %v3150_v58, %v5947_v17  ;;  %v2835_v56 = vmul.f32 %v5967_v33, %v2700_v49 }
 0x362   :  { %v2501_v50 = vadd.f32 %v5954_v60, %v4754_v48  ;;  %v2492_v51 = vpop.f32.mrb[165].mxu0  ;;  %3058 = vadd.xlane.f32.xlu1 %v2834_v38  ;;  %3062 = vadd.xlane.f32.xlu0 %v2836_v47  ;;  %v3529_v52 = vsel %vm3433_vm7, %v3528_v41, %v3524_v30  ;;  %v2915_v11 = vpop.xlane.xlu0 %2914  ;;  %v3548_v35 = vrot.slane %v3151_v9, %v5958_v12 }
 0x363   :  { %v2493_v3 = vadd.f32 %v5954_v60, %v2492_v51  ;;  %v3148_v6 = vadd.f32 %v5892_v19, %v2915_v11  ;;  %v4755_v22 = vpop.f32.mrb[166].mxu0  ;;  %v2917_v8 = vpop.xlane.xlu1 %2916 }
 0x364   :  { %v2705_v1 = vmax.f32 %v2501_v50, 0.0  ;;  %v2504_v10 = vadd.f32 %v5954_v60, %v4755_v22  ;;  %v3149_v13 = vadd.f32 %v5892_v19, %v2917_v8  ;;  %v2495_v14 = vpop.f32.mrb[167].mxu0 }
 0x365   :  { %v3533_v15 = vrot.slane %v3148_v6, %v5976_v31  ;;  %v2703_v61 = vmax.f32 %v2493_v3, 0.0  ;;  %v2496_v0 = vadd.f32 %v5954_v60, %v2495_v14 }
 0x366   :  { %v2840_v16 = vmul.f32 %v5967_v33, %v2705_v1  ;;  %v3538_v29 = vrot.slane %v3149_v13, %v5981_v39  ;;  %3064 = vadd.xlane.f32.xlu0 %v2837_v54  ;;  %v2927_v55 = vpop.xlane.xlu0 %2926  ;;  %v2706_v25 = vmax.f32 %v2504_v10, 0.0 }
 0x367   :  { %v3534_v23 = vsel %vm3440_vm8, %v3533_v15, %v3529_v52  ;;  %v2929_v53 = vpop.xlane.xlu1 %2928  ;;  %v2838_v18 = vmul.f32 %v5967_v33, %v2703_v61  ;;  %v2704_v20 = vmax.f32 %v2496_v0, 0.0  ;;  %v3154_v38 = vadd.f32 %v5892_v19, %v2927_v55 }
 0x368   :  { %v3539_v63 = vsel %vm3447_vm9, %v3538_v29, %v3534_v23  ;;  %3070 = vadd.xlane.f32.xlu1 %v2840_v16  ;;  %v2841_v36 = vmul.f32 %v5967_v33, %v2706_v25  ;;  %v3155_v48 = vadd.f32 %v5892_v19, %v2929_v53 }
 0x369   :  { %v3544_v43 = vsel %vm3454_vm10, %v3543_v57, %v3539_v63  ;;  %v4758_v45 = vpop.f32.mrb[168].mxu0  ;;  %v3563_v8 = vrot.slane %v3154_v38, %v6007_v62  ;;  %v2839_v10 = vmul.f32 %v5967_v33, %v2704_v20 }
 0x36a   :  { %v2517_v44 = vadd.f32 %v5954_v60, %v4758_v45  ;;  %v2508_v4 = vpop.f32.mrb[169].mxu0  ;;  %3060 = vadd.xlane.f32.xlu0 %v2835_v56  ;;  %v3549_v26 = vsel %vm3461_vm11, %v3548_v35, %v3544_v43  ;;  %v2923_v32 = vpop.xlane.xlu0 %2922  ;;  %v3568_v13 = vrot.slane %v3155_v48, %v6017_v37 }
 0x36b   :  { %v2509_v41 = vadd.f32 %v5954_v60, %v2508_v4  ;;  %v3152_v46 = vadd.f32 %v5892_v19, %v2923_v32  ;;  %v4759_v47 = vpop.f32.mrb[170].mxu0  ;;  %v2925_v30 = vpop.xlane.xlu1 %2924 }
 0x36c   :  { %v2709_v49 = vmax.f32 %v2517_v44, 0.0  ;;  %v2520_v50 = vadd.f32 %v5954_v60, %v4759_v47  ;;  %v3153_v51 = vadd.f32 %v5892_v19, %v2925_v30  ;;  %v2511_v52 = vpop.f32.mrb[171].mxu0  ;;  %3066 = vadd.xlane.f32.xlu1 %v2838_v18 }
 0x36d   :  { %v3553_v11 = vrot.slane %v3152_v46, %v6020_v40  ;;  %v2707_v58 = vmax.f32 %v2509_v41, 0.0  ;;  %v2512_v6 = vadd.f32 %v5954_v60, %v2511_v52 }
 0x36e   :  { %v2844_v54 = vmul.f32 %v5967_v33, %v2709_v49  ;;  %v3558_v3 = vrot.slane %v3153_v51, %v6023_v42  ;;  %3072 = vadd.xlane.f32.xlu0 %v2841_v36  ;;  %v2935_v22 = vpop.xlane.xlu0 %2934  ;;  %v2710_v14 = vmax.f32 %v2520_v50, 0.0 }
 0x36f   :  { %v3554_v9 = vsel %vm3468_vm12, %v3553_v11, %v3549_v26  ;;  %v2937_v1 = vpop.xlane.xlu1 %2936  ;;  %v2842_v29 = vmul.f32 %v5967_v33, %v2707_v58  ;;  %v2708_v55 = vmax.f32 %v2512_v6, 0.0  ;;  %v3158_v56 = vadd.f32 %v5892_v19, %v2935_v22 }
 0x370   :  { %v3559_v15 = vsel %vm3475_vm13, %v3558_v3, %v3554_v9  ;;  %3078 = vadd.xlane.f32.xlu1 %v2844_v54  ;;  %v2845_v18 = vmul.f32 %v5967_v33, %v2710_v14  ;;  %v3159_v20 = vadd.f32 %v5892_v19, %v2937_v1 }
 0x371   :  { %v3564_v16 = vsel %vm3482_vm14, %v3563_v8, %v3559_v15  ;;  %v4762_v61 = vpop.f32.mrb[172].mxu0  ;;  %v3582_v30 = vrot.slane %v3158_v56, %v5903_v5  ;;  %v2843_v49 = vmul.f32 %v5967_v33, %v2708_v55 }
 0x372   :  { %v3569_v0 = vsel %vm3489_vm15, %v3568_v13, %v3564_v16  ;;  %v2533_v57 = vadd.f32 %v5954_v60, %v4762_v61  ;;  %v2524_v23 = vpop.f32.mrb[173].mxu0  ;;  %3068 = vadd.xlane.f32.xlu0 %v2839_v10  ;;  %v2931_v25 = vpop.xlane.xlu0 %2930  ;;  %v3587_v50 = vrot.slane %v3159_v20, %v5906_v7 }
 0x373   :  { %v6130_v53 = vsel %vm4044_vm0, %v3569_v0, %v6046_v59  ;;  %v2525_v35 = vadd.f32 %v5954_v60, %v2524_v23  ;;  %v3156_v63 = vadd.f32 %v5892_v19, %v2931_v25  ;;  %v4763_v43 = vpop.f32.mrb[174].mxu0  ;;  %v2933_v45 = vpop.xlane.xlu1 %2932  ;;  %vm4046_vm0 = vcmask 1042434  }
 0x374   :  { %v2713_v44 = vmax.f32 %v2533_v57, 0.0  ;;  %v3157_v4 = vadd.f32 %v5892_v19, %v2933_v45  ;;  %v2527_v26 = vpop.f32.mrb[175].mxu0  ;;  %3074 = vadd.xlane.f32.xlu1 %v2842_v29  ;;  %v2536_v32 = vadd.f32 %v5954_v60, %v4763_v43 }
 0x375   :  { %v3573_v59 = vrot.slane %v3156_v63, %v5898_v28  ;;  %v2528_v36 = vadd.f32 %v5954_v60, %v2527_v26  ;;  %v2711_v41 = vmax.f32 %v2525_v35, 0.0 }
 0x376   :  { %v2848_v38 = vmul.f32 %v5967_v33, %v2713_v44  ;;  %v3577_v46 = vrot.slane %v3157_v4, %v5909_v27  ;;  %3080 = vadd.xlane.f32.xlu0 %v2845_v18  ;;  %v2943_v47 = vpop.xlane.xlu0 %2942  ;;  %v2714_v11 = vmax.f32 %v2536_v32, 0.0 }
 0x377   :  { %v2945_v48 = vpop.xlane.xlu1 %2944  ;;  %v2712_v52 = vmax.f32 %v2528_v36, 0.0  ;;  %v2846_v3 = vmul.f32 %v5967_v33, %v2711_v41  ;;  %v3162_v1 = vadd.f32 %v5892_v19, %v2943_v47 }
 0x378   :  { %v3578_v51 = vsel %vm3391_vm1, %v3577_v46, %v3573_v59  ;;  %3086 = vadd.xlane.f32.xlu1 %v2848_v38  ;;  %v3163_v16 = vadd.f32 %v5892_v19, %v2945_v48  ;;  %v2849_v55 = vmul.f32 %v5967_v33, %v2714_v11 }
 0x379   :  { %v3583_v54 = vsel %vm3398_vm2, %v3582_v30, %v3578_v51  ;;  %v4766_v58 = vpop.f32.mrb[176].mxu0  ;;  %v2847_v15 = vmul.f32 %v5967_v33, %v2712_v52  ;;  %v3602_v45 = vrot.slane %v3162_v1, %v5914_v2 }
 0x37a   :  { %v2549_v6 = vadd.f32 %v5954_v60, %v4766_v58  ;;  %v2540_v22 = vpop.f32.mrb[177].mxu0  ;;  %3076 = vadd.xlane.f32.xlu0 %v2843_v49  ;;  %v3588_v8 = vsel %vm3405_vm3, %v3587_v50, %v3583_v54  ;;  %v2939_v9 = vpop.xlane.xlu0 %2938  ;;  %v3607_v44 = vrot.slane %v3163_v16, %v5917_v21 }
 0x37b   :  { %v3160_v10 = vadd.f32 %v5892_v19, %v2939_v9  ;;  %v4767_v13 = vpop.f32.mrb[178].mxu0  ;;  %v2941_v14 = vpop.xlane.xlu1 %2940  ;;  %v2541_v56 = vadd.f32 %v5954_v60, %v2540_v22 }
 0x37c   :  { %v2552_v61 = vadd.f32 %v5954_v60, %v4767_v13  ;;  %v3161_v29 = vadd.f32 %v5892_v19, %v2941_v14  ;;  %v2543_v0 = vpop.f32.mrb[179].mxu0  ;;  %3082 = vadd.xlane.f32.xlu1 %v2846_v3  ;;  %v2717_v25 = vmax.f32 %v2549_v6, 0.0 }
 0x37d   :  { %v3592_v57 = vrot.slane %v3160_v10, %v5922_v34  ;;  %v2544_v23 = vadd.f32 %v5954_v60, %v2543_v0  ;;  %v2715_v41 = vmax.f32 %v2541_v56, 0.0 }
 0x37e   :  { %v2718_v35 = vmax.f32 %v2552_v61, 0.0  ;;  %v3597_v63 = vrot.slane %v3161_v29, %v5941_v24  ;;  %3084 = vadd.xlane.f32.xlu0 %v2847_v15  ;;  %v2951_v43 = vpop.xlane.xlu0 %2950  ;;  %v2852_v38 = vmul.f32 %v5967_v33, %v2717_v25 }
 0x37f   :  { %v3593_v18 = vsel %vm3412_vm4, %v3592_v57, %v3588_v8  ;;  %v2953_v20 = vpop.xlane.xlu1 %2952  ;;  %v2716_v59 = vmax.f32 %v2544_v23, 0.0  ;;  %v3166_v49 = vadd.f32 %v5892_v19, %v2951_v43  ;;  %v2850_v1 = vmul.f32 %v5967_v33, %v2715_v41 }
 0x380   :  { %v2853_v4 = vmul.f32 %v5967_v33, %v2718_v35  ;;  %v3598_v26 = vsel %vm3419_vm5, %v3597_v63, %v3593_v18  ;;  %3088 = vadd.xlane.f32.xlu1 %v2849_v55  ;;  %v3167_v54 = vadd.f32 %v5892_v19, %v2953_v20 }
 0x381   :  { %v3603_v32 = vsel %vm3426_vm6, %v3602_v45, %v3598_v26  ;;  %v4770_v36 = vpop.f32.mrb[180].mxu0  ;;  %v2851_v11 = vmul.f32 %v5967_v33, %v2716_v59  ;;  %v3622_v16 = vrot.slane %v3166_v49, %v5947_v17 }
 0x382   :  { %v2565_v46 = vadd.f32 %v5954_v60, %v4770_v36  ;;  %v2556_v47 = vpop.f32.mrb[181].mxu0  ;;  %3096 = vadd.xlane.f32.xlu0 %v2853_v4  ;;  %v3608_v30 = vsel %vm3433_vm7, %v3607_v44, %v3603_v32  ;;  %v2947_v48 = vpop.xlane.xlu0 %2946  ;;  %v3627_v0 = vrot.slane %v3167_v54, %v5958_v12 }
 0x383   :  { %v3164_v50 = vadd.f32 %v5892_v19, %v2947_v48  ;;  %v4771_v51 = vpop.f32.mrb[182].mxu0  ;;  %v2949_v52 = vpop.xlane.xlu1 %2948  ;;  %v2557_v22 = vadd.f32 %v5954_v60, %v2556_v47 }
 0x384   :  { %v2568_v58 = vadd.f32 %v5954_v60, %v4771_v51  ;;  %v3165_v3 = vadd.f32 %v5892_v19, %v2949_v52  ;;  %v2559_v6 = vpop.f32.mrb[183].mxu0  ;;  %3094 = vadd.xlane.f32.xlu1 %v2852_v38  ;;  %v2721_v10 = vmax.f32 %v2565_v46, 0.0 }
 0x385   :  { %v3612_v8 = vrot.slane %v3164_v50, %v5976_v31  ;;  %v2560_v9 = vadd.f32 %v5954_v60, %v2559_v6  ;;  %v2719_v25 = vmax.f32 %v2557_v22, 0.0 }
 0x386   :  { %v2722_v13 = vmax.f32 %v2568_v58, 0.0  ;;  %v3617_v14 = vrot.slane %v3165_v3, %v5981_v39  ;;  %3092 = vadd.xlane.f32.xlu0 %v2851_v11  ;;  %v2959_v15 = vpop.xlane.xlu0 %2958  ;;  %v2856_v63 = vmul.f32 %v5967_v33, %v2721_v10 }
 0x387   :  { %v3613_v61 = vsel %vm3440_vm8, %v3612_v8, %v3608_v30  ;;  %v2961_v29 = vpop.xlane.xlu1 %2960  ;;  %v2720_v23 = vmax.f32 %v2560_v9, 0.0  ;;  %v3170_v44 = vadd.f32 %v5892_v19, %v2959_v15  ;;  %v2854_v47 = vmul.f32 %v5967_v33, %v2719_v25 }
 0x388   :  { %v2857_v55 = vmul.f32 %v5967_v33, %v2722_v13  ;;  %v3618_v57 = vsel %vm3447_vm9, %v3617_v14, %v3613_v61  ;;  %3090 = vadd.xlane.f32.xlu1 %v2850_v1  ;;  %v3171_v36 = vadd.f32 %v5892_v19, %v2961_v29 }
 0x389   :  { %v3623_v56 = vsel %vm3454_vm10, %v3622_v16, %v3618_v57  ;;  %v4774_v35 = vpop.f32.mrb[184].mxu0  ;;  %v2855_v32 = vmul.f32 %v5967_v33, %v2720_v23  ;;  %v3642_v54 = vrot.slane %v3170_v44, %v6007_v62 }
 0x38a   :  { %v2581_v43 = vadd.f32 %v5954_v60, %v4774_v35  ;;  %v2572_v45 = vpop.f32.mrb[185].mxu0  ;;  %3104 = vadd.xlane.f32.xlu0 %v2857_v55  ;;  %v3628_v18 = vsel %vm3461_vm11, %v3627_v0, %v3623_v56  ;;  %v2955_v20 = vpop.xlane.xlu0 %2954  ;;  %v3647_v6 = vrot.slane %v3171_v36, %v6017_v37 }
 0x38b   :  { %v3168_v4 = vadd.f32 %v5892_v19, %v2955_v20  ;;  %v4775_v26 = vpop.f32.mrb[186].mxu0  ;;  %v2957_v59 = vpop.xlane.xlu1 %2956  ;;  %v2573_v50 = vadd.f32 %v5954_v60, %v2572_v45 }
 0x38c   :  { %v2584_v38 = vadd.f32 %v5954_v60, %v4775_v26  ;;  %v3169_v41 = vadd.f32 %v5892_v19, %v2957_v59  ;;  %v2575_v46 = vpop.f32.mrb[187].mxu0  ;;  %3102 = vadd.xlane.f32.xlu1 %v2856_v63  ;;  %v2725_v49 = vmax.f32 %v2581_v43, 0.0 }
 0x38d   :  { %v3632_v30 = vrot.slane %v3168_v4, %v6020_v40  ;;  %v2576_v48 = vadd.f32 %v5954_v60, %v2575_v46  ;;  %v2723_v14 = vmax.f32 %v2573_v50, 0.0 }
 0x38e   :  { %v2726_v51 = vmax.f32 %v2584_v38, 0.0  ;;  %v3637_v52 = vrot.slane %v3169_v41, %v6023_v42  ;;  %3100 = vadd.xlane.f32.xlu0 %v2855_v32  ;;  %v2967_v11 = vpop.xlane.xlu0 %2966  ;;  %v2860_v13 = vmul.f32 %v5967_v33, %v2725_v49 }
 0x38f   :  { %v3633_v58 = vsel %vm3468_vm12, %v3632_v30, %v3628_v18  ;;  %v2969_v3 = vpop.xlane.xlu1 %2968  ;;  %v2724_v9 = vmax.f32 %v2576_v48, 0.0  ;;  %v3174_v0 = vadd.f32 %v5892_v19, %v2967_v11  ;;  %v2858_v20 = vmul.f32 %v5967_v33, %v2723_v14 }
 0x390   :  { %v2861_v22 = vmul.f32 %v5967_v33, %v2726_v51  ;;  %v3638_v8 = vsel %vm3475_vm13, %v3637_v52, %v3633_v58  ;;  %3098 = vadd.xlane.f32.xlu1 %v2854_v47  ;;  %v3175_v35 = vadd.f32 %v5892_v19, %v2969_v3 }
 0x391   :  { %v3643_v1 = vsel %vm3482_vm14, %v3642_v54, %v3638_v8  ;;  %v4778_v10 = vpop.f32.mrb[188].mxu0  ;;  %v2859_v56 = vmul.f32 %v5967_v33, %v2724_v9  ;;  %v3661_v32 = vrot.slane %v3174_v0, %v5903_v5 }
 0x392   :  { %v3648_v15 = vsel %vm3489_vm15, %v3647_v6, %v3643_v1  ;;  %v2588_v16 = vpop.f32.mrb[189].mxu0  ;;  %3112 = vadd.xlane.f32.xlu0 %v2861_v22  ;;  %v2963_v61 = vpop.xlane.xlu0 %2962  ;;  %v2597_v45 = vadd.f32 %v5954_v60, %v4778_v10  ;;  %v3666_v41 = vrot.slane %v3175_v35, %v5906_v7 }
 0x393   :  { %v6211_v29 = vsel %vm4046_vm0, %v3648_v15, %v6130_v53  ;;  %v2589_v55 = vadd.f32 %v5954_v60, %v2588_v16  ;;  %v3172_v57 = vadd.f32 %v5892_v19, %v2963_v61  ;;  %v4779_v23 = vpop.f32.mrb[190].mxu0  ;;  %v2965_v25 = vpop.xlane.xlu1 %2964  ;;  %vm4048_vm0 = vcmask 1043459  }
 0x394   :  { %v3173_v63 = vadd.f32 %v5892_v19, %v2965_v25  ;;  %v2591_v43 = vpop.f32.mrb[191].mxu0  ;;  %3110 = vadd.xlane.f32.xlu1 %v2860_v13  ;;  %v2600_v4 = vadd.f32 %v5954_v60, %v4779_v23  ;;  %v2729_v47 = vmax.f32 %v2597_v45, 0.0 }
 0x395   :  { %v3652_v53 = vrot.slane %v3172_v57, %v5898_v28  ;;  %v2592_v18 = vadd.f32 %v5954_v60, %v2591_v43  ;;  %v2727_v44 = vmax.f32 %v2589_v55, 0.0 }
 0x396   :  { %v3656_v26 = vrot.slane %v3173_v63, %v5909_v27  ;;  %3108 = vadd.xlane.f32.xlu0 %v2859_v56  ;;  %v2975_v59 = vpop.xlane.xlu0 %2974  ;;  %v2730_v49 = vmax.f32 %v2600_v4, 0.0  ;;  %v2864_v6 = vmul.f32 %v5967_v33, %v2729_v47 }
 0x397   :  { %v2728_v36 = vmax.f32 %v2592_v18, 0.0  ;;  %v2977_v38 = vpop.xlane.xlu1 %2976  ;;  %v2862_v60 = vmul.f32 %v5967_v33, %v2727_v44  ;;  %v3178_v52 = vadd.f32 %v5892_v19, %v2975_v59 }
 0x398   :  { %v3657_v46 = vsel %vm3391_vm1, %v3656_v26, %v3652_v53  ;;  %3106 = vadd.xlane.f32.xlu1 %v2858_v20  ;;  %v3179_v58 = vadd.f32 %v5892_v19, %v2977_v38  ;;  %v2865_v8 = vmul.f32 %v5967_v33, %v2730_v49 }
 0x399   :  { %v3662_v30 = vsel %vm3398_vm2, %v3661_v32, %v3657_v46  ;;  %v2863_v48 = vmul.f32 %v5967_v33, %v2728_v36  ;;  %v3681_v10 = vrot.slane %v3178_v52, %v5914_v2 }
 0x39a   :  { %v3667_v50 = vsel %vm3405_vm3, %v3666_v41, %v3662_v30  ;;  %v2971_v51 = vpop.xlane.xlu0 %2970  ;;  %v3686_v15 = vrot.slane %v3179_v58, %v5917_v21 }
 0x39b   :  { %v3176_v11 = vadd.f32 %v5892_v19, %v2971_v51  ;;  %v2973_v54 = vpop.xlane.xlu1 %2972  ;;  %3116 = vadd.xlane.f32.xlu0 %v2863_v48 }
 0x39c   :  { %v3177_v3 = vadd.f32 %v5892_v19, %v2973_v54  ;;  %3114 = vadd.xlane.f32.xlu1 %v2862_v60 }
 0x39d   :  { %v3671_v22 = vrot.slane %v3176_v11, %v5922_v34 }
 0x39e   :  { %v3676_v9 = vrot.slane %v3177_v3, %v5941_v24  ;;  %v2983_v1 = vpop.xlane.xlu0 %2982 }
 0x39f   :  { %v3672_v13 = vsel %vm3412_vm4, %v3671_v22, %v3667_v50  ;;  %v2985_v14 = vpop.xlane.xlu1 %2984  ;;  %3118 = vadd.xlane.f32.xlu0 %v2864_v6  ;;  %v3182_v33 = vadd.f32 %v5892_v19, %v2983_v1 }
 0x3a0   :  { %v3677_v16 = vsel %vm3419_vm5, %v3676_v9, %v3672_v13  ;;  %3120 = vadd.xlane.f32.xlu1 %v2865_v8  ;;  %v3183_v25 = vadd.f32 %v5892_v19, %v2985_v14 }
 0x3a1   :  { %v3682_v61 = vsel %vm3426_vm6, %v3681_v10, %v3677_v16  ;;  %v3701_v45 = vrot.slane %v3182_v33, %v5947_v17 }
 0x3a2   :  { %v3687_v0 = vsel %vm3433_vm7, %v3686_v15, %v3682_v61  ;;  %v2979_v55 = vpop.xlane.xlu0 %2978  ;;  %v3706_v20 = vrot.slane %v3183_v25, %v5958_v12 }
 0x3a3   :  { %v3180_v57 = vadd.f32 %v5892_v19, %v2979_v55  ;;  %v2981_v23 = vpop.xlane.xlu1 %2980 }
 0x3a4   :  { %v3181_v56 = vadd.f32 %v5892_v19, %v2981_v23 }
 0x3a5   :  { %v3691_v35 = vrot.slane %v3180_v57, %v5976_v31 }
 0x3a6   :  { %v3696_v63 = vrot.slane %v3181_v56, %v5981_v39  ;;  %v2991_v43 = vpop.xlane.xlu0 %2990 }
 0x3a7   :  { %v3692_v53 = vsel %vm3440_vm8, %v3691_v35, %v3687_v0  ;;  %v2993_v18 = vpop.xlane.xlu1 %2992  ;;  %v3186_v32 = vadd.f32 %v5892_v19, %v2991_v43 }
 0x3a8   :  { %v3697_v44 = vsel %vm3447_vm9, %v3696_v63, %v3692_v53  ;;  %v3187_v41 = vadd.f32 %v5892_v19, %v2993_v18 }
 0x3a9   :  { %v3702_v4 = vsel %vm3454_vm10, %v3701_v45, %v3697_v44  ;;  %v3721_v60 = vrot.slane %v3186_v32, %v6007_v62 }
 0x3aa   :  { %v3707_v26 = vsel %vm3461_vm11, %v3706_v20, %v3702_v4  ;;  %v2987_v59 = vpop.xlane.xlu0 %2986  ;;  %v3726_v51 = vrot.slane %v3187_v41, %v6017_v37 }
 0x3ab   :  { %v3184_v36 = vadd.f32 %v5892_v19, %v2987_v59  ;;  %v2989_v38 = vpop.xlane.xlu1 %2988 }
 0x3ac   :  { %v3185_v46 = vadd.f32 %v5892_v19, %v2989_v38 }
 0x3ad   :  { %v3711_v47 = vrot.slane %v3184_v36, %v6020_v40 }
 0x3ae   :  { %v3716_v30 = vrot.slane %v3185_v46, %v6023_v42  ;;  %v2999_v48 = vpop.xlane.xlu0 %2998 }
 0x3af   :  { %v3712_v49 = vsel %vm3468_vm12, %v3711_v47, %v3707_v26  ;;  %v3001_v50 = vpop.xlane.xlu1 %3000  ;;  %v3190_v6 = vadd.f32 %v5892_v19, %v2999_v48 }
 0x3b0   :  { %v3717_v52 = vsel %vm3475_vm13, %v3716_v30, %v3712_v49  ;;  %v3191_v9 = vadd.f32 %v5892_v19, %v3001_v50 }
 0x3b1   :  { %v3722_v11 = vsel %vm3482_vm14, %v3721_v60, %v3717_v52  ;;  %v3740_v15 = vrot.slane %v3190_v6, %v5903_v5 }
 0x3b2   :  { %v3727_v54 = vsel %vm3489_vm15, %v3726_v51, %v3722_v11  ;;  %v2995_v58 = vpop.xlane.xlu0 %2994 }
 0x3b3   :  { %v6271_v3 = vsel %vm4048_vm0, %v3727_v54, %v6211_v29  ;;  %v3188_v22 = vadd.f32 %v5892_v19, %v2995_v58  ;;  %v2997_v8 = vpop.xlane.xlu1 %2996  ;;  %v3745_v29 = vrot.slane %v3191_v9, %v5906_v7  ;;  %vm4050_vm0 = vcmask 1044484  }
 0x3b4   :  { %v3189_v1 = vadd.f32 %v5892_v19, %v2997_v8 }
 0x3b5   :  { %v3731_v10 = vrot.slane %v3188_v22, %v5898_v28 }
 0x3b6   :  { %v3735_v13 = vrot.slane %v3189_v1, %v5909_v27  ;;  %v3007_v14 = vpop.xlane.xlu0 %3006 }
 0x3b7   :  { %v3009_v16 = vpop.xlane.xlu1 %3008  ;;  %v3194_v57 = vadd.f32 %v5892_v19, %v3007_v14 }
 0x3b8   :  { %v3736_v61 = vsel %vm3391_vm1, %v3735_v13, %v3731_v10  ;;  %v3195_v56 = vadd.f32 %v5892_v19, %v3009_v16 }
 0x3b9   :  { %v3741_v0 = vsel %vm3398_vm2, %v3740_v15, %v3736_v61  ;;  %v3760_v53 = vrot.slane %v3194_v57, %v5914_v2 }
 0x3ba   :  { %v3746_v55 = vsel %vm3405_vm3, %v3745_v29, %v3741_v0  ;;  %v3003_v33 = vpop.xlane.xlu0 %3002  ;;  %v3765_v44 = vrot.slane %v3195_v56, %v5917_v21 }
 0x3bb   :  { %v3192_v23 = vadd.f32 %v5892_v19, %v3003_v33  ;;  %v3005_v25 = vpop.xlane.xlu1 %3004 }
 0x3bc   :  { %v3193_v35 = vadd.f32 %v5892_v19, %v3005_v25 }
 0x3bd   :  { %v3750_v63 = vrot.slane %v3192_v23, %v5922_v34 }
 0x3be   :  { %v3755_v43 = vrot.slane %v3193_v35, %v5941_v24  ;;  %v3015_v45 = vpop.xlane.xlu0 %3014 }
 0x3bf   :  { %v3751_v18 = vsel %vm3412_vm4, %v3750_v63, %v3746_v55  ;;  %v3017_v20 = vpop.xlane.xlu1 %3016  ;;  %v3198_v36 = vadd.f32 %v5892_v19, %v3015_v45 }
 0x3c0   :  { %v3756_v4 = vsel %vm3419_vm5, %v3755_v43, %v3751_v18  ;;  %v3199_v46 = vadd.f32 %v5892_v19, %v3017_v20 }
 0x3c1   :  { %v3761_v26 = vsel %vm3426_vm6, %v3760_v53, %v3756_v4  ;;  %v3780_v49 = vrot.slane %v3198_v36, %v5947_v17 }
 0x3c2   :  { %v3766_v59 = vsel %vm3433_vm7, %v3765_v44, %v3761_v26  ;;  %v3011_v32 = vpop.xlane.xlu0 %3010  ;;  %v3785_v52 = vrot.slane %v3199_v46, %v5958_v12 }
 0x3c3   :  { %v3196_v38 = vadd.f32 %v5892_v19, %v3011_v32  ;;  %v3013_v41 = vpop.xlane.xlu1 %3012 }
 0x3c4   :  { %v3197_v47 = vadd.f32 %v5892_v19, %v3013_v41 }
 0x3c5   :  { %v3770_v30 = vrot.slane %v3196_v38, %v5976_v31 }
 0x3c6   :  { %v3775_v48 = vrot.slane %v3197_v47, %v5981_v39  ;;  %v3023_v60 = vpop.xlane.xlu0 %3022 }
 0x3c7   :  { %v3771_v50 = vsel %vm3440_vm8, %v3770_v30, %v3766_v59  ;;  %v3025_v51 = vpop.xlane.xlu1 %3024  ;;  %v3202_v22 = vadd.f32 %v5892_v19, %v3023_v60 }
 0x3c8   :  { %v3776_v11 = vsel %vm3447_vm9, %v3775_v48, %v3771_v50  ;;  %v3203_v1 = vadd.f32 %v5892_v19, %v3025_v51 }
 0x3c9   :  { %v3781_v54 = vsel %vm3454_vm10, %v3780_v49, %v3776_v11  ;;  %v3800_v16 = vrot.slane %v3202_v22, %v6007_v62 }
 0x3ca   :  { %v3786_v58 = vsel %vm3461_vm11, %v3785_v52, %v3781_v54  ;;  %v3019_v6 = vpop.xlane.xlu0 %3018  ;;  %v3805_v0 = vrot.slane %v3203_v1, %v6017_v37 }
 0x3cb   :  { %v3200_v8 = vadd.f32 %v5892_v19, %v3019_v6  ;;  %v3021_v9 = vpop.xlane.xlu1 %3020 }
 0x3cc   :  { %v3201_v10 = vadd.f32 %v5892_v19, %v3021_v9 }
 0x3cd   :  { %v3790_v13 = vrot.slane %v3200_v8, %v6020_v40 }
 0x3ce   :  { %v3795_v14 = vrot.slane %v3201_v10, %v6023_v42  ;;  %v3031_v15 = vpop.xlane.xlu0 %3030 }
 0x3cf   :  { %v3791_v29 = vsel %vm3468_vm12, %v3790_v13, %v3786_v58  ;;  %v3033_v61 = vpop.xlane.xlu1 %3032  ;;  %v3206_v25 = vadd.f32 %v5892_v19, %v3031_v15 }
 0x3d0   :  { %v3796_v55 = vsel %vm3475_vm13, %v3795_v14, %v3791_v29  ;;  %v3207_v43 = vadd.f32 %v5892_v19, %v3033_v61 }
 0x3d1   :  { %v3801_v33 = vsel %vm3482_vm14, %v3800_v16, %v3796_v55  ;;  %v3819_v20 = vrot.slane %v3206_v25, %v5903_v5 }
 0x3d2   :  { %v3806_v57 = vsel %vm3489_vm15, %v3805_v0, %v3801_v33  ;;  %v3027_v23 = vpop.xlane.xlu0 %3026  ;;  %v3824_v26 = vrot.slane %v3207_v43, %v5906_v7 }
 0x3d3   :  { %v3204_v56 = vadd.f32 %v5892_v19, %v3027_v23  ;;  %v3029_v35 = vpop.xlane.xlu1 %3028  ;;  %v6323_v63 = vsel %vm4050_vm0, %v3806_v57, %v6271_v3  ;;  %vm4052_vm0 = vcmask 1045509  }
 0x3d4   :  { %v3205_v45 = vadd.f32 %v5892_v19, %v3029_v35 }
 0x3d5   :  { %v3810_v53 = vrot.slane %v3204_v56, %v5898_v28 }
 0x3d6   :  { %v3814_v18 = vrot.slane %v3205_v45, %v5909_v27 }
 0x3d7   :  { %v3039_v44 = vpop.xlane.xlu1 %3038  ;;  %v3041_v4 = vpop.xlane.xlu0 %3040 }
 0x3d8   :  { %v3815_v59 = vsel %vm3391_vm1, %v3814_v18, %v3810_v53  ;;  %v3210_v41 = vadd.f32 %v5892_v19, %v3039_v44  ;;  %v3211_v30 = vadd.f32 %v5892_v19, %v3041_v4 }
 0x3d9   :  { %v3820_v32 = vsel %vm3398_vm2, %v3819_v20, %v3815_v59 }
 0x3da   :  { %v3825_v3 = vsel %vm3405_vm3, %v3824_v26, %v3820_v32  ;;  %v3839_v51 = vrot.slane %v3210_v41, %v5914_v2  ;;  %v3844_v11 = vrot.slane %v3211_v30, %v5917_v21 }
 0x3db   :  { %v3035_v36 = vpop.xlane.xlu1 %3034  ;;  %v3037_v38 = vpop.xlane.xlu0 %3036 }
 0x3dc   :  { %v3208_v46 = vadd.f32 %v5892_v19, %v3035_v36  ;;  %v3209_v47 = vadd.f32 %v5892_v19, %v3037_v38 }
 0x3de   :  { %v3829_v48 = vrot.slane %v3208_v46, %v5922_v34  ;;  %v3834_v60 = vrot.slane %v3209_v47, %v5941_v24 }
 0x3df   :  { %v3047_v49 = vpop.xlane.xlu1 %3046  ;;  %v3049_v50 = vpop.xlane.xlu0 %3048 }
 0x3e0   :  { %v3830_v52 = vsel %vm3412_vm4, %v3829_v48, %v3825_v3  ;;  %v3214_v9 = vadd.f32 %v5892_v19, %v3047_v49  ;;  %v3215_v13 = vadd.f32 %v5892_v19, %v3049_v50 }
 0x3e1   :  { %v3835_v54 = vsel %vm3419_vm5, %v3834_v60, %v3830_v52 }
 0x3e2   :  { %v3840_v58 = vsel %vm3426_vm6, %v3839_v51, %v3835_v54  ;;  %v3859_v61 = vrot.slane %v3214_v9, %v5947_v17  ;;  %v3864_v55 = vrot.slane %v3215_v13, %v5958_v12 }
 0x3e3   :  { %v3043_v6 = vpop.xlane.xlu1 %3042  ;;  %v3845_v22 = vsel %vm3433_vm7, %v3844_v11, %v3840_v58  ;;  %v3045_v8 = vpop.xlane.xlu0 %3044 }
 0x3e4   :  { %v3212_v1 = vadd.f32 %v5892_v19, %v3043_v6  ;;  %v3213_v10 = vadd.f32 %v5892_v19, %v3045_v8 }
 0x3e6   :  { %v3849_v14 = vrot.slane %v3212_v1, %v5976_v31  ;;  %v3854_v15 = vrot.slane %v3213_v10, %v5981_v39 }
 0x3e7   :  { %v3055_v16 = vpop.xlane.xlu1 %3054  ;;  %v3057_v29 = vpop.xlane.xlu0 %3056 }
 0x3e8   :  { %v3850_v0 = vsel %vm3440_vm8, %v3849_v14, %v3845_v22  ;;  %v3218_v35 = vadd.f32 %v5892_v19, %v3055_v16  ;;  %v3219_v53 = vadd.f32 %v5892_v19, %v3057_v29 }
 0x3e9   :  { %v3855_v33 = vsel %vm3447_vm9, %v3854_v15, %v3850_v0 }
 0x3ea   :  { %v3860_v57 = vsel %vm3454_vm10, %v3859_v61, %v3855_v33  ;;  %v3879_v4 = vrot.slane %v3218_v35, %v6007_v62  ;;  %v3884_v59 = vrot.slane %v3219_v53, %v6017_v37 }
 0x3eb   :  { %v3051_v23 = vpop.xlane.xlu1 %3050  ;;  %v3865_v25 = vsel %vm3461_vm11, %v3864_v55, %v3860_v57  ;;  %v3053_v56 = vpop.xlane.xlu0 %3052 }
 0x3ec   :  { %v3216_v43 = vadd.f32 %v5892_v19, %v3051_v23  ;;  %v3217_v45 = vadd.f32 %v5892_v19, %v3053_v56 }
 0x3ee   :  { %v3869_v18 = vrot.slane %v3216_v43, %v6020_v40  ;;  %v3874_v20 = vrot.slane %v3217_v45, %v6023_v42 }
 0x3ef   :  { %v3063_v44 = vpop.xlane.xlu0 %3062  ;;  %v3059_v3 = vpop.xlane.xlu1 %3058 }
 0x3f0   :  { %v3870_v26 = vsel %vm3468_vm12, %v3869_v18, %v3865_v25  ;;  %v3220_v11 = vadd.f32 %v5892_v19, %v3059_v3  ;;  %v3222_v22 = vadd.f32 %v5892_v19, %v3063_v44 }
 0x3f1   :  { %v3875_v32 = vsel %vm3475_vm13, %v3874_v20, %v3870_v26 }
 0x3f2   :  { %v3880_v36 = vsel %vm3482_vm14, %v3879_v4, %v3875_v32  ;;  %v3898_v13 = vrot.slane %v3222_v22, %v5903_v5 }
 0x3f3   :  { %v3885_v38 = vsel %vm3489_vm15, %v3884_v59, %v3880_v36  ;;  %v3065_v41 = vpop.xlane.xlu0 %3064 }
 0x3f4   :  { %v6371_v46 = vsel %vm4052_vm0, %v3885_v38, %v6323_v63  ;;  %v3889_v63 = vrot.slane %v3220_v11, %v5898_v28  ;;  %v3223_v9 = vadd.f32 %v5892_v19, %v3065_v41 }
 0x3f5   :  { %v3071_v47 = vpop.xlane.xlu1 %3070 }
 0x3f6   :  { %v3903_v61 = vrot.slane %v3223_v9, %v5906_v7  ;;  %v3226_v25 = vadd.f32 %v5892_v19, %v3071_v47 }
 0x3f7   :  { %v3061_v30 = vpop.xlane.xlu0 %3060 }
 0x3f8   :  { %v3221_v51 = vadd.f32 %v5892_v19, %v3061_v30  ;;  %v3918_v18 = vrot.slane %v3226_v25, %v5914_v2 }
 0x3f9   :  { %v3067_v48 = vpop.xlane.xlu1 %3066 }
 0x3fa   :  { %v3893_v58 = vrot.slane %v3221_v51, %v5909_v27  ;;  %v3224_v14 = vadd.f32 %v5892_v19, %v3067_v48 }
 0x3fb   :  { %v3073_v60 = vpop.xlane.xlu0 %3072 }
 0x3fc   :  { %v3894_v1 = vsel %vm3391_vm1, %v3893_v58, %v3889_v63  ;;  %v3908_v55 = vrot.slane %v3224_v14, %v5922_v34  ;;  %v3227_v43 = vadd.f32 %v5892_v19, %v3073_v60 }
 0x3fd   :  { %v3079_v49 = vpop.xlane.xlu1 %3078  ;;  %v3899_v29 = vsel %vm3398_vm2, %v3898_v13, %v3894_v1 }
 0x3fe   :  { %v3904_v33 = vsel %vm3405_vm3, %v3903_v61, %v3899_v29  ;;  %v3923_v3 = vrot.slane %v3227_v43, %v5917_v21  ;;  %v3230_v51 = vadd.f32 %v5892_v19, %v3079_v49 }
 0x3ff   :  { %v3069_v50 = vpop.xlane.xlu0 %3068  ;;  %v3909_v35 = vsel %vm3412_vm4, %v3908_v55, %v3904_v33 }
 0x400   :  { %v3225_v15 = vadd.f32 %v5892_v19, %v3069_v50 }
 0x401   :  { %v3075_v52 = vpop.xlane.xlu1 %3074 }
 0x402   :  { %v3913_v57 = vrot.slane %v3225_v15, %v5941_v24  ;;  %v3228_v20 = vadd.f32 %v5892_v19, %v3075_v52 }
 0x403   :  { %v3081_v54 = vpop.xlane.xlu0 %3080 }
 0x404   :  { %v3914_v45 = vsel %vm3419_vm5, %v3913_v57, %v3909_v35  ;;  %v3928_v38 = vrot.slane %v3228_v20, %v5976_v31 }
 0x405   :  { %v6376_v6 = vpop.xlane.xlu1 %3086  ;;  %v3919_v59 = vsel %vm3426_vm6, %v3918_v18, %v3914_v45 }
 0x406   :  { %v3924_v30 = vsel %vm3433_vm7, %v3923_v3, %v3919_v59 }
 0x407   :  { %v3077_v8 = vpop.xlane.xlu0 %3076  ;;  %v3929_v22 = vsel %vm3440_vm8, %v3928_v38, %v3924_v30 }
 0x408   :  { %v3229_v44 = vadd.f32 %v5892_v19, %v3077_v8 }
 0x409   :  { %v3083_v10 = vpop.xlane.xlu1 %3082 }
 0x40a   :  { %v3933_v48 = vrot.slane %v3229_v44, %v5981_v39  ;;  %v3232_v49 = vadd.f32 %v5892_v19, %v3083_v10 }
 0x40b   :  { %v3085_v16 = vpop.xlane.xlu0 %3084 }
 0x40c   :  { %v3934_v8 = vsel %vm3447_vm9, %v3933_v48, %v3929_v22  ;;  %v3233_v33 = vadd.f32 %v5892_v19, %v3085_v16  ;;  %v3948_v25 = vrot.slane %v3232_v49, %v6020_v40  ;;  %v3234_v16 = vadd.f32 %v5892_v19, %v6376_v6 }
 0x40d   :  { %v6387_v0 = vpop.xlane.xlu1 %3088 }
 0x40e   :  { %v3235_v59 = vadd.f32 %v5892_v19, %v6387_v0  ;;  %v3958_v48 = vrot.slane %v3234_v16, %v6007_v62 }
 0x40f   :  { %v3097_v23 = vpop.xlane.xlu0 %3096 }
 0x410   :  { %v3239_v52 = vadd.f32 %v5892_v19, %v3097_v23 }
 0x411   :  { %v3095_v56 = vpop.xlane.xlu1 %3094 }
 0x412   :  { %v3238_v41 = vadd.f32 %v5892_v19, %v3095_v56  ;;  %v3982_v15 = vrot.slane %v3239_v52, %v5906_v7 }
 0x413   :  { %v3093_v53 = vpop.xlane.xlu0 %3092 }
 0x414   :  { %v3237_v4 = vadd.f32 %v5892_v19, %v3093_v53  ;;  %v3977_v63 = vrot.slane %v3238_v41, %v5903_v5 }
 0x415   :  { %v3091_v26 = vpop.xlane.xlu1 %3090 }
 0x416   :  { %v3236_v32 = vadd.f32 %v5892_v19, %v3091_v26  ;;  %v3972_v60 = vrot.slane %v3237_v4, %v5909_v27  ;;  %v3938_v27 = vrot.slane %v3230_v51, %v5947_v17 }
 0x417   :  { %v3105_v36 = vpop.xlane.xlu0 %3104 }
 0x418   :  { %v3968_v47 = vrot.slane %v3236_v32, %v5898_v28  ;;  %v3231_v28 = vadd.f32 %v5892_v19, %v3081_v54  ;;  %v3939_v5 = vsel %vm3454_vm10, %v3938_v27, %v3934_v8  ;;  %v3243_v35 = vadd.f32 %v5892_v19, %v3105_v36 }
 0x419   :  { %v3103_v50 = vpop.xlane.xlu1 %3102 }
 0x41a   :  { %v3973_v11 = vsel %vm3391_vm1, %v3972_v60, %v3968_v47  ;;  %v3242_v54 = vadd.f32 %v5892_v19, %v3103_v50  ;;  %v3943_v55 = vrot.slane %v3231_v28, %v5958_v12  ;;  %vm4054_vm1 = vcmask 1046534  }
 0x41b   :  { %v3101_v58 = vpop.xlane.xlu0 %3100  ;;  %v3978_v13 = vsel %vm3398_vm2, %v3977_v63, %v3973_v11  ;;  %vm4056_vm2 = vcmask 1047559  }
 0x41c   :  { %v3241_v9 = vadd.f32 %v5892_v19, %v3101_v58  ;;  %v3983_v10 = vsel %vm3405_vm3, %v3982_v15, %v3978_v13  ;;  %v3944_v56 = vsel %vm3461_vm11, %v3943_v55, %v3939_v5  ;;  %v3997_v45 = vrot.slane %v3242_v54, %v5914_v2 }
 0x41d   :  { %v3099_v1 = vpop.xlane.xlu1 %3098  ;;  %v3949_v20 = vsel %vm3468_vm12, %v3948_v25, %v3944_v56  ;;  %v4002_v2 = vrot.slane %v3243_v35, %v5917_v21 }
 0x41e   :  { %v3240_v14 = vadd.f32 %v5892_v19, %v3099_v1  ;;  %v3992_v57 = vrot.slane %v3241_v9, %v5941_v24  ;;  %v3953_v24 = vrot.slane %v3233_v33, %v6023_v42 }
 0x41f   :  { %v3113_v29 = vpop.xlane.xlu0 %3112 }
 0x420   :  { %v3987_v61 = vrot.slane %v3240_v14, %v5922_v34  ;;  %v3247_v6 = vadd.f32 %v5892_v19, %v3113_v29  ;;  %v3954_v36 = vsel %vm3475_vm13, %v3953_v24, %v3949_v20 }
 0x421   :  { %v3111_v23 = vpop.xlane.xlu1 %3110 }
 0x422   :  { %v3988_v7 = vsel %vm3412_vm4, %v3987_v61, %v3983_v10  ;;  %v3246_v44 = vadd.f32 %v5892_v19, %v3111_v23  ;;  %v4022_v50 = vrot.slane %v3247_v6, %v5958_v12 }
 0x423   :  { %v3993_v43 = vsel %vm3419_vm5, %v3992_v57, %v3988_v7  ;;  %v3109_v34 = vpop.xlane.xlu0 %3108 }
 0x424   :  { %v3245_v53 = vadd.f32 %v5892_v19, %v3109_v34  ;;  %v3998_v26 = vsel %vm3426_vm6, %v3997_v45, %v3993_v43  ;;  %v4017_v0 = vrot.slane %v3246_v44, %v5947_v17 }
 0x425   :  { %v3107_v18 = vpop.xlane.xlu1 %3106  ;;  %v4003_v41 = vsel %vm3433_vm7, %v4002_v2, %v3998_v26 }
 0x426   :  { %v3244_v4 = vadd.f32 %v5892_v19, %v3107_v18  ;;  %v4012_v38 = vrot.slane %v3245_v53, %v5981_v39  ;;  %v3959_v39 = vsel %vm3482_vm14, %v3958_v48, %v3954_v36 }
 0x428   :  { %v4007_v32 = vrot.slane %v3244_v4, %v5976_v31  ;;  %v3117_v3 = vpop.xlane.xlu0 %3116  ;;  %v3963_v31 = vrot.slane %v3235_v59, %v6017_v37 }
 0x429   :  { %v3249_v47 = vadd.f32 %v5892_v19, %v3117_v3  ;;  %v3115_v30 = vpop.xlane.xlu1 %3114 }
 0x42a   :  { %v4008_v21 = vsel %vm3440_vm8, %v4007_v32, %v4003_v41  ;;  %v3248_v60 = vadd.f32 %v5892_v19, %v3115_v30  ;;  %v3964_v9 = vsel %vm3489_vm15, %v3963_v31, %v3959_v39 }
 0x42b   :  { %v4013_v51 = vsel %vm3447_vm9, %v4012_v38, %v4008_v21  ;;  %v4032_v22 = vrot.slane %v3249_v47, %v6023_v42  ;;  %v4055_v49 = vsel %vm4054_vm1, %v3964_v9, %v6371_v46 }
 0x42c   :  { %v4018_v52 = vsel %vm3454_vm10, %v4017_v0, %v4013_v51  ;;  %v4027_v11 = vrot.slane %v3248_v60, %v6020_v40  ;;  %v3119_v58 = vpop.xlane.xlu0 %3118 }
 0x42d   :  { %v4023_v17 = vsel %vm3461_vm11, %v4022_v50, %v4018_v52  ;;  %v3250_v63 = vadd.f32 %v5892_v19, %v3119_v58  ;;  %v3121_v28 = vpop.xlane.xlu1 %3120 }
 0x42e   :  { %v4028_v8 = vsel %vm3468_vm12, %v4027_v11, %v4023_v17  ;;  %v3251_v12 = vadd.f32 %v5892_v19, %v3121_v28 }
 0x42f   :  { %v4033_v1 = vsel %vm3475_vm13, %v4032_v22, %v4028_v8  ;;  %v4037_v27 = vrot.slane %v3250_v63, %v6007_v62 }
 0x430   :  { %v4042_v40 = vrot.slane %v3251_v12, %v6017_v37 }
 0x431   :  { %v4038_v42 = vsel %vm3482_vm14, %v4037_v27, %v4033_v1 }
 0x432   :  { %v4043_v13 = vsel %vm3489_vm15, %v4042_v40, %v4038_v42 }
 0x433   :  { %v4057_v14 = vsel %vm4056_vm2, %v4043_v13, %v4055_v49 }
 0x434   :  { %4059 = vst [vmem:[%s6486_s9] sm:$0xff] %v4057_v14 }

</bundles_post_ra>
